<compile_context>
chip_gen: v7x
topology: tpu7x:2x2x1
jax: 0.10.0
libtpu: 0.0.40
codegen_flags: <defaults>
</compile_context>

<pallas_src>
import math

import jax
import jax.numpy as jnp
from jax.experimental import pallas as pl
from jax.experimental.pallas import tpu as pltpu


_VMEM = pl.BlockSpec(memory_space=pltpu.MemorySpace.VMEM)
_SUBLANE = 8
_LANE = 128


def _round_up(x, m):
    return -(-x // m) * m


# --------------------------- fused kernel factory --------------------------- #

def _make_fused_lstm_kernel(T, BP, H, HP, num_layers, num_dirs):
    """Builds the fused whole-model kernel for a static configuration.

    Layouts (all built once in prepare_params):
      hidden vreg  : (BP, HP)    lanes [0:H)=fwd, [H:2H)=bwd, rest 0
      gate block   : (BP, 4*HP)  blocks (i, f, o, g), each HP lanes, per-direction
                     sub-lanes [0:H)=fwd, [H:2H)=bwd, rest 0
      W_ih         : (in_rows, 4*HP)   W_hh: (HP, 4*HP) block-diagonal over dirs
    """

    def kernel(*refs):
        pos = 0
        x_ref = refs[pos]; pos += 1                      # (T*BP, I) rows t*BP + b
        layer_refs = []
        for _ in range(num_layers):
            layer_refs.append((refs[pos], refs[pos + 1], refs[pos + 2]))
            pos += 3
        wlin_ref = refs[pos]                             # (HP, C_pad) bf16
        blin_ref = refs[pos + 1]                         # (1, C_pad)  f32
        out_ref = refs[pos + 2]                          # (BP, C_pad) f32

        # Direction lane masks (hoisted; fwd lanes are [0:H) in every HP block).
        if num_dirs == 2:
            hid_lane = jax.lax.broadcasted_iota(jnp.int32, (BP, HP), 1)
            hid_fwd = hid_lane < H                                   # (BP, HP)
            gate_fwd = jnp.concatenate([hid_fwd] * 4, axis=1)        # (BP, 4*HP)
        else:
            hid_fwd = gate_fwd = None

        def mxu(a, b):
            # bf16 operands, f32 accumulate (single-pass MXU); b is pre-cast.
            return jnp.dot(a.astype(jnp.bfloat16), b,
                           preferred_element_type=jnp.float32)

        def cell(g, h, c):
            # Gate blocks (i, f, o, g), each a full 128-lane (vreg-aligned) slice.
            sig = jax.nn.sigmoid(g[:, :3 * HP])
            i_g = sig[:, 0 * HP:1 * HP]
            f_g = sig[:, 1 * HP:2 * HP]
            o_g = sig[:, 2 * HP:3 * HP]
            g_g = jnp.tanh(g[:, 3 * HP:])
            c_new = f_g * c + i_g * g_g
            h_new = o_g * jnp.tanh(c_new)
            return h_new, c_new

        seq = x_ref[...]                                  # (T*BP, K) f32
        for layer in range(num_layers):
            wih_ref, whh_ref, b_ref = layer_refs[layer]
            is_last = layer == num_layers - 1

            # Hoisted input projection + bias for all time steps at once.
            gx = mxu(seq, wih_ref[...]) + b_ref[...]      # (T*BP, 4*HP) f32
            whh = whh_ref[...]                            # (HP, 4*HP) bf16

            h = jnp.zeros((BP, HP), jnp.float32)
            c = jnp.zeros((BP, HP), jnp.float32)
            hs = []
            for s in range(T):                            # static unroll (T small)
                if num_dirs == 2 and not is_last:
                    # fwd lanes process t = s, bwd lanes process t = T-1-s
                    # (one select over 4 vregs; no lane movement).
                    g_in = jnp.where(gate_fwd,
                                     gx[s * BP:(s + 1) * BP, :],
                                     gx[(T - 1 - s) * BP:(T - s) * BP, :])
                else:
                    g_in = gx[s * BP:(s + 1) * BP, :]
                g = g_in + mxu(h, whh)
                h, c = cell(g, h, c)
                if not is_last:
                    hs.append(h)

            if not is_last:
                # Re-assemble the time-ordered sequence [h_fwd(t) | h_bwd(t)].
                if num_dirs == 2:
                    seq = jnp.concatenate(
                        [jnp.where(hid_fwd, hs[t], hs[T - 1 - t])
                         for t in range(T)], axis=0)
                else:
                    seq = jnp.concatenate(hs, axis=0)
            else:
                # Head consumes output[:, -1, :]. Forward lanes: end of the full
                # scan. Backward lanes at t = T-1: a single cell step from zero
                # state on the t = T-1 input row (the reverse direction's first
                # step). Valid only because the head reads the last time step.
                h_head = h
                if num_dirs == 2:
                    h_step, _ = cell(gx[(T - 1) * BP:T * BP, :],
                                     jnp.zeros_like(h), jnp.zeros_like(c))
                    h_head = jnp.where(hid_fwd, h, h_step)
                # Lane-dense padded head output (unmasked store).
                out_ref[...] = mxu(h_head, wlin_ref[...]) + blin_ref[...]

    return kernel


# ------------------------------ parameters ---------------------------------- #

def init_params(key, input_size, hidden_size, num_layers, bidirectional, num_classes):
    """Parameter init mirroring torch.nn.LSTM / Linear shapes & ranges."""
    k = 1.0 / math.sqrt(hidden_size)
    num_dirs = 2 if bidirectional else 1
    params = {"lstm": [], "bidirectional": bidirectional}

    def uniform(key, shape, bound):
        return jax.random.uniform(key, shape, jnp.float32, -bound, bound)

    for layer in range(num_layers):
        in_dim = input_size if layer == 0 else hidden_size * num_dirs
        layer_params = {}
        for name in ["fwd", "bwd"][:num_dirs]:
            key, k1, k2, k3, k4 = jax.random.split(key, 5)
            layer_params[name] = (
                uniform(k1, (4 * hidden_size, in_dim), k),       # weight_ih
                uniform(k2, (4 * hidden_size, hidden_size), k),  # weight_hh
                uniform(k3, (4 * hidden_size,), k),              # bias_ih
                uniform(k4, (4 * hidden_size,), k),              # bias_hh
            )
        params["lstm"].append(layer_params)

    key, k1, k2 = jax.random.split(key, 3)
    kl = 1.0 / math.sqrt(hidden_size * num_dirs)
    params["linear"] = (
        uniform(k1, (num_classes, hidden_size * num_dirs), kl),  # weight
        uniform(k2, (num_classes,), kl),                         # bias
    )
    return params


def prepare_params(params, hidden_size, num_classes):
    """One-time repack into kernel-ready layout.

    * gate blocks reordered (torch i,f,g,o) -> (i,f,o,g), each padded to 128 lanes
    * both directions packed side by side (block-diagonal W_hh over directions)
    * biases combined (b_ih + b_hh); matmul weights cast to bf16
    * linear head padded to a 128-lane output
    """
    H = hidden_size
    num_dirs = 2 if params["bidirectional"] else 1
    DH = num_dirs * H
    HP = _round_up(max(DH, _LANE), _LANE)
    CP = _round_up(max(num_classes, _LANE), _LANE)
    gate_block = (0, 1, 3, 2)   # torch gate q (i,f,g,o) -> kernel block (i,f,o,g)

    layers = []
    for li, layer in enumerate(params["lstm"]):
        in_dim = layer["fwd"][0].shape[1]          # I for layer 0, DH afterwards
        rows = in_dim if li == 0 else HP
        wih = jnp.zeros((rows, 4 * HP), jnp.float32)
        whh = jnp.zeros((HP, 4 * HP), jnp.float32)
        bias = jnp.zeros((1, 4 * HP), jnp.float32)
        for d, name in enumerate(["fwd", "bwd"][:num_dirs]):
            w_ih, w_hh, b_ih, b_hh = layer[name]
            b = b_ih + b_hh
            for q in range(4):
                c0 = gate_block[q] * HP + d * H
                wih = wih.at[:in_dim, c0:c0 + H].set(w_ih[q * H:(q + 1) * H, :].T)
                whh = whh.at[d * H:(d + 1) * H, c0:c0 + H].set(
                    w_hh[q * H:(q + 1) * H, :].T)
                bias = bias.at[0, c0:c0 + H].set(b[q * H:(q + 1) * H])
        layers.append((wih.astype(jnp.bfloat16), whh.astype(jnp.bfloat16), bias))

    w_lin, b_lin = params["linear"]                                  # (C, DH), (C,)
    wlin = jnp.zeros((HP, CP), jnp.float32).at[:DH, :num_classes].set(w_lin.T)
    blin = jnp.zeros((1, CP), jnp.float32).at[0, :num_classes].set(b_lin)

    return {
        "bidirectional": params["bidirectional"],
        "hidden_size": H,
        "num_classes": num_classes,
        "hp": HP,
        "cp": CP,
        "layers": layers,
        "wlin": wlin.astype(jnp.bfloat16),
        "blin": blin,
    }


# ------------------------------- forward ------------------------------------ #

def lstm_benchmark_forward(prepped, x_bti):
    """Forward pass of LSTMBenchmarkModel. x_bti: (B, T, input_size) -> (B, num_classes)."""
    B, T, I = x_bti.shape
    H = prepped["hidden_size"]
    HP = prepped["hp"]
    CP = prepped["cp"]
    C = prepped["num_classes"]
    num_dirs = 2 if prepped["bidirectional"] else 1
    num_layers = len(prepped["layers"])
    BP = _round_up(B, _SUBLANE)

    # Time-major rows t*BP + b, batch padded to a full sublane tile.
    x = jnp.transpose(x_bti, (1, 0, 2)).astype(jnp.float32)      # (T, B, I)
    if BP != B:
        x = jnp.pad(x, ((0, 0), (0, BP - B), (0, 0)))
    x = x.reshape(T * BP, I)

    kernel = _make_fused_lstm_kernel(T, BP, H, HP, num_layers, num_dirs)

    args = [x]
    for wih, whh, b in prepped["layers"]:
        args += [wih, whh, b]
    args += [prepped["wlin"], prepped["blin"]]

    # Advisory cost estimate so XLA schedules around this latency-bound call.
    flops, trans = 0, 0
    k = I
    for _ in range(num_layers):
        flops += 2 * (T * BP) * k * (4 * HP)       # hoisted input projection
        flops += 2 * T * BP * HP * (4 * HP)        # per-step recurrent matmuls
        flops += 12 * T * BP * HP                  # cell elementwise
        trans += T * BP * 5 * HP                   # sigmoid + tanh
        k = HP
    flops += 2 * BP * HP * CP
    bytes_accessed = sum(int(a.size) * a.dtype.itemsize for a in args) + BP * CP * 4

    out_padded = pl.pallas_call(
        kernel,
        out_shape=jax.ShapeDtypeStruct((BP, CP), jnp.float32),
        in_specs=[_VMEM] * len(args),
        out_specs=_VMEM,
        cost_estimate=pl.CostEstimate(flops=flops, transcendentals=trans,
                                      bytes_accessed=bytes_accessed),
    )(*args)
    return out_padded[:B, :C]


# ----------------------------- pure-JAX reference ---------------------------- #

def _reference_forward(params, x_bti):
    """Straightforward jnp reference matching torch.nn.LSTM(batch_first) + Linear."""
    x = x_bti.astype(jnp.float32)
    B, T, _ = x.shape
    bidirectional = params["bidirectional"]

    def run_dir(seq, w_ih, w_hh, b_ih, b_hh, reverse):
        Hh = w_hh.shape[1]
        h = jnp.zeros((B, Hh), jnp.float32)
        c = jnp.zeros((B, Hh), jnp.float32)
        outs = [None] * T
        order = range(T - 1, -1, -1) if reverse else range(T)
        for t in order:
            g = seq[:, t, :] @ w_ih.T + h @ w_hh.T + b_ih + b_hh
            i = jax.nn.sigmoid(g[:, 0 * Hh:1 * Hh])
            f = jax.nn.sigmoid(g[:, 1 * Hh:2 * Hh])
            gg = jnp.tanh(g[:, 2 * Hh:3 * Hh])
            o = jax.nn.sigmoid(g[:, 3 * Hh:4 * Hh])
            c = f * c + i * gg
            h = o * jnp.tanh(c)
            outs[t] = h
        return jnp.stack(outs, axis=1)                  # (B, T, H)

    seq = x
    for layer in params["lstm"]:
        y = run_dir(seq, *layer["fwd"], reverse=False)
        if bidirectional:
            yb = run_dir(seq, *layer["bwd"], reverse=True)
            seq = jnp.concatenate([y, yb], axis=-1)
        else:
            seq = y
    w, b = params["linear"]
    return seq[:, -1, :] @ w.T + b


# ------------------------------ entry point ---------------------------------- #

if __name__ == "__main__":
    batch_size = 2
    seq_len = 8
    input_size = 16
    hidden_size = 32
    num_layers = 2
    bidirectional = True
    num_classes = 10

    key = jax.random.PRNGKey(0)
    key, pkey, xkey = jax.random.split(key, 3)
    params = init_params(pkey, input_size, hidden_size, num_layers,
                         bidirectional, num_classes)
    prepped = prepare_params(params, hidden_size, num_classes)
    x = jax.random.normal(xkey, (batch_size, seq_len, input_size), jnp.float32)

    fwd = jax.jit(lambda xx: lstm_benchmark_forward(prepped, xx))
    out = fwd(x)
    jax.block_until_ready(out)
    assert out.shape == (batch_size, num_classes)

    # Sanity check vs the pure-JAX reference (tolerance covers bf16 MXU operands).
    with jax.default_matmul_precision("float32"):
        ref = jax.jit(lambda xx: _reference_forward(params, xx))(x)
    jax.block_until_ready(ref)
    max_err = float(jnp.max(jnp.abs(out - ref)))
    assert max_err < 3e-2, f"mismatch vs reference: {max_err}"

    print("KERNEL_OK")
</pallas_src>

<mosaic_0001>
module attributes {stable_mosaic.version = 11 : i64} {
  func.func @kernel(%arg0: memref<64x16xf32, #tpu.memory_space<vmem>>, %arg1: memref<16x512xbf16, #tpu.memory_space<vmem>>, %arg2: memref<128x512xbf16, #tpu.memory_space<vmem>>, %arg3: memref<1x512xf32, #tpu.memory_space<vmem>>, %arg4: memref<128x512xbf16, #tpu.memory_space<vmem>>, %arg5: memref<128x512xbf16, #tpu.memory_space<vmem>>, %arg6: memref<1x512xf32, #tpu.memory_space<vmem>>, %arg7: memref<128x128xbf16, #tpu.memory_space<vmem>>, %arg8: memref<1x128xf32, #tpu.memory_space<vmem>>, %arg9: memref<8x128xf32, #tpu.memory_space<vmem>>) attributes {dimension_semantics = [], scalar_prefetch = 0 : i64, scratch_operands = 0 : i64, tpu.core_type = #tpu.core_type<tc>} {
    %0 = tpu.iota {dimensions = array<i32: 1>} : vector<8x128xi32>
    %c32_i32 = arith.constant 32 : i32
    %1 = vector.broadcast %c32_i32 : i32 to vector<8x128xi32>
    %2 = arith.cmpi slt, %0, %1 : vector<8x128xi32>
    %3 = tpu.concatenate %2, %2, %2, %2 in 1 : vector<8x128xi1>, vector<8x128xi1>, vector<8x128xi1>, vector<8x128xi1> -> vector<8x512xi1>
    %c0 = arith.constant 0 : index
    %c0_0 = arith.constant 0 : index
    %4 = vector.load %arg0[%c0, %c0_0] : memref<64x16xf32, #tpu.memory_space<vmem>>, vector<64x16xf32>
    %c0_1 = arith.constant 0 : index
    %c0_2 = arith.constant 0 : index
    %5 = vector.load %arg1[%c0_1, %c0_2] : memref<16x512xbf16, #tpu.memory_space<vmem>>, vector<16x512xbf16>
    %6 = arith.truncf %4 : vector<64x16xf32> to vector<64x16xbf16>
    %cst = arith.constant dense<0.000000e+00> : vector<64x512xf32>
    %7 = tpu.matmul %6, %5, %cst {dimension_numbers = #tpu.dot_dimension_numbers<[1], [0], [0], [1], [0, 0, 1, 1], [], []>} : vector<64x16xbf16>, vector<16x512xbf16>, vector<64x512xf32> -> vector<64x512xf32>
    %c0_3 = arith.constant 0 : index
    %c0_4 = arith.constant 0 : index
    %8 = vector.load %arg3[%c0_3, %c0_4] : memref<1x512xf32, #tpu.memory_space<vmem>>, vector<1x512xf32>
    %9 = vector.broadcast %8 : vector<1x512xf32> to vector<64x512xf32>
    %10 = arith.addf %7, %9 : vector<64x512xf32>
    %c0_5 = arith.constant 0 : index
    %c0_6 = arith.constant 0 : index
    %11 = vector.load %arg2[%c0_5, %c0_6] : memref<128x512xbf16, #tpu.memory_space<vmem>>, vector<128x512xbf16>
    %cst_7 = arith.constant 0.000000e+00 : f32
    %12 = vector.broadcast %cst_7 : f32 to vector<8x128xf32>
    %cst_8 = arith.constant 0.000000e+00 : f32
    %13 = vector.broadcast %cst_8 : f32 to vector<8x128xf32>
    %14 = vector.extract_strided_slice %10 {offsets = [0, 0], sizes = [8, 512], strides = [1, 1]} : vector<64x512xf32> to vector<8x512xf32>
    %15 = vector.extract_strided_slice %10 {offsets = [56, 0], sizes = [8, 512], strides = [1, 1]} : vector<64x512xf32> to vector<8x512xf32>
    %16 = arith.select %3, %14, %15 : vector<8x512xi1>, vector<8x512xf32>
    %17 = arith.truncf %12 : vector<8x128xf32> to vector<8x128xbf16>
    %cst_9 = arith.constant dense<0.000000e+00> : vector<8x512xf32>
    %18 = tpu.matmul %17, %11, %cst_9 {dimension_numbers = #tpu.dot_dimension_numbers<[1], [0], [0], [1], [0, 0, 1, 1], [], []>} : vector<8x128xbf16>, vector<128x512xbf16>, vector<8x512xf32> -> vector<8x512xf32>
    %19 = arith.addf %16, %18 : vector<8x512xf32>
    %20 = vector.extract_strided_slice %19 {offsets = [0, 0], sizes = [8, 384], strides = [1, 1]} : vector<8x512xf32> to vector<8x384xf32>
    %21 = arith.negf %20 : vector<8x384xf32>
    %22 = math.exp %21 : vector<8x384xf32>
    %cst_10 = arith.constant 1.000000e+00 : f32
    %23 = vector.broadcast %cst_10 : f32 to vector<8x384xf32>
    %24 = arith.addf %23, %22 : vector<8x384xf32>
    %25 = arith.divf %23, %24 : vector<8x384xf32>
    %26 = vector.extract_strided_slice %25 {offsets = [0, 0], sizes = [8, 128], strides = [1, 1]} : vector<8x384xf32> to vector<8x128xf32>
    %27 = vector.extract_strided_slice %25 {offsets = [0, 128], sizes = [8, 128], strides = [1, 1]} : vector<8x384xf32> to vector<8x128xf32>
    %28 = vector.extract_strided_slice %25 {offsets = [0, 256], sizes = [8, 128], strides = [1, 1]} : vector<8x384xf32> to vector<8x128xf32>
    %29 = vector.extract_strided_slice %19 {offsets = [0, 384], sizes = [8, 128], strides = [1, 1]} : vector<8x512xf32> to vector<8x128xf32>
    %30 = math.tanh %29 : vector<8x128xf32>
    %31 = arith.mulf %27, %13 : vector<8x128xf32>
    %32 = arith.mulf %26, %30 : vector<8x128xf32>
    %33 = arith.addf %31, %32 : vector<8x128xf32>
    %34 = math.tanh %33 : vector<8x128xf32>
    %35 = arith.mulf %28, %34 : vector<8x128xf32>
    %36 = vector.extract_strided_slice %10 {offsets = [8, 0], sizes = [8, 512], strides = [1, 1]} : vector<64x512xf32> to vector<8x512xf32>
    %37 = vector.extract_strided_slice %10 {offsets = [48, 0], sizes = [8, 512], strides = [1, 1]} : vector<64x512xf32> to vector<8x512xf32>
    %38 = arith.select %3, %36, %37 : vector<8x512xi1>, vector<8x512xf32>
    %39 = arith.truncf %35 : vector<8x128xf32> to vector<8x128xbf16>
    %cst_11 = arith.constant dense<0.000000e+00> : vector<8x512xf32>
    %40 = tpu.matmul %39, %11, %cst_11 {dimension_numbers = #tpu.dot_dimension_numbers<[1], [0], [0], [1], [0, 0, 1, 1], [], []>} : vector<8x128xbf16>, vector<128x512xbf16>, vector<8x512xf32> -> vector<8x512xf32>
    %41 = arith.addf %38, %40 : vector<8x512xf32>
    %42 = vector.extract_strided_slice %41 {offsets = [0, 0], sizes = [8, 384], strides = [1, 1]} : vector<8x512xf32> to vector<8x384xf32>
    %43 = arith.negf %42 : vector<8x384xf32>
    %44 = math.exp %43 : vector<8x384xf32>
    %cst_12 = arith.constant 1.000000e+00 : f32
    %45 = vector.broadcast %cst_12 : f32 to vector<8x384xf32>
    %46 = arith.addf %45, %44 : vector<8x384xf32>
    %47 = arith.divf %45, %46 : vector<8x384xf32>
    %48 = vector.extract_strided_slice %47 {offsets = [0, 0], sizes = [8, 128], strides = [1, 1]} : vector<8x384xf32> to vector<8x128xf32>
    %49 = vector.extract_strided_slice %47 {offsets = [0, 128], sizes = [8, 128], strides = [1, 1]} : vector<8x384xf32> to vector<8x128xf32>
    %50 = vector.extract_strided_slice %47 {offsets = [0, 256], sizes = [8, 128], strides = [1, 1]} : vector<8x384xf32> to vector<8x128xf32>
    %51 = vector.extract_strided_slice %41 {offsets = [0, 384], sizes = [8, 128], strides = [1, 1]} : vector<8x512xf32> to vector<8x128xf32>
    %52 = math.tanh %51 : vector<8x128xf32>
    %53 = arith.mulf %49, %33 : vector<8x128xf32>
    %54 = arith.mulf %48, %52 : vector<8x128xf32>
    %55 = arith.addf %53, %54 : vector<8x128xf32>
    %56 = math.tanh %55 : vector<8x128xf32>
    %57 = arith.mulf %50, %56 : vector<8x128xf32>
    %58 = vector.extract_strided_slice %10 {offsets = [16, 0], sizes = [8, 512], strides = [1, 1]} : vector<64x512xf32> to vector<8x512xf32>
    %59 = vector.extract_strided_slice %10 {offsets = [40, 0], sizes = [8, 512], strides = [1, 1]} : vector<64x512xf32> to vector<8x512xf32>
    %60 = arith.select %3, %58, %59 : vector<8x512xi1>, vector<8x512xf32>
    %61 = arith.truncf %57 : vector<8x128xf32> to vector<8x128xbf16>
    %cst_13 = arith.constant dense<0.000000e+00> : vector<8x512xf32>
    %62 = tpu.matmul %61, %11, %cst_13 {dimension_numbers = #tpu.dot_dimension_numbers<[1], [0], [0], [1], [0, 0, 1, 1], [], []>} : vector<8x128xbf16>, vector<128x512xbf16>, vector<8x512xf32> -> vector<8x512xf32>
    %63 = arith.addf %60, %62 : vector<8x512xf32>
    %64 = vector.extract_strided_slice %63 {offsets = [0, 0], sizes = [8, 384], strides = [1, 1]} : vector<8x512xf32> to vector<8x384xf32>
    %65 = arith.negf %64 : vector<8x384xf32>
    %66 = math.exp %65 : vector<8x384xf32>
    %cst_14 = arith.constant 1.000000e+00 : f32
    %67 = vector.broadcast %cst_14 : f32 to vector<8x384xf32>
    %68 = arith.addf %67, %66 : vector<8x384xf32>
    %69 = arith.divf %67, %68 : vector<8x384xf32>
    %70 = vector.extract_strided_slice %69 {offsets = [0, 0], sizes = [8, 128], strides = [1, 1]} : vector<8x384xf32> to vector<8x128xf32>
    %71 = vector.extract_strided_slice %69 {offsets = [0, 128], sizes = [8, 128], strides = [1, 1]} : vector<8x384xf32> to vector<8x128xf32>
    %72 = vector.extract_strided_slice %69 {offsets = [0, 256], sizes = [8, 128], strides = [1, 1]} : vector<8x384xf32> to vector<8x128xf32>
    %73 = vector.extract_strided_slice %63 {offsets = [0, 384], sizes = [8, 128], strides = [1, 1]} : vector<8x512xf32> to vector<8x128xf32>
    %74 = math.tanh %73 : vector<8x128xf32>
    %75 = arith.mulf %71, %55 : vector<8x128xf32>
    %76 = arith.mulf %70, %74 : vector<8x128xf32>
    %77 = arith.addf %75, %76 : vector<8x128xf32>
    %78 = math.tanh %77 : vector<8x128xf32>
    %79 = arith.mulf %72, %78 : vector<8x128xf32>
    %80 = vector.extract_strided_slice %10 {offsets = [24, 0], sizes = [8, 512], strides = [1, 1]} : vector<64x512xf32> to vector<8x512xf32>
    %81 = vector.extract_strided_slice %10 {offsets = [32, 0], sizes = [8, 512], strides = [1, 1]} : vector<64x512xf32> to vector<8x512xf32>
    %82 = arith.select %3, %80, %81 : vector<8x512xi1>, vector<8x512xf32>
    %83 = arith.truncf %79 : vector<8x128xf32> to vector<8x128xbf16>
    %cst_15 = arith.constant dense<0.000000e+00> : vector<8x512xf32>
    %84 = tpu.matmul %83, %11, %cst_15 {dimension_numbers = #tpu.dot_dimension_numbers<[1], [0], [0], [1], [0, 0, 1, 1], [], []>} : vector<8x128xbf16>, vector<128x512xbf16>, vector<8x512xf32> -> vector<8x512xf32>
    %85 = arith.addf %82, %84 : vector<8x512xf32>
    %86 = vector.extract_strided_slice %85 {offsets = [0, 0], sizes = [8, 384], strides = [1, 1]} : vector<8x512xf32> to vector<8x384xf32>
    %87 = arith.negf %86 : vector<8x384xf32>
    %88 = math.exp %87 : vector<8x384xf32>
    %cst_16 = arith.constant 1.000000e+00 : f32
    %89 = vector.broadcast %cst_16 : f32 to vector<8x384xf32>
    %90 = arith.addf %89, %88 : vector<8x384xf32>
    %91 = arith.divf %89, %90 : vector<8x384xf32>
    %92 = vector.extract_strided_slice %91 {offsets = [0, 0], sizes = [8, 128], strides = [1, 1]} : vector<8x384xf32> to vector<8x128xf32>
    %93 = vector.extract_strided_slice %91 {offsets = [0, 128], sizes = [8, 128], strides = [1, 1]} : vector<8x384xf32> to vector<8x128xf32>
    %94 = vector.extract_strided_slice %91 {offsets = [0, 256], sizes = [8, 128], strides = [1, 1]} : vector<8x384xf32> to vector<8x128xf32>
    %95 = vector.extract_strided_slice %85 {offsets = [0, 384], sizes = [8, 128], strides = [1, 1]} : vector<8x512xf32> to vector<8x128xf32>
    %96 = math.tanh %95 : vector<8x128xf32>
    %97 = arith.mulf %93, %77 : vector<8x128xf32>
    %98 = arith.mulf %92, %96 : vector<8x128xf32>
    %99 = arith.addf %97, %98 : vector<8x128xf32>
    %100 = math.tanh %99 : vector<8x128xf32>
    %101 = arith.mulf %94, %100 : vector<8x128xf32>
    %102 = vector.extract_strided_slice %10 {offsets = [32, 0], sizes = [8, 512], strides = [1, 1]} : vector<64x512xf32> to vector<8x512xf32>
    %103 = vector.extract_strided_slice %10 {offsets = [24, 0], sizes = [8, 512], strides = [1, 1]} : vector<64x512xf32> to vector<8x512xf32>
    %104 = arith.select %3, %102, %103 : vector<8x512xi1>, vector<8x512xf32>
    %105 = arith.truncf %101 : vector<8x128xf32> to vector<8x128xbf16>
    %cst_17 = arith.constant dense<0.000000e+00> : vector<8x512xf32>
    %106 = tpu.matmul %105, %11, %cst_17 {dimension_numbers = #tpu.dot_dimension_numbers<[1], [0], [0], [1], [0, 0, 1, 1], [], []>} : vector<8x128xbf16>, vector<128x512xbf16>, vector<8x512xf32> -> vector<8x512xf32>
    %107 = arith.addf %104, %106 : vector<8x512xf32>
    %108 = vector.extract_strided_slice %107 {offsets = [0, 0], sizes = [8, 384], strides = [1, 1]} : vector<8x512xf32> to vector<8x384xf32>
    %109 = arith.negf %108 : vector<8x384xf32>
    %110 = math.exp %109 : vector<8x384xf32>
    %cst_18 = arith.constant 1.000000e+00 : f32
    %111 = vector.broadcast %cst_18 : f32 to vector<8x384xf32>
    %112 = arith.addf %111, %110 : vector<8x384xf32>
    %113 = arith.divf %111, %112 : vector<8x384xf32>
    %114 = vector.extract_strided_slice %113 {offsets = [0, 0], sizes = [8, 128], strides = [1, 1]} : vector<8x384xf32> to vector<8x128xf32>
    %115 = vector.extract_strided_slice %113 {offsets = [0, 128], sizes = [8, 128], strides = [1, 1]} : vector<8x384xf32> to vector<8x128xf32>
    %116 = vector.extract_strided_slice %113 {offsets = [0, 256], sizes = [8, 128], strides = [1, 1]} : vector<8x384xf32> to vector<8x128xf32>
    %117 = vector.extract_strided_slice %107 {offsets = [0, 384], sizes = [8, 128], strides = [1, 1]} : vector<8x512xf32> to vector<8x128xf32>
    %118 = math.tanh %117 : vector<8x128xf32>
    %119 = arith.mulf %115, %99 : vector<8x128xf32>
    %120 = arith.mulf %114, %118 : vector<8x128xf32>
    %121 = arith.addf %119, %120 : vector<8x128xf32>
    %122 = math.tanh %121 : vector<8x128xf32>
    %123 = arith.mulf %116, %122 : vector<8x128xf32>
    %124 = vector.extract_strided_slice %10 {offsets = [40, 0], sizes = [8, 512], strides = [1, 1]} : vector<64x512xf32> to vector<8x512xf32>
    %125 = vector.extract_strided_slice %10 {offsets = [16, 0], sizes = [8, 512], strides = [1, 1]} : vector<64x512xf32> to vector<8x512xf32>
    %126 = arith.select %3, %124, %125 : vector<8x512xi1>, vector<8x512xf32>
    %127 = arith.truncf %123 : vector<8x128xf32> to vector<8x128xbf16>
    %cst_19 = arith.constant dense<0.000000e+00> : vector<8x512xf32>
    %128 = tpu.matmul %127, %11, %cst_19 {dimension_numbers = #tpu.dot_dimension_numbers<[1], [0], [0], [1], [0, 0, 1, 1], [], []>} : vector<8x128xbf16>, vector<128x512xbf16>, vector<8x512xf32> -> vector<8x512xf32>
    %129 = arith.addf %126, %128 : vector<8x512xf32>
    %130 = vector.extract_strided_slice %129 {offsets = [0, 0], sizes = [8, 384], strides = [1, 1]} : vector<8x512xf32> to vector<8x384xf32>
    %131 = arith.negf %130 : vector<8x384xf32>
    %132 = math.exp %131 : vector<8x384xf32>
    %cst_20 = arith.constant 1.000000e+00 : f32
    %133 = vector.broadcast %cst_20 : f32 to vector<8x384xf32>
    %134 = arith.addf %133, %132 : vector<8x384xf32>
    %135 = arith.divf %133, %134 : vector<8x384xf32>
    %136 = vector.extract_strided_slice %135 {offsets = [0, 0], sizes = [8, 128], strides = [1, 1]} : vector<8x384xf32> to vector<8x128xf32>
    %137 = vector.extract_strided_slice %135 {offsets = [0, 128], sizes = [8, 128], strides = [1, 1]} : vector<8x384xf32> to vector<8x128xf32>
    %138 = vector.extract_strided_slice %135 {offsets = [0, 256], sizes = [8, 128], strides = [1, 1]} : vector<8x384xf32> to vector<8x128xf32>
    %139 = vector.extract_strided_slice %129 {offsets = [0, 384], sizes = [8, 128], strides = [1, 1]} : vector<8x512xf32> to vector<8x128xf32>
    %140 = math.tanh %139 : vector<8x128xf32>
    %141 = arith.mulf %137, %121 : vector<8x128xf32>
    %142 = arith.mulf %136, %140 : vector<8x128xf32>
    %143 = arith.addf %141, %142 : vector<8x128xf32>
    %144 = math.tanh %143 : vector<8x128xf32>
    %145 = arith.mulf %138, %144 : vector<8x128xf32>
    %146 = vector.extract_strided_slice %10 {offsets = [48, 0], sizes = [8, 512], strides = [1, 1]} : vector<64x512xf32> to vector<8x512xf32>
    %147 = vector.extract_strided_slice %10 {offsets = [8, 0], sizes = [8, 512], strides = [1, 1]} : vector<64x512xf32> to vector<8x512xf32>
    %148 = arith.select %3, %146, %147 : vector<8x512xi1>, vector<8x512xf32>
    %149 = arith.truncf %145 : vector<8x128xf32> to vector<8x128xbf16>
    %cst_21 = arith.constant dense<0.000000e+00> : vector<8x512xf32>
    %150 = tpu.matmul %149, %11, %cst_21 {dimension_numbers = #tpu.dot_dimension_numbers<[1], [0], [0], [1], [0, 0, 1, 1], [], []>} : vector<8x128xbf16>, vector<128x512xbf16>, vector<8x512xf32> -> vector<8x512xf32>
    %151 = arith.addf %148, %150 : vector<8x512xf32>
    %152 = vector.extract_strided_slice %151 {offsets = [0, 0], sizes = [8, 384], strides = [1, 1]} : vector<8x512xf32> to vector<8x384xf32>
    %153 = arith.negf %152 : vector<8x384xf32>
    %154 = math.exp %153 : vector<8x384xf32>
    %cst_22 = arith.constant 1.000000e+00 : f32
    %155 = vector.broadcast %cst_22 : f32 to vector<8x384xf32>
    %156 = arith.addf %155, %154 : vector<8x384xf32>
    %157 = arith.divf %155, %156 : vector<8x384xf32>
    %158 = vector.extract_strided_slice %157 {offsets = [0, 0], sizes = [8, 128], strides = [1, 1]} : vector<8x384xf32> to vector<8x128xf32>
    %159 = vector.extract_strided_slice %157 {offsets = [0, 128], sizes = [8, 128], strides = [1, 1]} : vector<8x384xf32> to vector<8x128xf32>
    %160 = vector.extract_strided_slice %157 {offsets = [0, 256], sizes = [8, 128], strides = [1, 1]} : vector<8x384xf32> to vector<8x128xf32>
    %161 = vector.extract_strided_slice %151 {offsets = [0, 384], sizes = [8, 128], strides = [1, 1]} : vector<8x512xf32> to vector<8x128xf32>
    %162 = math.tanh %161 : vector<8x128xf32>
    %163 = arith.mulf %159, %143 : vector<8x128xf32>
    %164 = arith.mulf %158, %162 : vector<8x128xf32>
    %165 = arith.addf %163, %164 : vector<8x128xf32>
    %166 = math.tanh %165 : vector<8x128xf32>
    %167 = arith.mulf %160, %166 : vector<8x128xf32>
    %168 = vector.extract_strided_slice %10 {offsets = [56, 0], sizes = [8, 512], strides = [1, 1]} : vector<64x512xf32> to vector<8x512xf32>
    %169 = vector.extract_strided_slice %10 {offsets = [0, 0], sizes = [8, 512], strides = [1, 1]} : vector<64x512xf32> to vector<8x512xf32>
    %170 = arith.select %3, %168, %169 : vector<8x512xi1>, vector<8x512xf32>
    %171 = arith.truncf %167 : vector<8x128xf32> to vector<8x128xbf16>
    %cst_23 = arith.constant dense<0.000000e+00> : vector<8x512xf32>
    %172 = tpu.matmul %171, %11, %cst_23 {dimension_numbers = #tpu.dot_dimension_numbers<[1], [0], [0], [1], [0, 0, 1, 1], [], []>} : vector<8x128xbf16>, vector<128x512xbf16>, vector<8x512xf32> -> vector<8x512xf32>
    %173 = arith.addf %170, %172 : vector<8x512xf32>
    %174 = vector.extract_strided_slice %173 {offsets = [0, 0], sizes = [8, 384], strides = [1, 1]} : vector<8x512xf32> to vector<8x384xf32>
    %175 = arith.negf %174 : vector<8x384xf32>
    %176 = math.exp %175 : vector<8x384xf32>
    %cst_24 = arith.constant 1.000000e+00 : f32
    %177 = vector.broadcast %cst_24 : f32 to vector<8x384xf32>
    %178 = arith.addf %177, %176 : vector<8x384xf32>
    %179 = arith.divf %177, %178 : vector<8x384xf32>
    %180 = vector.extract_strided_slice %179 {offsets = [0, 0], sizes = [8, 128], strides = [1, 1]} : vector<8x384xf32> to vector<8x128xf32>
    %181 = vector.extract_strided_slice %179 {offsets = [0, 128], sizes = [8, 128], strides = [1, 1]} : vector<8x384xf32> to vector<8x128xf32>
    %182 = vector.extract_strided_slice %179 {offsets = [0, 256], sizes = [8, 128], strides = [1, 1]} : vector<8x384xf32> to vector<8x128xf32>
    %183 = vector.extract_strided_slice %173 {offsets = [0, 384], sizes = [8, 128], strides = [1, 1]} : vector<8x512xf32> to vector<8x128xf32>
    %184 = math.tanh %183 : vector<8x128xf32>
    %185 = arith.mulf %181, %165 : vector<8x128xf32>
    %186 = arith.mulf %180, %184 : vector<8x128xf32>
    %187 = arith.addf %185, %186 : vector<8x128xf32>
    %188 = math.tanh %187 : vector<8x128xf32>
    %189 = arith.mulf %182, %188 : vector<8x128xf32>
    %190 = arith.select %2, %35, %189 : vector<8x128xi1>, vector<8x128xf32>
    %191 = arith.select %2, %57, %167 : vector<8x128xi1>, vector<8x128xf32>
    %192 = arith.select %2, %79, %145 : vector<8x128xi1>, vector<8x128xf32>
    %193 = arith.select %2, %101, %123 : vector<8x128xi1>, vector<8x128xf32>
    %194 = arith.select %2, %123, %101 : vector<8x128xi1>, vector<8x128xf32>
    %195 = arith.select %2, %145, %79 : vector<8x128xi1>, vector<8x128xf32>
    %196 = arith.select %2, %167, %57 : vector<8x128xi1>, vector<8x128xf32>
    %197 = arith.select %2, %189, %35 : vector<8x128xi1>, vector<8x128xf32>
    %198 = tpu.concatenate %190, %191, %192, %193, %194, %195, %196, %197 in 0 : vector<8x128xf32>, vector<8x128xf32>, vector<8x128xf32>, vector<8x128xf32>, vector<8x128xf32>, vector<8x128xf32>, vector<8x128xf32>, vector<8x128xf32> -> vector<64x128xf32>
    %c0_25 = arith.constant 0 : index
    %c0_26 = arith.constant 0 : index
    %199 = vector.load %arg4[%c0_25, %c0_26] : memref<128x512xbf16, #tpu.memory_space<vmem>>, vector<128x512xbf16>
    %200 = arith.truncf %198 : vector<64x128xf32> to vector<64x128xbf16>
    %cst_27 = arith.constant dense<0.000000e+00> : vector<64x512xf32>
    %201 = tpu.matmul %200, %199, %cst_27 {dimension_numbers = #tpu.dot_dimension_numbers<[1], [0], [0], [1], [0, 0, 1, 1], [], []>} : vector<64x128xbf16>, vector<128x512xbf16>, vector<64x512xf32> -> vector<64x512xf32>
    %c0_28 = arith.constant 0 : index
    %c0_29 = arith.constant 0 : index
    %202 = vector.load %arg6[%c0_28, %c0_29] : memref<1x512xf32, #tpu.memory_space<vmem>>, vector<1x512xf32>
    %203 = vector.broadcast %202 : vector<1x512xf32> to vector<64x512xf32>
    %204 = arith.addf %201, %203 : vector<64x512xf32>
    %c0_30 = arith.constant 0 : index
    %c0_31 = arith.constant 0 : index
    %205 = vector.load %arg5[%c0_30, %c0_31] : memref<128x512xbf16, #tpu.memory_space<vmem>>, vector<128x512xbf16>
    %cst_32 = arith.constant 0.000000e+00 : f32
    %206 = vector.broadcast %cst_32 : f32 to vector<8x128xf32>
    %cst_33 = arith.constant 0.000000e+00 : f32
    %207 = vector.broadcast %cst_33 : f32 to vector<8x128xf32>
    %208 = vector.extract_strided_slice %204 {offsets = [0, 0], sizes = [8, 512], strides = [1, 1]} : vector<64x512xf32> to vector<8x512xf32>
    %209 = arith.truncf %206 : vector<8x128xf32> to vector<8x128xbf16>
    %cst_34 = arith.constant dense<0.000000e+00> : vector<8x512xf32>
    %210 = tpu.matmul %209, %205, %cst_34 {dimension_numbers = #tpu.dot_dimension_numbers<[1], [0], [0], [1], [0, 0, 1, 1], [], []>} : vector<8x128xbf16>, vector<128x512xbf16>, vector<8x512xf32> -> vector<8x512xf32>
    %211 = arith.addf %208, %210 : vector<8x512xf32>
    %212 = vector.extract_strided_slice %211 {offsets = [0, 0], sizes = [8, 384], strides = [1, 1]} : vector<8x512xf32> to vector<8x384xf32>
    %213 = arith.negf %212 : vector<8x384xf32>
    %214 = math.exp %213 : vector<8x384xf32>
    %cst_35 = arith.constant 1.000000e+00 : f32
    %215 = vector.broadcast %cst_35 : f32 to vector<8x384xf32>
    %216 = arith.addf %215, %214 : vector<8x384xf32>
    %217 = arith.divf %215, %216 : vector<8x384xf32>
    %218 = vector.extract_strided_slice %217 {offsets = [0, 0], sizes = [8, 128], strides = [1, 1]} : vector<8x384xf32> to vector<8x128xf32>
    %219 = vector.extract_strided_slice %217 {offsets = [0, 128], sizes = [8, 128], strides = [1, 1]} : vector<8x384xf32> to vector<8x128xf32>
    %220 = vector.extract_strided_slice %217 {offsets = [0, 256], sizes = [8, 128], strides = [1, 1]} : vector<8x384xf32> to vector<8x128xf32>
    %221 = vector.extract_strided_slice %211 {offsets = [0, 384], sizes = [8, 128], strides = [1, 1]} : vector<8x512xf32> to vector<8x128xf32>
    %222 = math.tanh %221 : vector<8x128xf32>
    %223 = arith.mulf %219, %207 : vector<8x128xf32>
    %224 = arith.mulf %218, %222 : vector<8x128xf32>
    %225 = arith.addf %223, %224 : vector<8x128xf32>
    %226 = math.tanh %225 : vector<8x128xf32>
    %227 = arith.mulf %220, %226 : vector<8x128xf32>
    %228 = vector.extract_strided_slice %204 {offsets = [8, 0], sizes = [8, 512], strides = [1, 1]} : vector<64x512xf32> to vector<8x512xf32>
    %229 = arith.truncf %227 : vector<8x128xf32> to vector<8x128xbf16>
    %cst_36 = arith.constant dense<0.000000e+00> : vector<8x512xf32>
    %230 = tpu.matmul %229, %205, %cst_36 {dimension_numbers = #tpu.dot_dimension_numbers<[1], [0], [0], [1], [0, 0, 1, 1], [], []>} : vector<8x128xbf16>, vector<128x512xbf16>, vector<8x512xf32> -> vector<8x512xf32>
    %231 = arith.addf %228, %230 : vector<8x512xf32>
    %232 = vector.extract_strided_slice %231 {offsets = [0, 0], sizes = [8, 384], strides = [1, 1]} : vector<8x512xf32> to vector<8x384xf32>
    %233 = arith.negf %232 : vector<8x384xf32>
    %234 = math.exp %233 : vector<8x384xf32>
    %cst_37 = arith.constant 1.000000e+00 : f32
    %235 = vector.broadcast %cst_37 : f32 to vector<8x384xf32>
    %236 = arith.addf %235, %234 : vector<8x384xf32>
    %237 = arith.divf %235, %236 : vector<8x384xf32>
    %238 = vector.extract_strided_slice %237 {offsets = [0, 0], sizes = [8, 128], strides = [1, 1]} : vector<8x384xf32> to vector<8x128xf32>
    %239 = vector.extract_strided_slice %237 {offsets = [0, 128], sizes = [8, 128], strides = [1, 1]} : vector<8x384xf32> to vector<8x128xf32>
    %240 = vector.extract_strided_slice %237 {offsets = [0, 256], sizes = [8, 128], strides = [1, 1]} : vector<8x384xf32> to vector<8x128xf32>
    %241 = vector.extract_strided_slice %231 {offsets = [0, 384], sizes = [8, 128], strides = [1, 1]} : vector<8x512xf32> to vector<8x128xf32>
    %242 = math.tanh %241 : vector<8x128xf32>
    %243 = arith.mulf %239, %225 : vector<8x128xf32>
    %244 = arith.mulf %238, %242 : vector<8x128xf32>
    %245 = arith.addf %243, %244 : vector<8x128xf32>
    %246 = math.tanh %245 : vector<8x128xf32>
    %247 = arith.mulf %240, %246 : vector<8x128xf32>
    %248 = vector.extract_strided_slice %204 {offsets = [16, 0], sizes = [8, 512], strides = [1, 1]} : vector<64x512xf32> to vector<8x512xf32>
    %249 = arith.truncf %247 : vector<8x128xf32> to vector<8x128xbf16>
    %cst_38 = arith.constant dense<0.000000e+00> : vector<8x512xf32>
    %250 = tpu.matmul %249, %205, %cst_38 {dimension_numbers = #tpu.dot_dimension_numbers<[1], [0], [0], [1], [0, 0, 1, 1], [], []>} : vector<8x128xbf16>, vector<128x512xbf16>, vector<8x512xf32> -> vector<8x512xf32>
    %251 = arith.addf %248, %250 : vector<8x512xf32>
    %252 = vector.extract_strided_slice %251 {offsets = [0, 0], sizes = [8, 384], strides = [1, 1]} : vector<8x512xf32> to vector<8x384xf32>
    %253 = arith.negf %252 : vector<8x384xf32>
    %254 = math.exp %253 : vector<8x384xf32>
    %cst_39 = arith.constant 1.000000e+00 : f32
    %255 = vector.broadcast %cst_39 : f32 to vector<8x384xf32>
    %256 = arith.addf %255, %254 : vector<8x384xf32>
    %257 = arith.divf %255, %256 : vector<8x384xf32>
    %258 = vector.extract_strided_slice %257 {offsets = [0, 0], sizes = [8, 128], strides = [1, 1]} : vector<8x384xf32> to vector<8x128xf32>
    %259 = vector.extract_strided_slice %257 {offsets = [0, 128], sizes = [8, 128], strides = [1, 1]} : vector<8x384xf32> to vector<8x128xf32>
    %260 = vector.extract_strided_slice %257 {offsets = [0, 256], sizes = [8, 128], strides = [1, 1]} : vector<8x384xf32> to vector<8x128xf32>
    %261 = vector.extract_strided_slice %251 {offsets = [0, 384], sizes = [8, 128], strides = [1, 1]} : vector<8x512xf32> to vector<8x128xf32>
    %262 = math.tanh %261 : vector<8x128xf32>
    %263 = arith.mulf %259, %245 : vector<8x128xf32>
    %264 = arith.mulf %258, %262 : vector<8x128xf32>
    %265 = arith.addf %263, %264 : vector<8x128xf32>
    %266 = math.tanh %265 : vector<8x128xf32>
    %267 = arith.mulf %260, %266 : vector<8x128xf32>
    %268 = vector.extract_strided_slice %204 {offsets = [24, 0], sizes = [8, 512], strides = [1, 1]} : vector<64x512xf32> to vector<8x512xf32>
    %269 = arith.truncf %267 : vector<8x128xf32> to vector<8x128xbf16>
    %cst_40 = arith.constant dense<0.000000e+00> : vector<8x512xf32>
    %270 = tpu.matmul %269, %205, %cst_40 {dimension_numbers = #tpu.dot_dimension_numbers<[1], [0], [0], [1], [0, 0, 1, 1], [], []>} : vector<8x128xbf16>, vector<128x512xbf16>, vector<8x512xf32> -> vector<8x512xf32>
    %271 = arith.addf %268, %270 : vector<8x512xf32>
    %272 = vector.extract_strided_slice %271 {offsets = [0, 0], sizes = [8, 384], strides = [1, 1]} : vector<8x512xf32> to vector<8x384xf32>
    %273 = arith.negf %272 : vector<8x384xf32>
    %274 = math.exp %273 : vector<8x384xf32>
    %cst_41 = arith.constant 1.000000e+00 : f32
    %275 = vector.broadcast %cst_41 : f32 to vector<8x384xf32>
    %276 = arith.addf %275, %274 : vector<8x384xf32>
    %277 = arith.divf %275, %276 : vector<8x384xf32>
    %278 = vector.extract_strided_slice %277 {offsets = [0, 0], sizes = [8, 128], strides = [1, 1]} : vector<8x384xf32> to vector<8x128xf32>
    %279 = vector.extract_strided_slice %277 {offsets = [0, 128], sizes = [8, 128], strides = [1, 1]} : vector<8x384xf32> to vector<8x128xf32>
    %280 = vector.extract_strided_slice %277 {offsets = [0, 256], sizes = [8, 128], strides = [1, 1]} : vector<8x384xf32> to vector<8x128xf32>
    %281 = vector.extract_strided_slice %271 {offsets = [0, 384], sizes = [8, 128], strides = [1, 1]} : vector<8x512xf32> to vector<8x128xf32>
    %282 = math.tanh %281 : vector<8x128xf32>
    %283 = arith.mulf %279, %265 : vector<8x128xf32>
    %284 = arith.mulf %278, %282 : vector<8x128xf32>
    %285 = arith.addf %283, %284 : vector<8x128xf32>
    %286 = math.tanh %285 : vector<8x128xf32>
    %287 = arith.mulf %280, %286 : vector<8x128xf32>
    %288 = vector.extract_strided_slice %204 {offsets = [32, 0], sizes = [8, 512], strides = [1, 1]} : vector<64x512xf32> to vector<8x512xf32>
    %289 = arith.truncf %287 : vector<8x128xf32> to vector<8x128xbf16>
    %cst_42 = arith.constant dense<0.000000e+00> : vector<8x512xf32>
    %290 = tpu.matmul %289, %205, %cst_42 {dimension_numbers = #tpu.dot_dimension_numbers<[1], [0], [0], [1], [0, 0, 1, 1], [], []>} : vector<8x128xbf16>, vector<128x512xbf16>, vector<8x512xf32> -> vector<8x512xf32>
    %291 = arith.addf %288, %290 : vector<8x512xf32>
    %292 = vector.extract_strided_slice %291 {offsets = [0, 0], sizes = [8, 384], strides = [1, 1]} : vector<8x512xf32> to vector<8x384xf32>
    %293 = arith.negf %292 : vector<8x384xf32>
    %294 = math.exp %293 : vector<8x384xf32>
    %cst_43 = arith.constant 1.000000e+00 : f32
    %295 = vector.broadcast %cst_43 : f32 to vector<8x384xf32>
    %296 = arith.addf %295, %294 : vector<8x384xf32>
    %297 = arith.divf %295, %296 : vector<8x384xf32>
    %298 = vector.extract_strided_slice %297 {offsets = [0, 0], sizes = [8, 128], strides = [1, 1]} : vector<8x384xf32> to vector<8x128xf32>
    %299 = vector.extract_strided_slice %297 {offsets = [0, 128], sizes = [8, 128], strides = [1, 1]} : vector<8x384xf32> to vector<8x128xf32>
    %300 = vector.extract_strided_slice %297 {offsets = [0, 256], sizes = [8, 128], strides = [1, 1]} : vector<8x384xf32> to vector<8x128xf32>
    %301 = vector.extract_strided_slice %291 {offsets = [0, 384], sizes = [8, 128], strides = [1, 1]} : vector<8x512xf32> to vector<8x128xf32>
    %302 = math.tanh %301 : vector<8x128xf32>
    %303 = arith.mulf %299, %285 : vector<8x128xf32>
    %304 = arith.mulf %298, %302 : vector<8x128xf32>
    %305 = arith.addf %303, %304 : vector<8x128xf32>
    %306 = math.tanh %305 : vector<8x128xf32>
    %307 = arith.mulf %300, %306 : vector<8x128xf32>
    %308 = vector.extract_strided_slice %204 {offsets = [40, 0], sizes = [8, 512], strides = [1, 1]} : vector<64x512xf32> to vector<8x512xf32>
    %309 = arith.truncf %307 : vector<8x128xf32> to vector<8x128xbf16>
    %cst_44 = arith.constant dense<0.000000e+00> : vector<8x512xf32>
    %310 = tpu.matmul %309, %205, %cst_44 {dimension_numbers = #tpu.dot_dimension_numbers<[1], [0], [0], [1], [0, 0, 1, 1], [], []>} : vector<8x128xbf16>, vector<128x512xbf16>, vector<8x512xf32> -> vector<8x512xf32>
    %311 = arith.addf %308, %310 : vector<8x512xf32>
    %312 = vector.extract_strided_slice %311 {offsets = [0, 0], sizes = [8, 384], strides = [1, 1]} : vector<8x512xf32> to vector<8x384xf32>
    %313 = arith.negf %312 : vector<8x384xf32>
    %314 = math.exp %313 : vector<8x384xf32>
    %cst_45 = arith.constant 1.000000e+00 : f32
    %315 = vector.broadcast %cst_45 : f32 to vector<8x384xf32>
    %316 = arith.addf %315, %314 : vector<8x384xf32>
    %317 = arith.divf %315, %316 : vector<8x384xf32>
    %318 = vector.extract_strided_slice %317 {offsets = [0, 0], sizes = [8, 128], strides = [1, 1]} : vector<8x384xf32> to vector<8x128xf32>
    %319 = vector.extract_strided_slice %317 {offsets = [0, 128], sizes = [8, 128], strides = [1, 1]} : vector<8x384xf32> to vector<8x128xf32>
    %320 = vector.extract_strided_slice %317 {offsets = [0, 256], sizes = [8, 128], strides = [1, 1]} : vector<8x384xf32> to vector<8x128xf32>
    %321 = vector.extract_strided_slice %311 {offsets = [0, 384], sizes = [8, 128], strides = [1, 1]} : vector<8x512xf32> to vector<8x128xf32>
    %322 = math.tanh %321 : vector<8x128xf32>
    %323 = arith.mulf %319, %305 : vector<8x128xf32>
    %324 = arith.mulf %318, %322 : vector<8x128xf32>
    %325 = arith.addf %323, %324 : vector<8x128xf32>
    %326 = math.tanh %325 : vector<8x128xf32>
    %327 = arith.mulf %320, %326 : vector<8x128xf32>
    %328 = vector.extract_strided_slice %204 {offsets = [48, 0], sizes = [8, 512], strides = [1, 1]} : vector<64x512xf32> to vector<8x512xf32>
    %329 = arith.truncf %327 : vector<8x128xf32> to vector<8x128xbf16>
    %cst_46 = arith.constant dense<0.000000e+00> : vector<8x512xf32>
    %330 = tpu.matmul %329, %205, %cst_46 {dimension_numbers = #tpu.dot_dimension_numbers<[1], [0], [0], [1], [0, 0, 1, 1], [], []>} : vector<8x128xbf16>, vector<128x512xbf16>, vector<8x512xf32> -> vector<8x512xf32>
    %331 = arith.addf %328, %330 : vector<8x512xf32>
    %332 = vector.extract_strided_slice %331 {offsets = [0, 0], sizes = [8, 384], strides = [1, 1]} : vector<8x512xf32> to vector<8x384xf32>
    %333 = arith.negf %332 : vector<8x384xf32>
    %334 = math.exp %333 : vector<8x384xf32>
    %cst_47 = arith.constant 1.000000e+00 : f32
    %335 = vector.broadcast %cst_47 : f32 to vector<8x384xf32>
    %336 = arith.addf %335, %334 : vector<8x384xf32>
    %337 = arith.divf %335, %336 : vector<8x384xf32>
    %338 = vector.extract_strided_slice %337 {offsets = [0, 0], sizes = [8, 128], strides = [1, 1]} : vector<8x384xf32> to vector<8x128xf32>
    %339 = vector.extract_strided_slice %337 {offsets = [0, 128], sizes = [8, 128], strides = [1, 1]} : vector<8x384xf32> to vector<8x128xf32>
    %340 = vector.extract_strided_slice %337 {offsets = [0, 256], sizes = [8, 128], strides = [1, 1]} : vector<8x384xf32> to vector<8x128xf32>
    %341 = vector.extract_strided_slice %331 {offsets = [0, 384], sizes = [8, 128], strides = [1, 1]} : vector<8x512xf32> to vector<8x128xf32>
    %342 = math.tanh %341 : vector<8x128xf32>
    %343 = arith.mulf %339, %325 : vector<8x128xf32>
    %344 = arith.mulf %338, %342 : vector<8x128xf32>
    %345 = arith.addf %343, %344 : vector<8x128xf32>
    %346 = math.tanh %345 : vector<8x128xf32>
    %347 = arith.mulf %340, %346 : vector<8x128xf32>
    %348 = vector.extract_strided_slice %204 {offsets = [56, 0], sizes = [8, 512], strides = [1, 1]} : vector<64x512xf32> to vector<8x512xf32>
    %349 = arith.truncf %347 : vector<8x128xf32> to vector<8x128xbf16>
    %cst_48 = arith.constant dense<0.000000e+00> : vector<8x512xf32>
    %350 = tpu.matmul %349, %205, %cst_48 {dimension_numbers = #tpu.dot_dimension_numbers<[1], [0], [0], [1], [0, 0, 1, 1], [], []>} : vector<8x128xbf16>, vector<128x512xbf16>, vector<8x512xf32> -> vector<8x512xf32>
    %351 = arith.addf %348, %350 : vector<8x512xf32>
    %352 = vector.extract_strided_slice %351 {offsets = [0, 0], sizes = [8, 384], strides = [1, 1]} : vector<8x512xf32> to vector<8x384xf32>
    %353 = arith.negf %352 : vector<8x384xf32>
    %354 = math.exp %353 : vector<8x384xf32>
    %cst_49 = arith.constant 1.000000e+00 : f32
    %355 = vector.broadcast %cst_49 : f32 to vector<8x384xf32>
    %356 = arith.addf %355, %354 : vector<8x384xf32>
    %357 = arith.divf %355, %356 : vector<8x384xf32>
    %358 = vector.extract_strided_slice %357 {offsets = [0, 0], sizes = [8, 128], strides = [1, 1]} : vector<8x384xf32> to vector<8x128xf32>
    %359 = vector.extract_strided_slice %357 {offsets = [0, 128], sizes = [8, 128], strides = [1, 1]} : vector<8x384xf32> to vector<8x128xf32>
    %360 = vector.extract_strided_slice %357 {offsets = [0, 256], sizes = [8, 128], strides = [1, 1]} : vector<8x384xf32> to vector<8x128xf32>
    %361 = vector.extract_strided_slice %351 {offsets = [0, 384], sizes = [8, 128], strides = [1, 1]} : vector<8x512xf32> to vector<8x128xf32>
    %362 = math.tanh %361 : vector<8x128xf32>
    %363 = arith.mulf %359, %345 : vector<8x128xf32>
    %364 = arith.mulf %358, %362 : vector<8x128xf32>
    %365 = arith.addf %363, %364 : vector<8x128xf32>
    %366 = math.tanh %365 : vector<8x128xf32>
    %367 = arith.mulf %360, %366 : vector<8x128xf32>
    %368 = vector.extract_strided_slice %204 {offsets = [56, 0], sizes = [8, 512], strides = [1, 1]} : vector<64x512xf32> to vector<8x512xf32>
    %cst_50 = arith.constant 0.000000e+00 : f32
    %369 = vector.broadcast %cst_50 : f32 to vector<8x128xf32>
    %370 = vector.extract_strided_slice %368 {offsets = [0, 0], sizes = [8, 384], strides = [1, 1]} : vector<8x512xf32> to vector<8x384xf32>
    %371 = arith.negf %370 : vector<8x384xf32>
    %372 = math.exp %371 : vector<8x384xf32>
    %cst_51 = arith.constant 1.000000e+00 : f32
    %373 = vector.broadcast %cst_51 : f32 to vector<8x384xf32>
    %374 = arith.addf %373, %372 : vector<8x384xf32>
    %375 = arith.divf %373, %374 : vector<8x384xf32>
    %376 = vector.extract_strided_slice %375 {offsets = [0, 0], sizes = [8, 128], strides = [1, 1]} : vector<8x384xf32> to vector<8x128xf32>
    %377 = vector.extract_strided_slice %375 {offsets = [0, 128], sizes = [8, 128], strides = [1, 1]} : vector<8x384xf32> to vector<8x128xf32>
    %378 = vector.extract_strided_slice %375 {offsets = [0, 256], sizes = [8, 128], strides = [1, 1]} : vector<8x384xf32> to vector<8x128xf32>
    %379 = vector.extract_strided_slice %368 {offsets = [0, 384], sizes = [8, 128], strides = [1, 1]} : vector<8x512xf32> to vector<8x128xf32>
    %380 = math.tanh %379 : vector<8x128xf32>
    %381 = arith.mulf %377, %369 : vector<8x128xf32>
    %382 = arith.mulf %376, %380 : vector<8x128xf32>
    %383 = arith.addf %381, %382 : vector<8x128xf32>
    %384 = math.tanh %383 : vector<8x128xf32>
    %385 = arith.mulf %378, %384 : vector<8x128xf32>
    %386 = arith.select %2, %367, %385 : vector<8x128xi1>, vector<8x128xf32>
    %c0_52 = arith.constant 0 : index
    %c0_53 = arith.constant 0 : index
    %387 = vector.load %arg7[%c0_52, %c0_53] : memref<128x128xbf16, #tpu.memory_space<vmem>>, vector<128x128xbf16>
    %388 = arith.truncf %386 : vector<8x128xf32> to vector<8x128xbf16>
    %cst_54 = arith.constant dense<0.000000e+00> : vector<8x128xf32>
    %389 = tpu.matmul %388, %387, %cst_54 {dimension_numbers = #tpu.dot_dimension_numbers<[1], [0], [0], [1], [0, 0, 1, 1], [], []>} : vector<8x128xbf16>, vector<128x128xbf16>, vector<8x128xf32> -> vector<8x128xf32>
    %c0_55 = arith.constant 0 : index
    %c0_56 = arith.constant 0 : index
    %390 = vector.load %arg8[%c0_55, %c0_56] : memref<1x128xf32, #tpu.memory_space<vmem>>, vector<1x128xf32>
    %391 = vector.broadcast %390 : vector<1x128xf32> to vector<8x128xf32>
    %392 = arith.addf %389, %391 : vector<8x128xf32>
    %c0_57 = arith.constant 0 : index
    %c0_58 = arith.constant 0 : index
    %393 = vector.load %arg9[%c0_57, %c0_58] : memref<8x128xf32, #tpu.memory_space<vmem>>, vector<8x128xf32>
    tpu.vector_store %arg9[%c0_57, %c0_58], %392 {strides = array<i32>} : memref<8x128xf32, #tpu.memory_space<vmem>>, vector<8x128xf32>,
    return
  }
}

</mosaic_0001>

<bundles_post_ra>
// kernel: _lambda_.1
= control target key start
LH: loop header
LB: loop body
LE: loop exit
PB: predicated region body
PF: predicated region fallthrough
CT: control target
= control target key end

     0   :  { %v5600_v1 = vmov 0   ;;  %vm94_vm0 = vcmask 130048   ;;  %v33_v49 = vlaneseq  ;;  %vm3653_vm2 = vmmov 0   ;;  %s5586_s1 = inlined_call_operand.vmem [shape: bf16[16,512], index: 1, kind: input, shape index: {}]   ;;  %s5587_s0 = inlined_call_operand.vmem [shape: f32[64,16], index: 0, kind: input, shape index: {}]   ;;  %s5588_s2 = inlined_call_operand.vmem [shape: bf16[128,512], index: 2, kind: input, shape index: {}]   ;;  %s5589_s3 = inlined_call_operand.vmem [shape: f32[1,512], index: 3, kind: input, shape index: {}]   ;;  %s5590_s4 = inlined_call_operand.vmem [shape: bf16[128,512], index: 4, kind: input, shape index: {}]   ;;  %s5591_s5 = inlined_call_operand.vmem [shape: bf16[128,512], index: 5, kind: input, shape index: {}]   ;;  %s5592_s6 = inlined_call_operand.vmem [shape: f32[1,512], index: 6, kind: input, shape index: {}]   ;;  %s5593_s7 = inlined_call_operand.vmem [shape: bf16[128,128], index: 7, kind: input, shape index: {}]   ;;  %s5594_s8 = inlined_call_operand.vmem [shape: f32[1,128], index: 8, kind: input, shape index: {}]   ;;  %s5595_s9 = inlined_call_operand.vmem [shape: f32[8,128], index: 9, kind: output, shape index: {}]  }
   0x1   :  { %v3157_v0 = vld [vmem:[%s5586_s1 + $0x4] ss:$16 sps:$4 sm:$0xff]   ;;  %139 = vmatprep.mubr.bf16.mxu0 %v5600_v1  ;;  %212 = vmatprep.mubr.bf16.mxu1 %v5600_v1  ;;  %v3159_v2 = vld [vmem:[%s5586_s1 + $0xc] ss:$16 sps:$4 sm:$0xff]   ;;  %v3161_v3 = vld [vmem:[%s5586_s1] ss:$16 sps:$4 sm:$0xff]  }
   0x2   :  { %107 = vmatprep.subr.bf16.mxu0 %v3157_v0  ;;  %v3162_v4 = vld [vmem:[%s5586_s1 + $0x8] ss:$16 sps:$4 sm:$0xff]   ;;  %v36_v5 = vld [vmem:[%s5587_s0] sm:$0xff]  ;;  %180 = vmatprep.subr.bf16.mxu1 %v3159_v2  ;;  %v3732_v9 = vld [vmem:[%s5588_s2 + $0xc] ss:$16 sps:$4 sm:$0xff]   ;;  %v3988_v50 = vshrl.u32 %v33_v49, 7 }
   0x3   :  { %v37_v6 = vld [vmem:[%s5587_s0 + $0x8] sm:$0xff]  ;;  %108 = vmatpush1.bf16.msra.mxu0 %v3161_v3  ;;  %181 = vmatpush1.bf16.msra.mxu1 %v3162_v4  ;;  %v3727_v8 = vld [vmem:[%s5588_s2 + $0x4] ss:$16 sps:$4 sm:$0xff]   ;;  %5618 = vst [vmem:[#allocation3_spill] sm:$0xff] %v3732_v9  ;;  %v3737_v10 = vld [vmem:[%s5588_s2] ss:$16 sps:$4 sm:$0xff]  }
   0x4   :  { %v48_v7 = vpack.c.bf16 %v37_v6, %v36_v5  ;;  %5617 = vst [vmem:[#allocation2_spill] sm:$0xff] %v3727_v8  ;;  %v3742_v11 = vld [vmem:[%s5588_s2 + $0x8] ss:$16 sps:$4 sm:$0xff]   ;;  %449 = vmatprep.subr.bf16.mxu0 %v3727_v8  ;;  %v3748_v12 = vld [vmem:[%s5588_s2 + $0x24] ss:$16 sps:$4 sm:$0xff]   ;;  %490 = vmatprep.subr.bf16.mxu1 %v3732_v9  ;;  %5621 = vst [vmem:[#allocation6_spill] sm:$0xff] %v3988_v50 }
   0x5   :  { %v3755_v13 = vld [vmem:[%s5588_s2 + $0x2c] ss:$16 sps:$4 sm:$0xff]   ;;  %v3762_v14 = vld [vmem:[%s5588_s2 + $0x20] ss:$16 sps:$4 sm:$0xff]   ;;  %v3767_v15 = vld [vmem:[%s5588_s2 + $0x28] ss:$16 sps:$4 sm:$0xff]  }
   0x6   :  { %2961 = vmatmul.mubr.msk.bf16.vlgmr.msra.gmra.mrb[0].mxu0 %vm94_vm0, %v48_v7  ;;  %2965 = vmatmul.mubr.msk.bf16.vlgmr.msra.gmra.mrb[0].mxu1 %vm94_vm0, %v48_v7  ;;  %v38_v16 = vld [vmem:[%s5587_s0 + $0x10] sm:$0xff]  ;;  %v39_v17 = vld [vmem:[%s5587_s0 + $0x18] sm:$0xff]  ;;  %v40_v26 = vld [vmem:[%s5587_s0 + $0x20] sm:$0xff]  ;;  %v5598_v51 = vsub.s32 2, %v3988_v50  ;;  %v5596_v52 = vsub.s32 3, %v3988_v50  ;;  %v5599_v53 = vsub.s32 0, %v3988_v50 }
   0x7   :  { %450 = vmatpush1.bf16.msra.mxu0 %v3737_v10  ;;  %491 = vmatpush1.bf16.msra.mxu1 %v3742_v11  ;;  %v3782_v18 = vld [vmem:[%s5588_s2 + $0x44] ss:$16 sps:$4 sm:$0xff]   ;;  %v49_v19 = vpack.c.bf16 %v39_v17, %v38_v16  ;;  %v3788_v20 = vld [vmem:[%s5588_s2 + $0x4c] ss:$16 sps:$4 sm:$0xff]   ;;  %v3793_v21 = vld [vmem:[%s5588_s2 + $0x40] ss:$16 sps:$4 sm:$0xff]  }
   0x8   :  { %451 = vmatprep.subr.bf16.mxu0 %v3748_v12  ;;  %492 = vmatprep.subr.bf16.mxu1 %v3755_v13  ;;  %v3799_v22 = vld [vmem:[%s5588_s2 + $0x48] ss:$16 sps:$4 sm:$0xff]   ;;  %v3806_v23 = vld [vmem:[%s5588_s2 + $0x64] ss:$16 sps:$4 sm:$0xff]   ;;  %v3812_v24 = vld [vmem:[%s5588_s2 + $0x6c] ss:$16 sps:$4 sm:$0xff]  }
   0x9   :  { %149 = vmatprep.mubr.bf16.mxu0 %v5600_v1  ;;  %222 = vmatprep.mubr.bf16.mxu1 %v5600_v1  ;;  %v3817_v25 = vld [vmem:[%s5588_s2 + $0x60] ss:$16 sps:$4 sm:$0xff]   ;;  %v41_v27 = vld [vmem:[%s5587_s0 + $0x28] sm:$0xff]  ;;  %v3839_v29 = vld [vmem:[%s5588_s2 + $0x84] ss:$16 sps:$4 sm:$0xff]   ;;  %v5597_v55 = vsub.s32 1, %v3988_v50 }
   0xa   :  { %v3834_v28 = vld [vmem:[%s5588_s2 + $0x68] ss:$16 sps:$4 sm:$0xff]   ;;  %v3846_v30 = vld [vmem:[%s5588_s2 + $0x8c] ss:$16 sps:$4 sm:$0xff]   ;;  %v50_v31 = vpack.c.bf16 %v41_v27, %v40_v26  ;;  %v3852_v32 = vld [vmem:[%s5588_s2 + $0x80] ss:$16 sps:$4 sm:$0xff]  }
   0xb   :  { %452 = vmatpush1.bf16.msra.mxu0 %v3762_v14  ;;  %493 = vmatpush1.bf16.msra.mxu1 %v3767_v15  ;;  %v3857_v33 = vld [vmem:[%s5588_s2 + $0x88] ss:$16 sps:$4 sm:$0xff]   ;;  %v3864_v34 = vld [vmem:[%s5588_s2 + $0xa4] ss:$16 sps:$4 sm:$0xff]   ;;  %v3870_v35 = vld [vmem:[%s5588_s2 + $0xac] ss:$16 sps:$4 sm:$0xff]  }
   0xc   :  { %453 = vmatprep.subr.bf16.mxu0 %v3782_v18  ;;  %494 = vmatprep.subr.bf16.mxu1 %v3788_v20  ;;  %v3877_v36 = vld [vmem:[%s5588_s2 + $0xa0] ss:$16 sps:$4 sm:$0xff]   ;;  %v3882_v37 = vld [vmem:[%s5588_s2 + $0xa8] ss:$16 sps:$4 sm:$0xff]   ;;  %v3897_v40 = vld [vmem:[%s5588_s2 + $0xc4] ss:$16 sps:$4 sm:$0xff]  }
   0xd   :  { %v42_v38 = vld [vmem:[%s5587_s0 + $0x30] sm:$0xff]  ;;  %v43_v39 = vld [vmem:[%s5587_s0 + $0x38] sm:$0xff]  ;;  %v52_v54 = vld [vmem:[%s5589_s3] sm:$0xf] }
   0xe   :  { %2962 = vmatmul.mubr.msk.bf16.gmra.mrb[4].mxu0 %vm94_vm0, %v49_v19  ;;  %2966 = vmatmul.mubr.msk.bf16.gmra.mrb[4].mxu1 %vm94_vm0, %v49_v19  ;;  %v3904_v41 = vld [vmem:[%s5588_s2 + $0xcc] ss:$16 sps:$4 sm:$0xff]   ;;  %v51_v42 = vpack.c.bf16 %v43_v39, %v42_v38  ;;  %v3910_v43 = vld [vmem:[%s5588_s2 + $0xc0] ss:$16 sps:$4 sm:$0xff]   ;;  %v3917_v44 = vld [vmem:[%s5588_s2 + $0xc8] ss:$16 sps:$4 sm:$0xff]   ;;  %v3999_v56 = vrot.slane %v52_v54, %v5598_v51  ;;  %v4007_v59 = vrot.slane %v52_v54, %v5596_v52 }
   0xf   :  { %454 = vmatpush1.bf16.msra.mxu0 %v3793_v21  ;;  %159 = vmatprep.mubr.bf16.mxu0 %v5600_v1  ;;  %v3922_v45 = vld [vmem:[%s5588_s2 + $0xe4] ss:$16 sps:$4 sm:$0xff]   ;;  %v3928_v46 = vld [vmem:[%s5588_s2 + $0xec] ss:$16 sps:$4 sm:$0xff]   ;;  %v3936_v47 = vld [vmem:[%s5588_s2 + $0xe0] ss:$16 sps:$4 sm:$0xff]   ;;  %v4011_v60 = vrot.slane %v52_v54, %v5599_v53  ;;  %v4019_v63 = vrot.slane %v52_v54, %v5597_v55 }
  0x10   :  { %495 = vmatpush1.bf16.msra.mxu1 %v3799_v22  ;;  %455 = vmatprep.subr.bf16.mxu0 %v3806_v23  ;;  %5619 = vst [vmem:[#allocation4_spill] sm:$0xff] %v3936_v47  ;;  %v3944_v48 = vld [vmem:[%s5588_s2 + $0xe8] ss:$16 sps:$4 sm:$0xff]   ;;  %v4040_v51 = vand.u32 127, %v33_v49 }
  0x11   :  { %496 = vmatprep.subr.bf16.mxu1 %v3812_v24  ;;  %232 = vmatprep.mubr.bf16.mxu1 %v5600_v1  ;;  %5620 = vst [vmem:[#allocation5_spill] sm:$0xff] %v3944_v48 }
  0x12   :  { %5622 = vst [vmem:[#allocation7_spill] sm:$0xff] %v4040_v51  ;;  %vm35_vm1 = vcmp.lt.s32.totalorder %v4040_v51, 32 }
  0x13   :  { %456 = vmatpush1.bf16.msra.mxu0 %v3817_v25 }
  0x14   :  { %497 = vmatpush1.bf16.msra.mxu1 %v3834_v28  ;;  %457 = vmatprep.subr.bf16.mxu0 %v3839_v29 }
  0x15   :  { %498 = vmatprep.subr.bf16.mxu1 %v3846_v30 }
  0x16   :  { %2963 = vmatmul.mubr.msk.bf16.gmra.mrb[8].mxu0 %vm94_vm0, %v50_v31  ;;  %2967 = vmatmul.mubr.msk.bf16.gmra.mrb[8].mxu1 %vm94_vm0, %v50_v31 }
  0x17   :  { %458 = vmatpush1.bf16.msra.mxu0 %v3852_v32  ;;  %169 = vmatprep.mubr.bf16.mxu0 %v5600_v1 }
  0x18   :  { %499 = vmatpush1.bf16.msra.mxu1 %v3857_v33  ;;  %459 = vmatprep.subr.bf16.mxu0 %v3864_v34 }
  0x19   :  { %500 = vmatprep.subr.bf16.mxu1 %v3870_v35  ;;  %242 = vmatprep.mubr.bf16.mxu1 %v5600_v1 }
  0x1b   :  { %460 = vmatpush1.bf16.msra.mxu0 %v3877_v36 }
  0x1c   :  { %501 = vmatpush1.bf16.msra.mxu1 %v3882_v37  ;;  %461 = vmatprep.subr.bf16.mxu0 %v3897_v40 }
  0x1d   :  { %502 = vmatprep.subr.bf16.mxu1 %v3904_v41 }
  0x1e   :  { %2964 = vmatmul.mubr.msk.bf16.gmra.mrb[12].mxu0 %vm94_vm0, %v51_v42  ;;  %2968 = vmatmul.mubr.msk.bf16.gmra.mrb[12].mxu1 %vm94_vm0, %v51_v42 }
  0x1f   :  { %462 = vmatpush1.bf16.msra.mxu0 %v3910_v43  ;;  %481 = vmatprep.mubr.bf16.mxu0 %v5600_v1 }
  0x20   :  { %503 = vmatpush1.bf16.msra.mxu1 %v3917_v44  ;;  %463 = vmatprep.subr.bf16.mxu0 %v3922_v45 }
  0x21   :  { %504 = vmatprep.subr.bf16.mxu1 %v3928_v46  ;;  %522 = vmatprep.mubr.bf16.mxu1 %v5600_v1 }
  0x23   :  { %464 = vmatpush1.bf16.msra.mxu0 %v3936_v47 }
  0x24   :  { %505 = vmatpush1.bf16.msra.mxu1 %v3944_v48  ;;  %564 = vmatprep.subr.bf16.mxu0 %v3727_v8 }
  0x25   :  { %605 = vmatprep.subr.bf16.mxu1 %v3732_v9 }
  0x26   :  { %482 = vmatmul.mubr.bf16.vlgmr.msra.gmra.mrb[16].mxu0 %v5600_v1 }
  0x27   :  { %523 = vmatmul.mubr.bf16.vlgmr.msra.gmra.mrb[16].mxu1 %v5600_v1  ;;  %565 = vmatpush1.bf16.msra.mxu0 %v3737_v10 }
  0x28   :  { %606 = vmatpush1.bf16.msra.mxu1 %v3742_v11  ;;  %566 = vmatprep.subr.bf16.mxu0 %v3748_v12 }
  0x29   :  { %607 = vmatprep.subr.bf16.mxu1 %v3755_v13  ;;  %596 = vmatprep.mubr.bf16.mxu0 %v5600_v1 }
  0x2a   :  { %637 = vmatprep.mubr.bf16.mxu1 %v5600_v1 }
  0x2b   :  { %567 = vmatpush1.bf16.msra.mxu0 %v3762_v14 }
  0x2c   :  { %608 = vmatpush1.bf16.msra.mxu1 %v3767_v15  ;;  %568 = vmatprep.subr.bf16.mxu0 %v3782_v18 }
  0x2d   :  { %609 = vmatprep.subr.bf16.mxu1 %v3788_v20 }
  0x2f   :  { %569 = vmatpush1.bf16.msra.mxu0 %v3793_v21 }
  0x30   :  { %610 = vmatpush1.bf16.msra.mxu1 %v3799_v22  ;;  %570 = vmatprep.subr.bf16.mxu0 %v3806_v23 }
  0x31   :  { %611 = vmatprep.subr.bf16.mxu1 %v3812_v24 }
  0x33   :  { %571 = vmatpush1.bf16.msra.mxu0 %v3817_v25 }
  0x34   :  { %612 = vmatpush1.bf16.msra.mxu1 %v3834_v28  ;;  %572 = vmatprep.subr.bf16.mxu0 %v3839_v29 }
  0x35   :  { %613 = vmatprep.subr.bf16.mxu1 %v3846_v30 }
  0x37   :  { %573 = vmatpush1.bf16.msra.mxu0 %v3852_v32 }
  0x38   :  { %614 = vmatpush1.bf16.msra.mxu1 %v3857_v33  ;;  %574 = vmatprep.subr.bf16.mxu0 %v3864_v34 }
  0x39   :  { %615 = vmatprep.subr.bf16.mxu1 %v3870_v35 }
  0x3b   :  { %575 = vmatpush1.bf16.msra.mxu0 %v3877_v36 }
  0x3c   :  { %616 = vmatpush1.bf16.msra.mxu1 %v3882_v37  ;;  %576 = vmatprep.subr.bf16.mxu0 %v3897_v40 }
  0x3d   :  { %617 = vmatprep.subr.bf16.mxu1 %v3904_v41 }
  0x3f   :  { %577 = vmatpush1.bf16.msra.mxu0 %v3910_v43 }
  0x40   :  { %618 = vmatpush1.bf16.msra.mxu1 %v3917_v44  ;;  %578 = vmatprep.subr.bf16.mxu0 %v3922_v45 }
  0x41   :  { %619 = vmatprep.subr.bf16.mxu1 %v3928_v46 }
  0x43   :  { %579 = vmatpush1.bf16.msra.mxu0 %v3936_v47 }
  0x44   :  { %620 = vmatpush1.bf16.msra.mxu1 %v3944_v48  ;;  %679 = vmatprep.subr.bf16.mxu0 %v3727_v8 }
  0x45   :  { %720 = vmatprep.subr.bf16.mxu1 %v3732_v9 }
  0xd9   :  { %v4001_v57 = vpop.f32.mrb[0].mxu0  ;;  %v4003_v58 = vpop.f32.mrb[0].mxu1 }
  0xda   :  { %v4013_v61 = vpop.f32.mrb[1].mxu0  ;;  %v4015_v62 = vpop.f32.mrb[1].mxu1 }
  0xdb   :  { %v145_v0 = vpop.f32.mrb[2].mxu0  ;;  %v218_v2 = vpop.f32.mrb[2].mxu1 }
  0xdc   :  { %v4022_v3 = vadd.f32 %v145_v0, %v4011_v60  ;;  %v147_v4 = vpop.f32.mrb[3].mxu0  ;;  %v4025_v5 = vadd.f32 %v218_v2, %v3999_v56  ;;  %v220_v6 = vpop.f32.mrb[3].mxu1 }
  0xdd   :  { %v4028_v7 = vadd.f32 %v147_v4, %v4019_v63  ;;  %v4031_v16 = vadd.f32 %v220_v6, %v4007_v59 }
  0xe1   :  { %v151_v17 = vpop.f32.mrb[4].mxu0  ;;  %v224_v19 = vpop.f32.mrb[4].mxu1 }
  0xe2   :  { %v152_v26 = vadd.f32 %v151_v17, %v4011_v60  ;;  %v153_v27 = vpop.f32.mrb[5].mxu0  ;;  %v225_v31 = vadd.f32 %v224_v19, %v3999_v56  ;;  %v226_v38 = vpop.f32.mrb[5].mxu1 }
  0xe3   :  { %v154_v39 = vadd.f32 %v153_v27, %v4019_v63  ;;  %v155_v42 = vpop.f32.mrb[6].mxu0  ;;  %v227_v54 = vadd.f32 %v226_v38, %v4007_v59  ;;  %v228_v0 = vpop.f32.mrb[6].mxu1 }
  0xe4   :  { %v156_v2 = vadd.f32 %v155_v42, %v4011_v60  ;;  %v157_v4 = vpop.f32.mrb[7].mxu0  ;;  %v229_v6 = vadd.f32 %v228_v0, %v3999_v56  ;;  %v230_v52 = vpop.f32.mrb[7].mxu1 }
  0xe5   :  { %v158_v55 = vadd.f32 %v157_v4, %v4019_v63  ;;  %v231_v17 = vadd.f32 %v230_v52, %v4007_v59 }
  0xe9   :  { %v161_v19 = vpop.f32.mrb[8].mxu0  ;;  %v234_v27 = vpop.f32.mrb[8].mxu1 }
  0xea   :  { %v162_v53 = vadd.f32 %v161_v19, %v4011_v60  ;;  %v163_v38 = vpop.f32.mrb[9].mxu0  ;;  %v235_v1 = vadd.f32 %v234_v27, %v3999_v56  ;;  %v236_v42 = vpop.f32.mrb[9].mxu1 }
  0xeb   :  { %v164_v50 = vadd.f32 %v163_v38, %v4019_v63  ;;  %v165_v0 = vpop.f32.mrb[10].mxu0  ;;  %v237_v9 = vadd.f32 %v236_v42, %v4007_v59  ;;  %v238_v4 = vpop.f32.mrb[10].mxu1 }
  0xec   :  { %v166_v49 = vadd.f32 %v165_v0, %v4011_v60  ;;  %v167_v8 = vpop.f32.mrb[11].mxu0  ;;  %v239_v52 = vadd.f32 %v238_v4, %v3999_v56  ;;  %v240_v48 = vpop.f32.mrb[11].mxu1  ;;  %v4052_v47 = vsel %vm35_vm1, %v156_v2, %v162_v53  ;;  %v4056_v19 = vsel %vm35_vm1, %v229_v6, %v235_v1 }
  0xed   :  { %5623 = vst [vmem:[#allocation8_spill] sm:$0xff] %v4052_v47  ;;  %5624 = vst [vmem:[#allocation9_spill] sm:$0xff] %v4056_v19  ;;  %v168_v27 = vadd.f32 %v167_v8, %v4019_v63  ;;  %v241_v38 = vadd.f32 %v240_v48, %v4007_v59  ;;  %v4062_v42 = vsel %vm35_vm1, %v158_v55, %v164_v50 }
  0xee   :  { %5625 = vst [vmem:[#allocation10_spill] sm:$0xff] %v4062_v42  ;;  %v4066_v0 = vsel %vm35_vm1, %v231_v17, %v237_v9  ;;  %v4070_v4 = vsel %vm35_vm1, %v152_v26, %v166_v49  ;;  %v4074_v47 = vsel %vm35_vm1, %v225_v31, %v239_v52  ;;  %v4078_v8 = vsel %vm35_vm1, %v162_v53, %v156_v2 }
  0xef   :  { %5626 = vst [vmem:[#allocation11_spill] sm:$0xff] %v4066_v0  ;;  %v4082_v48 = vsel %vm35_vm1, %v235_v1, %v229_v6  ;;  %v4086_v42 = vsel %vm35_vm1, %v154_v39, %v168_v27  ;;  %v4090_v0 = vsel %vm35_vm1, %v227_v54, %v241_v38  ;;  %v4094_v19 = vsel %vm35_vm1, %v164_v50, %v158_v55 }
  0xf0   :  { %5627 = vst [vmem:[#allocation12_spill] sm:$0xff] %v4094_v19  ;;  %v4098_v53 = vsel %vm35_vm1, %v237_v9, %v231_v17  ;;  %v4102_v1 = vsel %vm35_vm1, %v166_v49, %v152_v26  ;;  %v4106_v2 = vsel %vm35_vm1, %v239_v52, %v225_v31  ;;  %v4110_v6 = vsel %vm35_vm1, %v168_v27, %v154_v39 }
  0xf1   :  { %5628 = vst [vmem:[#allocation13_spill] sm:$0xff] %v4102_v1  ;;  %5629 = vst [vmem:[#allocation14_spill] sm:$0xff] %v4106_v2  ;;  %v4114_v50 = vsel %vm35_vm1, %v241_v38, %v227_v54  ;;  %v171_v55 = vpop.f32.mrb[12].mxu0  ;;  %v244_v19 = vpop.f32.mrb[12].mxu1  ;;  %v142_v9 = vadd.f32 %v4001_v57, %v4011_v60  ;;  %v215_v26 = vadd.f32 %v4003_v58, %v3999_v56 }
  0xf2   :  { %5630 = vst [vmem:[#allocation15_spill] sm:$0xff] %v4110_v6  ;;  %5631 = vst [vmem:[#allocation16_spill] sm:$0xff] %v4114_v50  ;;  %v172_v17 = vadd.f32 %v171_v55, %v4011_v60  ;;  %v245_v31 = vadd.f32 %v244_v19, %v3999_v56  ;;  %v173_v49 = vpop.f32.mrb[13].mxu0  ;;  %v246_v52 = vpop.f32.mrb[13].mxu1  ;;  %v144_v39 = vadd.f32 %v4013_v61, %v4019_v63 }
  0xf3   :  { %v217_v54 = vadd.f32 %v4015_v62, %v4007_v59  ;;  %v174_v27 = vadd.f32 %v173_v49, %v4019_v63  ;;  %v247_v38 = vadd.f32 %v246_v52, %v4007_v59  ;;  %v175_v57 = vpop.f32.mrb[14].mxu0  ;;  %v248_v50 = vpop.f32.mrb[14].mxu1 }
  0xf4   :  { %v176_v58 = vadd.f32 %v175_v57, %v4011_v60  ;;  %v249_v55 = vadd.f32 %v248_v50, %v3999_v56  ;;  %v177_v6 = vpop.f32.mrb[15].mxu0  ;;  %v250_v19 = vpop.f32.mrb[15].mxu1  ;;  %v4133_v2 = vsel %vm35_vm1, %v4022_v3, %v172_v17  ;;  %v4138_v61 = vsel %vm35_vm1, %v4025_v5, %v245_v31 }
  0xf5   :  { %v178_v62 = vadd.f32 %v177_v6, %v4019_v63  ;;  %v251_v49 = vadd.f32 %v250_v19, %v4007_v59  ;;  %v4145_v56 = vsel %vm35_vm1, %v4028_v7, %v174_v27  ;;  %v4150_v60 = vsel %vm35_vm1, %v4031_v16, %v247_v38 }
  0xf6   :  { %v285_v50 = vsel %vm35_vm1, %v142_v9, %v176_v58  ;;  %v287_v52 = vsel %vm35_vm1, %v215_v26, %v249_v55  ;;  %v4159_v59 = vsel %vm35_vm1, %v172_v17, %v4022_v3  ;;  %v4164_v63 = vsel %vm35_vm1, %v245_v31, %v4025_v5 }
  0xf7   :  { %5632 = vst [vmem:[#allocation17_spill] sm:$0xff] %v4159_v59  ;;  %5633 = vst [vmem:[#allocation18_spill] sm:$0xff] %v4164_v63  ;;  %v286_v6 = vsel %vm35_vm1, %v144_v39, %v178_v62  ;;  %v288_v57 = vsel %vm35_vm1, %v217_v54, %v251_v49  ;;  %v4173_v19 = vsel %vm35_vm1, %v174_v27, %v4028_v7 }
  0xf8   :  { %5634 = vst [vmem:[#allocation19_spill] sm:$0xff] %v4173_v19  ;;  %v4178_v3 = vsel %vm35_vm1, %v247_v38, %v4031_v16  ;;  %v4182_v5 = vsel %vm35_vm1, %v176_v58, %v142_v9  ;;  %v4186_v17 = vsel %vm35_vm1, %v249_v55, %v215_v26  ;;  %v4190_v31 = vsel %vm35_vm1, %v178_v62, %v144_v39 }
  0xf9   :  { %5635 = vst [vmem:[#allocation20_spill] sm:$0xff] %v4178_v3  ;;  %5636 = vst [vmem:[#allocation21_spill] sm:$0xff] %v4182_v5  ;;  %v4194_v7 = vsel %vm35_vm1, %v251_v49, %v217_v54  ;;  %v483_v27 = vpop.f32.mrb[16].mxu0 }
  0xfa   :  { %5637 = vst [vmem:[#allocation22_spill] sm:$0xff] %v4186_v17  ;;  %5638 = vst [vmem:[#allocation23_spill] sm:$0xff] %v4194_v7  ;;  %v531_v19 = vadd.f32 %v483_v27, %v285_v50  ;;  %v524_v16 = vpop.f32.mrb[16].mxu1  ;;  %v485_v38 = vpop.f32.mrb[17].mxu0 }
  0xfb   :  { %v533_v3 = vadd.f32 %v524_v16, %v287_v52  ;;  %v532_v63 = vadd.f32 %v485_v38, %v286_v6  ;;  %v526_v9 = vpop.f32.mrb[17].mxu1  ;;  %v487_v58 = vpop.f32.mrb[18].mxu0 }
  0xfc   :  { %v3001_v5 = vmul.f32 -1.442695, %v531_v19  ;;  %v534_v59 = vadd.f32 %v526_v9, %v288_v57  ;;  %v488_v26 = vpop.f32.mrb[19].mxu0  ;;  %v528_v55 = vpop.f32.mrb[18].mxu1  ;;  %v5641_v9 = vld [vmem:[#allocation4_spill] sm:$0xff]  ;;  %v5642_v58 = vld [vmem:[#allocation5_spill] sm:$0xff] }
  0xfd   :  { %v3002_v17 = vmul.f32 -1.442695, %v532_v63  ;;  %v529_v1 = vpop.f32.mrb[19].mxu1  ;;  %v3003_v39 = vmul.f32 -1.442695, %v533_v3  ;;  %v5643_v26 = vld [vmem:[#allocation2_spill] sm:$0xff] }
  0xfe   :  { %3315 = vpow2.f32 %v3001_v5  ;;  %v5644_v55 = vld [vmem:[#allocation3_spill] sm:$0xff] }
  0xff   :  { %3317 = vpow2.f32 %v3002_v17  ;;  %v5640_v17 = vmov 0  }
 0x100   :  { %3319 = vpow2.f32 %v3003_v39 }
 0x101   :  { %3321 = vtanh.f32 %v534_v59 }
 0x108   :  { %v3316_v62 = vpop.eup %3315 }
 0x109   :  { %v544_v54 = vadd.f32 1.0, %v3316_v62  ;;  %v3318_v49 = vpop.eup %3317 }
 0x10a   :  { %v545_v50 = vadd.f32 1.0, %v3318_v49  ;;  %v3320_v52 = vpop.eup %3319 }
 0x10b   :  { %3323 = vrcp.f32 %v544_v54  ;;  %v3322_v6 = vpop.eup %3321  ;;  %v546_v16 = vadd.f32 1.0, %v3320_v52 }
 0x10c   :  { %3325 = vrcp.f32 %v545_v50 }
 0x10d   :  { %3327 = vrcp.f32 %v546_v16 }
 0x115   :  { %v3324_v27 = vpop.eup %3323 }
 0x116   :  { %v555_v19 = vmul.f32 %v3324_v27, %v3322_v6  ;;  %v3326_v57 = vpop.eup %3325 }
 0x117   :  { %v554_v38 = vmul.f32 0.0, %v3326_v57  ;;  %v3328_v1 = vpop.eup %3327 }
 0x119   :  { %v4196_v63 = vadd.f32 %v555_v19, %v554_v38 }
 0x11b   :  { %3329 = vtanh.f32 %v4196_v63 }
 0x125   :  { %v3330_v3 = vpop.eup %3329 }
 0x126   :  { %v4199_v5 = vmul.f32 %v3330_v3, %v3328_v1 }
 0x128   :  { %5639 = vst [vmem:[#allocation24_spill] sm:$0xff] %v4199_v5  ;;  %v563_v59 = vpack.c.bf16 %v4199_v5, %v4199_v5 }
 0x12a   :  { %597 = vmatmul.mubr.bf16.vlgmr.msra.gmra.mrb[20].mxu0 %v563_v59  ;;  %638 = vmatmul.mubr.bf16.vlgmr.msra.gmra.mrb[20].mxu1 %v563_v59 }
 0x12b   :  { %680 = vmatpush1.bf16.msra.mxu0 %v3737_v10  ;;  %721 = vmatpush1.bf16.msra.mxu1 %v3742_v11 }
 0x12c   :  { %681 = vmatprep.subr.bf16.mxu0 %v3748_v12  ;;  %722 = vmatprep.subr.bf16.mxu1 %v3755_v13 }
 0x12d   :  { %711 = vmatprep.mubr.bf16.mxu0 %v5640_v17  ;;  %752 = vmatprep.mubr.bf16.mxu1 %v5640_v17 }
 0x12f   :  { %682 = vmatpush1.bf16.msra.mxu0 %v3762_v14  ;;  %723 = vmatpush1.bf16.msra.mxu1 %v3767_v15 }
 0x130   :  { %683 = vmatprep.subr.bf16.mxu0 %v3782_v18  ;;  %724 = vmatprep.subr.bf16.mxu1 %v3788_v20 }
 0x133   :  { %684 = vmatpush1.bf16.msra.mxu0 %v3793_v21  ;;  %725 = vmatpush1.bf16.msra.mxu1 %v3799_v22 }
 0x134   :  { %685 = vmatprep.subr.bf16.mxu0 %v3806_v23  ;;  %726 = vmatprep.subr.bf16.mxu1 %v3812_v24 }
 0x137   :  { %686 = vmatpush1.bf16.msra.mxu0 %v3817_v25  ;;  %727 = vmatpush1.bf16.msra.mxu1 %v3834_v28 }
 0x138   :  { %687 = vmatprep.subr.bf16.mxu0 %v3839_v29  ;;  %728 = vmatprep.subr.bf16.mxu1 %v3846_v30 }
 0x13b   :  { %688 = vmatpush1.bf16.msra.mxu0 %v3852_v32  ;;  %729 = vmatpush1.bf16.msra.mxu1 %v3857_v33 }
 0x13c   :  { %689 = vmatprep.subr.bf16.mxu0 %v3864_v34  ;;  %730 = vmatprep.subr.bf16.mxu1 %v3870_v35 }
 0x13f   :  { %690 = vmatpush1.bf16.msra.mxu0 %v3877_v36  ;;  %731 = vmatpush1.bf16.msra.mxu1 %v3882_v37 }
 0x140   :  { %691 = vmatprep.subr.bf16.mxu0 %v3897_v40  ;;  %732 = vmatprep.subr.bf16.mxu1 %v3904_v41 }
 0x143   :  { %692 = vmatpush1.bf16.msra.mxu0 %v3910_v43  ;;  %733 = vmatpush1.bf16.msra.mxu1 %v3917_v44 }
 0x144   :  { %693 = vmatprep.subr.bf16.mxu0 %v3922_v45  ;;  %734 = vmatprep.subr.bf16.mxu1 %v3928_v46 }
 0x147   :  { %694 = vmatpush1.bf16.msra.mxu0 %v5641_v9  ;;  %735 = vmatpush1.bf16.msra.mxu1 %v5642_v58 }
 0x148   :  { %794 = vmatprep.subr.bf16.mxu0 %v5643_v26  ;;  %835 = vmatprep.subr.bf16.mxu1 %v5644_v55 }
 0x1fd   :  { %v598_v39 = vpop.f32.mrb[20].mxu0  ;;  %v639_v62 = vpop.f32.mrb[20].mxu1 }
 0x1fe   :  { %v646_v54 = vadd.f32 %v598_v39, %v4133_v2  ;;  %v648_v49 = vadd.f32 %v639_v62, %v4138_v61  ;;  %v600_v50 = vpop.f32.mrb[21].mxu0  ;;  %v641_v52 = vpop.f32.mrb[21].mxu1 }
 0x1ff   :  { %v647_v6 = vadd.f32 %v600_v50, %v4145_v56  ;;  %v649_v27 = vadd.f32 %v641_v52, %v4150_v60  ;;  %v602_v19 = vpop.f32.mrb[22].mxu0  ;;  %v643_v57 = vpop.f32.mrb[22].mxu1 }
 0x200   :  { %v3004_v16 = vmul.f32 -1.442695, %v646_v54  ;;  %v603_v38 = vpop.f32.mrb[23].mxu0  ;;  %v644_v1 = vpop.f32.mrb[23].mxu1  ;;  %v3006_v59 = vmul.f32 -1.442695, %v648_v49 }
 0x201   :  { %v3005_v3 = vmul.f32 -1.442695, %v647_v6 }
 0x202   :  { %3331 = vpow2.f32 %v3004_v16 }
 0x203   :  { %3333 = vpow2.f32 %v3005_v3 }
 0x204   :  { %3335 = vtanh.f32 %v649_v27 }
 0x205   :  { %3337 = vpow2.f32 %v3006_v59 }
 0x20c   :  { %v3332_v5 = vpop.eup %3331 }
 0x20d   :  { %v659_v7 = vadd.f32 1.0, %v3332_v5  ;;  %v3334_v2 = vpop.eup %3333 }
 0x20e   :  { %v660_v61 = vadd.f32 1.0, %v3334_v2  ;;  %v3336_v56 = vpop.eup %3335 }
 0x20f   :  { %3339 = vrcp.f32 %v659_v7  ;;  %v3338_v39 = vpop.eup %3337 }
 0x210   :  { %3341 = vrcp.f32 %v660_v61  ;;  %v661_v54 = vadd.f32 1.0, %v3338_v39 }
 0x212   :  { %3343 = vrcp.f32 %v661_v54 }
 0x219   :  { %v3340_v60 = vpop.eup %3339 }
 0x21a   :  { %v670_v62 = vmul.f32 %v3340_v60, %v3336_v56  ;;  %v3342_v50 = vpop.eup %3341 }
 0x21b   :  { %v669_v52 = vmul.f32 %v3342_v50, %v4196_v63 }
 0x21c   :  { %v3344_v5 = vpop.eup %3343 }
 0x21d   :  { %v4242_v6 = vadd.f32 %v670_v62, %v669_v52 }
 0x21f   :  { %3345 = vtanh.f32 %v4242_v6 }
 0x229   :  { %v3346_v49 = vpop.eup %3345 }
 0x22a   :  { %v4245_v27 = vmul.f32 %v3346_v49, %v3344_v5 }
 0x22c   :  { %v678_v7 = vpack.c.bf16 %v4245_v27, %v4245_v27 }
 0x22e   :  { %712 = vmatmul.mubr.bf16.vlgmr.msra.gmra.mrb[24].mxu0 %v678_v7  ;;  %753 = vmatmul.mubr.bf16.vlgmr.msra.gmra.mrb[24].mxu1 %v678_v7 }
 0x22f   :  { %795 = vmatpush1.bf16.msra.mxu0 %v3737_v10  ;;  %836 = vmatpush1.bf16.msra.mxu1 %v3742_v11 }
 0x230   :  { %796 = vmatprep.subr.bf16.mxu0 %v3748_v12  ;;  %837 = vmatprep.subr.bf16.mxu1 %v3755_v13 }
 0x231   :  { %826 = vmatprep.mubr.bf16.mxu0 %v5640_v17  ;;  %867 = vmatprep.mubr.bf16.mxu1 %v5640_v17 }
 0x233   :  { %797 = vmatpush1.bf16.msra.mxu0 %v3762_v14  ;;  %838 = vmatpush1.bf16.msra.mxu1 %v3767_v15 }
 0x234   :  { %798 = vmatprep.subr.bf16.mxu0 %v3782_v18  ;;  %839 = vmatprep.subr.bf16.mxu1 %v3788_v20 }
 0x237   :  { %799 = vmatpush1.bf16.msra.mxu0 %v3793_v21  ;;  %840 = vmatpush1.bf16.msra.mxu1 %v3799_v22 }
 0x238   :  { %800 = vmatprep.subr.bf16.mxu0 %v3806_v23  ;;  %841 = vmatprep.subr.bf16.mxu1 %v3812_v24 }
 0x23b   :  { %801 = vmatpush1.bf16.msra.mxu0 %v3817_v25  ;;  %842 = vmatpush1.bf16.msra.mxu1 %v3834_v28 }
 0x23c   :  { %802 = vmatprep.subr.bf16.mxu0 %v3839_v29  ;;  %843 = vmatprep.subr.bf16.mxu1 %v3846_v30 }
 0x23f   :  { %803 = vmatpush1.bf16.msra.mxu0 %v3852_v32  ;;  %844 = vmatpush1.bf16.msra.mxu1 %v3857_v33 }
 0x240   :  { %804 = vmatprep.subr.bf16.mxu0 %v3864_v34  ;;  %845 = vmatprep.subr.bf16.mxu1 %v3870_v35 }
 0x243   :  { %805 = vmatpush1.bf16.msra.mxu0 %v3877_v36  ;;  %846 = vmatpush1.bf16.msra.mxu1 %v3882_v37 }
 0x244   :  { %806 = vmatprep.subr.bf16.mxu0 %v3897_v40  ;;  %847 = vmatprep.subr.bf16.mxu1 %v3904_v41 }
 0x247   :  { %807 = vmatpush1.bf16.msra.mxu0 %v3910_v43  ;;  %848 = vmatpush1.bf16.msra.mxu1 %v3917_v44 }
 0x248   :  { %808 = vmatprep.subr.bf16.mxu0 %v3922_v45  ;;  %849 = vmatprep.subr.bf16.mxu1 %v3928_v46 }
 0x24b   :  { %809 = vmatpush1.bf16.msra.mxu0 %v5641_v9  ;;  %850 = vmatpush1.bf16.msra.mxu1 %v5642_v58 }
 0x24c   :  { %909 = vmatprep.subr.bf16.mxu0 %v5643_v26  ;;  %950 = vmatprep.subr.bf16.mxu1 %v5644_v55 }
 0x301   :  { %v713_v63 = vpop.f32.mrb[24].mxu0  ;;  %v754_v19 = vpop.f32.mrb[24].mxu1 }
 0x302   :  { %v761_v57 = vadd.f32 %v713_v63, %v4070_v4  ;;  %v763_v16 = vadd.f32 %v754_v19, %v4074_v47  ;;  %v715_v38 = vpop.f32.mrb[25].mxu0  ;;  %v756_v1 = vpop.f32.mrb[25].mxu1 }
 0x303   :  { %v762_v3 = vadd.f32 %v715_v38, %v4086_v42  ;;  %v764_v59 = vadd.f32 %v756_v1, %v4090_v0  ;;  %v717_v2 = vpop.f32.mrb[26].mxu0  ;;  %v758_v61 = vpop.f32.mrb[26].mxu1 }
 0x304   :  { %v3007_v56 = vmul.f32 -1.442695, %v761_v57  ;;  %v718_v39 = vpop.f32.mrb[27].mxu0  ;;  %v759_v60 = vpop.f32.mrb[27].mxu1  ;;  %v3009_v50 = vmul.f32 -1.442695, %v763_v16 }
 0x305   :  { %v3008_v62 = vmul.f32 -1.442695, %v762_v3  ;;  %v5648_v61 = vld [vmem:[#allocation11_spill] sm:$0xff] }
 0x306   :  { %3347 = vpow2.f32 %v3007_v56 }
 0x307   :  { %3349 = vpow2.f32 %v3008_v62 }
 0x308   :  { %3351 = vtanh.f32 %v764_v59  ;;  %v5647_v59 = vld [vmem:[#allocation10_spill] sm:$0xff] }
 0x309   :  { %3353 = vpow2.f32 %v3009_v50 }
 0x310   :  { %v3348_v54 = vpop.eup %3347 }
 0x311   :  { %v774_v52 = vadd.f32 1.0, %v3348_v54  ;;  %v3350_v4 = vpop.eup %3349 }
 0x312   :  { %v775_v47 = vadd.f32 1.0, %v3350_v4  ;;  %v3352_v42 = vpop.eup %3351 }
 0x313   :  { %3355 = vrcp.f32 %v774_v52  ;;  %v3354_v5 = vpop.eup %3353 }
 0x314   :  { %3357 = vrcp.f32 %v775_v47  ;;  %v776_v63 = vadd.f32 1.0, %v3354_v5 }
 0x316   :  { %3359 = vrcp.f32 %v776_v63 }
 0x31d   :  { %v3356_v0 = vpop.eup %3355 }
 0x31e   :  { %v785_v49 = vmul.f32 %v3356_v0, %v3352_v42  ;;  %v3358_v7 = vpop.eup %3357 }
 0x31f   :  { %v784_v19 = vmul.f32 %v3358_v7, %v4242_v6 }
 0x320   :  { %v3360_v16 = vpop.eup %3359 }
 0x321   :  { %v4288_v57 = vadd.f32 %v785_v49, %v784_v19 }
 0x323   :  { %3361 = vtanh.f32 %v4288_v57 }
 0x32d   :  { %v3362_v38 = vpop.eup %3361 }
 0x32e   :  { %v4291_v1 = vmul.f32 %v3362_v38, %v3360_v16 }
 0x330   :  { %v793_v3 = vpack.c.bf16 %v4291_v1, %v4291_v1 }
 0x332   :  { %827 = vmatmul.mubr.bf16.vlgmr.msra.gmra.mrb[28].mxu0 %v793_v3  ;;  %868 = vmatmul.mubr.bf16.vlgmr.msra.gmra.mrb[28].mxu1 %v793_v3 }
 0x333   :  { %910 = vmatpush1.bf16.msra.mxu0 %v3737_v10  ;;  %951 = vmatpush1.bf16.msra.mxu1 %v3742_v11 }
 0x334   :  { %911 = vmatprep.subr.bf16.mxu0 %v3748_v12  ;;  %952 = vmatprep.subr.bf16.mxu1 %v3755_v13  ;;  %v5645_v12 = vld [vmem:[#allocation8_spill] sm:$0xff] }
 0x335   :  { %941 = vmatprep.mubr.bf16.mxu0 %v5640_v17  ;;  %982 = vmatprep.mubr.bf16.mxu1 %v5640_v17 }
 0x337   :  { %912 = vmatpush1.bf16.msra.mxu0 %v3762_v14  ;;  %953 = vmatpush1.bf16.msra.mxu1 %v3767_v15  ;;  %v5646_v14 = vld [vmem:[#allocation9_spill] sm:$0xff] }
 0x338   :  { %913 = vmatprep.subr.bf16.mxu0 %v3782_v18  ;;  %954 = vmatprep.subr.bf16.mxu1 %v3788_v20 }
 0x33b   :  { %914 = vmatpush1.bf16.msra.mxu0 %v3793_v21  ;;  %955 = vmatpush1.bf16.msra.mxu1 %v3799_v22 }
 0x33c   :  { %915 = vmatprep.subr.bf16.mxu0 %v3806_v23  ;;  %956 = vmatprep.subr.bf16.mxu1 %v3812_v24 }
 0x33f   :  { %916 = vmatpush1.bf16.msra.mxu0 %v3817_v25  ;;  %957 = vmatpush1.bf16.msra.mxu1 %v3834_v28 }
 0x340   :  { %917 = vmatprep.subr.bf16.mxu0 %v3839_v29  ;;  %958 = vmatprep.subr.bf16.mxu1 %v3846_v30 }
 0x343   :  { %918 = vmatpush1.bf16.msra.mxu0 %v3852_v32  ;;  %959 = vmatpush1.bf16.msra.mxu1 %v3857_v33 }
 0x344   :  { %919 = vmatprep.subr.bf16.mxu0 %v3864_v34  ;;  %960 = vmatprep.subr.bf16.mxu1 %v3870_v35 }
 0x347   :  { %920 = vmatpush1.bf16.msra.mxu0 %v3877_v36  ;;  %961 = vmatpush1.bf16.msra.mxu1 %v3882_v37 }
 0x348   :  { %921 = vmatprep.subr.bf16.mxu0 %v3897_v40  ;;  %962 = vmatprep.subr.bf16.mxu1 %v3904_v41 }
 0x34b   :  { %922 = vmatpush1.bf16.msra.mxu0 %v3910_v43  ;;  %963 = vmatpush1.bf16.msra.mxu1 %v3917_v44 }
 0x34c   :  { %923 = vmatprep.subr.bf16.mxu0 %v3922_v45  ;;  %964 = vmatprep.subr.bf16.mxu1 %v3928_v46 }
 0x34f   :  { %924 = vmatpush1.bf16.msra.mxu0 %v5641_v9  ;;  %965 = vmatpush1.bf16.msra.mxu1 %v5642_v58 }
 0x350   :  { %1024 = vmatprep.subr.bf16.mxu0 %v5643_v26  ;;  %1065 = vmatprep.subr.bf16.mxu1 %v5644_v55 }
 0x405   :  { %v828_v10 = vpop.f32.mrb[28].mxu0  ;;  %v869_v11 = vpop.f32.mrb[28].mxu1 }
 0x406   :  { %v876_v13 = vadd.f32 %v828_v10, %v5645_v12  ;;  %v878_v15 = vadd.f32 %v869_v11, %v5646_v14  ;;  %v830_v18 = vpop.f32.mrb[29].mxu0  ;;  %v871_v6 = vpop.f32.mrb[29].mxu1  ;;  %v4356_v14 = vld [vmem:[%s5588_s2 + $0x24] ss:$16 sps:$4 sm:$0xff]  }
 0x407   :  { %v877_v2 = vadd.f32 %v830_v18, %v5647_v59  ;;  %v879_v56 = vadd.f32 %v871_v6, %v5648_v61  ;;  %v832_v39 = vpop.f32.mrb[30].mxu0  ;;  %v873_v60 = vpop.f32.mrb[30].mxu1  ;;  %v4370_v18 = vld [vmem:[%s5588_s2 + $0x20] ss:$16 sps:$4 sm:$0xff]   ;;  %v4376_v6 = vld [vmem:[%s5588_s2 + $0x28] ss:$16 sps:$4 sm:$0xff]  }
 0x408   :  { %v3010_v62 = vmul.f32 -1.442695, %v876_v13  ;;  %v833_v50 = vpop.f32.mrb[31].mxu0  ;;  %v874_v54 = vpop.f32.mrb[31].mxu1  ;;  %v3012_v55 = vmul.f32 -1.442695, %v878_v15 }
 0x409   :  { %v3011_v26 = vmul.f32 -1.442695, %v877_v2  ;;  %v4344_v13 = vld [vmem:[%s5588_s2] ss:$16 sps:$4 sm:$0xff]   ;;  %v4362_v15 = vld [vmem:[%s5588_s2 + $0x2c] ss:$16 sps:$4 sm:$0xff]  }
 0x40a   :  { %3363 = vpow2.f32 %v3010_v62  ;;  %v4382_v59 = vld [vmem:[%s5588_s2 + $0x44] ss:$16 sps:$4 sm:$0xff]  }
 0x40b   :  { %3365 = vpow2.f32 %v3011_v26  ;;  %v4444_v26 = vld [vmem:[%s5588_s2 + $0x4c] ss:$16 sps:$4 sm:$0xff]  }
 0x40c   :  { %3367 = vtanh.f32 %v879_v56 }
 0x40d   :  { %3369 = vpow2.f32 %v3012_v55  ;;  %v4450_v55 = vld [vmem:[%s5588_s2 + $0x40] ss:$16 sps:$4 sm:$0xff]  }
 0x414   :  { %v3364_v52 = vpop.eup %3363 }
 0x415   :  { %v889_v4 = vadd.f32 1.0, %v3364_v52  ;;  %v3366_v47 = vpop.eup %3365  ;;  %v4456_v52 = vld [vmem:[%s5588_s2 + $0x48] ss:$16 sps:$4 sm:$0xff]  }
 0x416   :  { %v890_v42 = vadd.f32 1.0, %v3366_v47  ;;  %v3368_v5 = vpop.eup %3367  ;;  %v4468_v47 = vld [vmem:[%s5588_s2 + $0x6c] ss:$16 sps:$4 sm:$0xff]  }
 0x417   :  { %3371 = vrcp.f32 %v889_v4  ;;  %v3370_v0 = vpop.eup %3369  ;;  %v4462_v4 = vld [vmem:[%s5588_s2 + $0x64] ss:$16 sps:$4 sm:$0xff]  }
 0x418   :  { %3373 = vrcp.f32 %v890_v42  ;;  %v891_v19 = vadd.f32 1.0, %v3370_v0  ;;  %v4474_v42 = vld [vmem:[%s5588_s2 + $0x60] ss:$16 sps:$4 sm:$0xff]   ;;  %v4486_v0 = vld [vmem:[%s5588_s2 + $0x84] ss:$16 sps:$4 sm:$0xff]  }
 0x41a   :  { %3375 = vrcp.f32 %v891_v19  ;;  %v4510_v19 = vld [vmem:[%s5588_s2 + $0xa4] ss:$16 sps:$4 sm:$0xff]  }
 0x421   :  { %v3372_v49 = vpop.eup %3371 }
 0x422   :  { %v900_v7 = vmul.f32 %v3372_v49, %v3368_v5  ;;  %v3374_v63 = vpop.eup %3373  ;;  %v4480_v5 = vld [vmem:[%s5588_s2 + $0x68] ss:$16 sps:$4 sm:$0xff]   ;;  %v4492_v49 = vld [vmem:[%s5588_s2 + $0x8c] ss:$16 sps:$4 sm:$0xff]  }
 0x423   :  { %v899_v16 = vmul.f32 %v3374_v63, %v4288_v57  ;;  %v4350_v57 = vld [vmem:[%s5588_s2 + $0x8] ss:$16 sps:$4 sm:$0xff]  }
 0x424   :  { %v3376_v3 = vpop.eup %3375  ;;  %v4504_v63 = vld [vmem:[%s5588_s2 + $0x88] ss:$16 sps:$4 sm:$0xff]  }
 0x425   :  { %v4334_v38 = vadd.f32 %v900_v7, %v899_v16  ;;  %v4498_v7 = vld [vmem:[%s5588_s2 + $0x80] ss:$16 sps:$4 sm:$0xff]   ;;  %v4516_v16 = vld [vmem:[%s5588_s2 + $0xac] ss:$16 sps:$4 sm:$0xff]  }
 0x427   :  { %3377 = vtanh.f32 %v4334_v38 }
 0x431   :  { %v3378_v10 = vpop.eup %3377 }
 0x432   :  { %v4337_v11 = vmul.f32 %v3378_v10, %v3376_v3  ;;  %v4528_v3 = vld [vmem:[%s5588_s2 + $0xa8] ss:$16 sps:$4 sm:$0xff]   ;;  %v4534_v10 = vld [vmem:[%s5588_s2 + $0xc4] ss:$16 sps:$4 sm:$0xff]  }
 0x434   :  { %v908_v12 = vpack.c.bf16 %v4337_v11, %v4337_v11 }
 0x436   :  { %942 = vmatmul.mubr.bf16.vlgmr.msra.gmra.mrb[32].mxu0 %v908_v12  ;;  %983 = vmatmul.mubr.bf16.vlgmr.msra.gmra.mrb[32].mxu1 %v908_v12  ;;  %v4540_v12 = vld [vmem:[%s5588_s2 + $0xcc] ss:$16 sps:$4 sm:$0xff]  }
 0x437   :  { %1025 = vmatpush1.bf16.msra.mxu0 %v4344_v13  ;;  %1066 = vmatpush1.bf16.msra.mxu1 %v4350_v57 }
 0x438   :  { %1026 = vmatprep.subr.bf16.mxu0 %v4356_v14  ;;  %1067 = vmatprep.subr.bf16.mxu1 %v4362_v15 }
 0x439   :  { %1056 = vmatprep.mubr.bf16.mxu0 %v5640_v17  ;;  %1097 = vmatprep.mubr.bf16.mxu1 %v5640_v17 }
 0x43b   :  { %1027 = vmatpush1.bf16.msra.mxu0 %v4370_v18  ;;  %1068 = vmatpush1.bf16.msra.mxu1 %v4376_v6 }
 0x43c   :  { %1028 = vmatprep.subr.bf16.mxu0 %v4382_v59  ;;  %1069 = vmatprep.subr.bf16.mxu1 %v3788_v20  ;;  %v4411_v20 = vld [vmem:[%s5588_s2 + $0x4] ss:$16 sps:$4 sm:$0xff]  }
 0x43f   :  { %1029 = vmatpush1.bf16.msra.mxu0 %v3793_v21  ;;  %1070 = vmatpush1.bf16.msra.mxu1 %v3799_v22  ;;  %v4417_v21 = vld [vmem:[%s5588_s2 + $0xc] ss:$16 sps:$4 sm:$0xff]  }
 0x440   :  { %1030 = vmatprep.subr.bf16.mxu0 %v3806_v23  ;;  %1071 = vmatprep.subr.bf16.mxu1 %v3812_v24 }
 0x443   :  { %1031 = vmatpush1.bf16.msra.mxu0 %v3817_v25  ;;  %1072 = vmatpush1.bf16.msra.mxu1 %v3834_v28 }
 0x444   :  { %1032 = vmatprep.subr.bf16.mxu0 %v3839_v29  ;;  %1073 = vmatprep.subr.bf16.mxu1 %v3846_v30  ;;  %v5649_v30 = vld [vmem:[#allocation12_spill] sm:$0xff] }
 0x447   :  { %1033 = vmatpush1.bf16.msra.mxu0 %v3852_v32  ;;  %1074 = vmatpush1.bf16.msra.mxu1 %v3857_v33 }
 0x448   :  { %1034 = vmatprep.subr.bf16.mxu0 %v3864_v34  ;;  %1075 = vmatprep.subr.bf16.mxu1 %v3870_v35 }
 0x44b   :  { %1035 = vmatpush1.bf16.msra.mxu0 %v3877_v36  ;;  %1076 = vmatpush1.bf16.msra.mxu1 %v3882_v37 }
 0x44c   :  { %1036 = vmatprep.subr.bf16.mxu0 %v3897_v40  ;;  %1077 = vmatprep.subr.bf16.mxu1 %v3904_v41 }
 0x44f   :  { %1037 = vmatpush1.bf16.msra.mxu0 %v3910_v43  ;;  %1078 = vmatpush1.bf16.msra.mxu1 %v3917_v44 }
 0x450   :  { %1038 = vmatprep.subr.bf16.mxu0 %v3922_v45  ;;  %1079 = vmatprep.subr.bf16.mxu1 %v3928_v46 }
 0x453   :  { %1039 = vmatpush1.bf16.msra.mxu0 %v5641_v9  ;;  %1080 = vmatpush1.bf16.msra.mxu1 %v5642_v58 }
 0x454   :  { %1139 = vmatprep.subr.bf16.mxu0 %v4411_v20  ;;  %1180 = vmatprep.subr.bf16.mxu1 %v4417_v21 }
 0x509   :  { %v943_v22 = vpop.f32.mrb[32].mxu0  ;;  %v984_v23 = vpop.f32.mrb[32].mxu1 }
 0x50a   :  { %v991_v24 = vadd.f32 %v943_v22, %v4078_v8  ;;  %v993_v25 = vadd.f32 %v984_v23, %v4082_v48  ;;  %v945_v28 = vpop.f32.mrb[33].mxu0  ;;  %v986_v29 = vpop.f32.mrb[33].mxu1  ;;  %v4546_v22 = vld [vmem:[%s5588_s2 + $0xc0] ss:$16 sps:$4 sm:$0xff]   ;;  %v4552_v23 = vld [vmem:[%s5588_s2 + $0xc8] ss:$16 sps:$4 sm:$0xff]  }
 0x50b   :  { %v992_v32 = vadd.f32 %v945_v28, %v5649_v30  ;;  %v994_v33 = vadd.f32 %v986_v29, %v4098_v53  ;;  %v947_v34 = vpop.f32.mrb[34].mxu0  ;;  %v988_v35 = vpop.f32.mrb[34].mxu1  ;;  %v4570_v28 = vld [vmem:[%s5588_s2 + $0xe0] ss:$16 sps:$4 sm:$0xff]   ;;  %v4576_v29 = vld [vmem:[%s5588_s2 + $0xe8] ss:$16 sps:$4 sm:$0xff]  }
 0x50c   :  { %v3013_v36 = vmul.f32 -1.442695, %v991_v24  ;;  %v948_v37 = vpop.f32.mrb[35].mxu0  ;;  %v989_v40 = vpop.f32.mrb[35].mxu1  ;;  %v3015_v43 = vmul.f32 -1.442695, %v993_v25 }
 0x50d   :  { %v3014_v41 = vmul.f32 -1.442695, %v992_v32  ;;  %v4558_v24 = vld [vmem:[%s5588_s2 + $0xe4] ss:$16 sps:$4 sm:$0xff]   ;;  %v4564_v25 = vld [vmem:[%s5588_s2 + $0xec] ss:$16 sps:$4 sm:$0xff]  }
 0x50e   :  { %3379 = vpow2.f32 %v3013_v36  ;;  %v5651_v35 = vld [vmem:[#allocation14_spill] sm:$0xff] }
 0x50f   :  { %3381 = vpow2.f32 %v3014_v41  ;;  %v5652_v41 = vld [vmem:[#allocation15_spill] sm:$0xff] }
 0x510   :  { %3383 = vtanh.f32 %v994_v33  ;;  %v5650_v33 = vld [vmem:[#allocation13_spill] sm:$0xff] }
 0x511   :  { %3385 = vpow2.f32 %v3015_v43 }
 0x518   :  { %v3380_v44 = vpop.eup %3379 }
 0x519   :  { %v1004_v45 = vadd.f32 1.0, %v3380_v44  ;;  %v3382_v46 = vpop.eup %3381  ;;  %v5653_v44 = vld [vmem:[#allocation16_spill] sm:$0xff] }
 0x51a   :  { %v1005_v8 = vadd.f32 1.0, %v3382_v46  ;;  %v3384_v48 = vpop.eup %3383 }
 0x51b   :  { %3387 = vrcp.f32 %v1004_v45  ;;  %v3386_v9 = vpop.eup %3385 }
 0x51c   :  { %3389 = vrcp.f32 %v1005_v8  ;;  %v1006_v61 = vadd.f32 1.0, %v3386_v9 }
 0x51e   :  { %3391 = vrcp.f32 %v1006_v61 }
 0x525   :  { %v3388_v53 = vpop.eup %3387 }
 0x526   :  { %v1015_v58 = vmul.f32 %v3388_v53, %v3384_v48  ;;  %v3390_v2 = vpop.eup %3389 }
 0x527   :  { %v1014_v56 = vmul.f32 %v3390_v2, %v4334_v38  ;;  %v4522_v38 = vld [vmem:[%s5588_s2 + $0xa0] ss:$16 sps:$4 sm:$0xff]  }
 0x528   :  { %v3392_v60 = vpop.eup %3391 }
 0x529   :  { %v4425_v39 = vadd.f32 %v1015_v58, %v1014_v56 }
 0x52b   :  { %3393 = vtanh.f32 %v4425_v39 }
 0x535   :  { %v3394_v62 = vpop.eup %3393 }
 0x536   :  { %v4428_v50 = vmul.f32 %v3394_v62, %v3392_v60 }
 0x538   :  { %v1023_v54 = vpack.c.bf16 %v4428_v50, %v4428_v50 }
 0x53a   :  { %1057 = vmatmul.mubr.bf16.vlgmr.msra.gmra.mrb[36].mxu0 %v1023_v54  ;;  %1098 = vmatmul.mubr.bf16.vlgmr.msra.gmra.mrb[36].mxu1 %v1023_v54 }
 0x53b   :  { %1140 = vmatpush1.bf16.msra.mxu0 %v4344_v13  ;;  %1181 = vmatpush1.bf16.msra.mxu1 %v4350_v57 }
 0x53c   :  { %1141 = vmatprep.subr.bf16.mxu0 %v4356_v14  ;;  %1182 = vmatprep.subr.bf16.mxu1 %v4362_v15 }
 0x53d   :  { %1171 = vmatprep.mubr.bf16.mxu0 %v5640_v17  ;;  %1212 = vmatprep.mubr.bf16.mxu1 %v5640_v17 }
 0x53f   :  { %1142 = vmatpush1.bf16.msra.mxu0 %v4370_v18  ;;  %1183 = vmatpush1.bf16.msra.mxu1 %v4376_v6 }
 0x540   :  { %1143 = vmatprep.subr.bf16.mxu0 %v4382_v59  ;;  %1184 = vmatprep.subr.bf16.mxu1 %v4444_v26 }
 0x543   :  { %1144 = vmatpush1.bf16.msra.mxu0 %v4450_v55  ;;  %1185 = vmatpush1.bf16.msra.mxu1 %v4456_v52 }
 0x544   :  { %1145 = vmatprep.subr.bf16.mxu0 %v4462_v4  ;;  %1186 = vmatprep.subr.bf16.mxu1 %v4468_v47 }
 0x547   :  { %1146 = vmatpush1.bf16.msra.mxu0 %v4474_v42  ;;  %1187 = vmatpush1.bf16.msra.mxu1 %v4480_v5 }
 0x548   :  { %1147 = vmatprep.subr.bf16.mxu0 %v4486_v0  ;;  %1188 = vmatprep.subr.bf16.mxu1 %v4492_v49 }
 0x54b   :  { %1148 = vmatpush1.bf16.msra.mxu0 %v4498_v7  ;;  %1189 = vmatpush1.bf16.msra.mxu1 %v4504_v63 }
 0x54c   :  { %1149 = vmatprep.subr.bf16.mxu0 %v4510_v19  ;;  %1190 = vmatprep.subr.bf16.mxu1 %v4516_v16 }
 0x54f   :  { %1150 = vmatpush1.bf16.msra.mxu0 %v4522_v38  ;;  %1191 = vmatpush1.bf16.msra.mxu1 %v4528_v3 }
 0x550   :  { %1151 = vmatprep.subr.bf16.mxu0 %v4534_v10  ;;  %1192 = vmatprep.subr.bf16.mxu1 %v4540_v12 }
 0x553   :  { %1152 = vmatpush1.bf16.msra.mxu0 %v4546_v22  ;;  %1193 = vmatpush1.bf16.msra.mxu1 %v4552_v23 }
 0x554   :  { %1153 = vmatprep.subr.bf16.mxu0 %v4558_v24  ;;  %1194 = vmatprep.subr.bf16.mxu1 %v4564_v25 }
 0x557   :  { %1154 = vmatpush1.bf16.msra.mxu0 %v4570_v28  ;;  %1195 = vmatpush1.bf16.msra.mxu1 %v4576_v29 }
 0x558   :  { %1254 = vmatprep.subr.bf16.mxu0 %v4411_v20  ;;  %1295 = vmatprep.subr.bf16.mxu1 %v4417_v21 }
 0x60d   :  { %v1058_v30 = vpop.f32.mrb[36].mxu0  ;;  %v1099_v32 = vpop.f32.mrb[36].mxu1 }
 0x60e   :  { %v1106_v34 = vadd.f32 %v1058_v30, %v5650_v33  ;;  %v1108_v36 = vadd.f32 %v1099_v32, %v5651_v35  ;;  %v1060_v37 = vpop.f32.mrb[37].mxu0  ;;  %v1101_v40 = vpop.f32.mrb[37].mxu1 }
 0x60f   :  { %v1107_v43 = vadd.f32 %v1060_v37, %v5652_v41  ;;  %v1109_v45 = vadd.f32 %v1101_v40, %v5653_v44  ;;  %v1062_v46 = vpop.f32.mrb[38].mxu0  ;;  %v1103_v8 = vpop.f32.mrb[38].mxu1  ;;  %v1367_v41 = vsel %vm35_vm1, %v4337_v11, %v4428_v50 }
 0x610   :  { %v3016_v48 = vmul.f32 -1.442695, %v1106_v34  ;;  %v1063_v9 = vpop.f32.mrb[39].mxu0  ;;  %v1104_v53 = vpop.f32.mrb[39].mxu1  ;;  %v3018_v21 = vmul.f32 -1.442695, %v1108_v36 }
 0x611   :  { %v3017_v20 = vmul.f32 -1.442695, %v1107_v43  ;;  %v3213_v53 = vld [vmem:[%s5590_s4 + $0x4] ss:$16 sps:$4 sm:$0xff]  }
 0x612   :  { %3395 = vpow2.f32 %v3016_v48 }
 0x613   :  { %3397 = vpow2.f32 %v3017_v20  ;;  %v3211_v20 = vld [vmem:[%s5590_s4] ss:$16 sps:$4 sm:$0xff]  }
 0x614   :  { %3399 = vtanh.f32 %v1109_v45 }
 0x615   :  { %3401 = vpow2.f32 %v3018_v21  ;;  %v3214_v21 = vld [vmem:[%s5590_s4 + $0x8] ss:$16 sps:$4 sm:$0xff]  }
 0x61c   :  { %v3396_v58 = vpop.eup %3395 }
 0x61d   :  { %v1119_v2 = vadd.f32 1.0, %v3396_v58  ;;  %v3398_v61 = vpop.eup %3397  ;;  %v3216_v58 = vld [vmem:[%s5590_s4 + $0xc] ss:$16 sps:$4 sm:$0xff]  }
 0x61e   :  { %v1120_v56 = vadd.f32 1.0, %v3398_v61  ;;  %v3400_v60 = vpop.eup %3399  ;;  %v3222_v61 = vld [vmem:[%s5590_s4 + $0x2c] ss:$16 sps:$4 sm:$0xff]  }
 0x61f   :  { %3403 = vrcp.f32 %v1119_v2  ;;  %v3402_v62 = vpop.eup %3401  ;;  %v3219_v2 = vld [vmem:[%s5590_s4 + $0x24] ss:$16 sps:$4 sm:$0xff]  }
 0x620   :  { %3405 = vrcp.f32 %v1120_v56  ;;  %v1121_v33 = vadd.f32 1.0, %v3402_v62  ;;  %v3217_v56 = vld [vmem:[%s5590_s4 + $0x20] ss:$16 sps:$4 sm:$0xff]   ;;  %v3225_v62 = vld [vmem:[%s5590_s4 + $0x44] ss:$16 sps:$4 sm:$0xff]  }
 0x622   :  { %3407 = vrcp.f32 %v1121_v33  ;;  %v3231_v33 = vld [vmem:[%s5590_s4 + $0x64] ss:$16 sps:$4 sm:$0xff]  }
 0x629   :  { %v3404_v54 = vpop.eup %3403 }
 0x62a   :  { %v1130_v30 = vmul.f32 %v3404_v54, %v3400_v60  ;;  %v3406_v32 = vpop.eup %3405  ;;  %v3220_v60 = vld [vmem:[%s5590_s4 + $0x28] ss:$16 sps:$4 sm:$0xff]   ;;  %v3228_v54 = vld [vmem:[%s5590_s4 + $0x4c] ss:$16 sps:$4 sm:$0xff]  }
 0x62b   :  { %v1129_v34 = vmul.f32 %v3406_v32, %v4425_v39  ;;  %v1368_v39 = vsel %vm35_vm1, %v4428_v50, %v4337_v11  ;;  %v3226_v32 = vld [vmem:[%s5590_s4 + $0x48] ss:$16 sps:$4 sm:$0xff]  }
 0x62c   :  { %v3408_v36 = vpop.eup %3407 }
 0x62d   :  { %v4586_v35 = vadd.f32 %v1130_v30, %v1129_v34  ;;  %v3223_v30 = vld [vmem:[%s5590_s4 + $0x40] ss:$16 sps:$4 sm:$0xff]   ;;  %v3234_v34 = vld [vmem:[%s5590_s4 + $0x6c] ss:$16 sps:$4 sm:$0xff]  }
 0x62f   :  { %3409 = vtanh.f32 %v4586_v35 }
 0x639   :  { %v3410_v37 = vpop.eup %3409 }
 0x63a   :  { %v1133_v40 = vmul.f32 %v3410_v37, %v3408_v36  ;;  %v3232_v36 = vld [vmem:[%s5590_s4 + $0x68] ss:$16 sps:$4 sm:$0xff]   ;;  %v3237_v37 = vld [vmem:[%s5590_s4 + $0x84] ss:$16 sps:$4 sm:$0xff]  }
 0x63c   :  { %v1138_v43 = vpack.c.bf16 %v1133_v40, %v1133_v40  ;;  %v1366_v44 = vsel %vm35_vm1, %v4291_v1, %v1133_v40  ;;  %v1369_v45 = vsel %vm35_vm1, %v1133_v40, %v4291_v1  ;;  %v3240_v40 = vld [vmem:[%s5590_s4 + $0x8c] ss:$16 sps:$4 sm:$0xff]  }
 0x63d   :  { %v4603_v46 = vpack.c.bf16 %v1367_v41, %v1366_v44  ;;  %v4605_v8 = vpack.c.bf16 %v1369_v45, %v1368_v39  ;;  %v3235_v41 = vld [vmem:[%s5590_s4 + $0x80] ss:$16 sps:$4 sm:$0xff]   ;;  %v3243_v44 = vld [vmem:[%s5590_s4 + $0xa4] ss:$16 sps:$4 sm:$0xff]   ;;  %v3246_v45 = vld [vmem:[%s5590_s4 + $0xac] ss:$16 sps:$4 sm:$0xff]  }
 0x63e   :  { %1172 = vmatmul.mubr.bf16.vlgmr.msra.gmra.mrb[40].mxu0 %v1138_v43  ;;  %1213 = vmatmul.mubr.bf16.vlgmr.msra.gmra.mrb[40].mxu1 %v1138_v43  ;;  %v3238_v43 = vld [vmem:[%s5590_s4 + $0x88] ss:$16 sps:$4 sm:$0xff]   ;;  %v3241_v39 = vld [vmem:[%s5590_s4 + $0xa0] ss:$16 sps:$4 sm:$0xff]  }
 0x63f   :  { %1255 = vmatpush1.bf16.msra.mxu0 %v4344_v13  ;;  %1296 = vmatpush1.bf16.msra.mxu1 %v4350_v57  ;;  %v5654_v13 = vld [vmem:[#allocation17_spill] sm:$0xff] }
 0x640   :  { %1256 = vmatprep.subr.bf16.mxu0 %v4356_v14  ;;  %1297 = vmatprep.subr.bf16.mxu1 %v4362_v15  ;;  %v5655_v14 = vld [vmem:[#allocation18_spill] sm:$0xff] }
 0x641   :  { %1286 = vmatprep.mubr.bf16.mxu0 %v5640_v17  ;;  %1327 = vmatprep.mubr.bf16.mxu1 %v5640_v17 }
 0x643   :  { %1257 = vmatpush1.bf16.msra.mxu0 %v4370_v18  ;;  %1298 = vmatpush1.bf16.msra.mxu1 %v4376_v6 }
 0x644   :  { %1258 = vmatprep.subr.bf16.mxu0 %v4382_v59  ;;  %1299 = vmatprep.subr.bf16.mxu1 %v4444_v26  ;;  %v5656_v59 = vld [vmem:[#allocation19_spill] sm:$0xff]  ;;  %v5657_v26 = vld [vmem:[#allocation20_spill] sm:$0xff] }
 0x647   :  { %1259 = vmatpush1.bf16.msra.mxu0 %v4450_v55  ;;  %1300 = vmatpush1.bf16.msra.mxu1 %v4456_v52 }
 0x648   :  { %1260 = vmatprep.subr.bf16.mxu0 %v4462_v4  ;;  %1301 = vmatprep.subr.bf16.mxu1 %v4468_v47 }
 0x64b   :  { %1261 = vmatpush1.bf16.msra.mxu0 %v4474_v42  ;;  %1302 = vmatpush1.bf16.msra.mxu1 %v4480_v5 }
 0x64c   :  { %1262 = vmatprep.subr.bf16.mxu0 %v4486_v0  ;;  %1303 = vmatprep.subr.bf16.mxu1 %v4492_v49 }
 0x64f   :  { %1263 = vmatpush1.bf16.msra.mxu0 %v4498_v7  ;;  %1304 = vmatpush1.bf16.msra.mxu1 %v4504_v63 }
 0x650   :  { %1264 = vmatprep.subr.bf16.mxu0 %v4510_v19  ;;  %1305 = vmatprep.subr.bf16.mxu1 %v4516_v16 }
 0x653   :  { %1265 = vmatpush1.bf16.msra.mxu0 %v4522_v38  ;;  %1306 = vmatpush1.bf16.msra.mxu1 %v4528_v3 }
 0x654   :  { %1266 = vmatprep.subr.bf16.mxu0 %v4534_v10  ;;  %1307 = vmatprep.subr.bf16.mxu1 %v4540_v12 }
 0x657   :  { %1267 = vmatpush1.bf16.msra.mxu0 %v4546_v22  ;;  %1308 = vmatpush1.bf16.msra.mxu1 %v4552_v23 }
 0x658   :  { %1268 = vmatprep.subr.bf16.mxu0 %v4558_v24  ;;  %1309 = vmatprep.subr.bf16.mxu1 %v4564_v25 }
 0x65b   :  { %1269 = vmatpush1.bf16.msra.mxu0 %v4570_v28  ;;  %1310 = vmatpush1.bf16.msra.mxu1 %v4576_v29 }
 0x65c   :  { %1590 = vmatprep.subr.bf16.mxu0 %v3213_v53  ;;  %1663 = vmatprep.subr.bf16.mxu1 %v3216_v58 }
 0x711   :  { %v1173_v1 = vpop.f32.mrb[40].mxu0  ;;  %v1214_v11 = vpop.f32.mrb[40].mxu1 }
 0x712   :  { %v1221_v57 = vadd.f32 %v1173_v1, %v5654_v13  ;;  %v1223_v15 = vadd.f32 %v1214_v11, %v5655_v14  ;;  %v1175_v18 = vpop.f32.mrb[41].mxu0  ;;  %v1216_v6 = vpop.f32.mrb[41].mxu1  ;;  %v3249_v1 = vld [vmem:[%s5590_s4 + $0xc4] ss:$16 sps:$4 sm:$0xff]   ;;  %v3244_v11 = vld [vmem:[%s5590_s4 + $0xa8] ss:$16 sps:$4 sm:$0xff]  }
 0x713   :  { %v1222_v50 = vadd.f32 %v1175_v18, %v5656_v59  ;;  %v1224_v55 = vadd.f32 %v1216_v6, %v5657_v26  ;;  %v1177_v52 = vpop.f32.mrb[42].mxu0  ;;  %v1218_v4 = vpop.f32.mrb[42].mxu1  ;;  %v3252_v13 = vld [vmem:[%s5590_s4 + $0xcc] ss:$16 sps:$4 sm:$0xff]   ;;  %v3255_v14 = vld [vmem:[%s5590_s4 + $0xe4] ss:$16 sps:$4 sm:$0xff]  }
 0x714   :  { %v3019_v47 = vmul.f32 -1.442695, %v1221_v57  ;;  %v1178_v42 = vpop.f32.mrb[43].mxu0  ;;  %v1219_v5 = vpop.f32.mrb[43].mxu1  ;;  %v3021_v49 = vmul.f32 -1.442695, %v1223_v15 }
 0x715   :  { %v3020_v0 = vmul.f32 -1.442695, %v1222_v50  ;;  %v3247_v57 = vld [vmem:[%s5590_s4 + $0xc0] ss:$16 sps:$4 sm:$0xff]   ;;  %v3250_v15 = vld [vmem:[%s5590_s4 + $0xc8] ss:$16 sps:$4 sm:$0xff]  }
 0x716   :  { %3411 = vpow2.f32 %v3019_v47  ;;  %v3258_v18 = vld [vmem:[%s5590_s4 + $0xec] ss:$16 sps:$4 sm:$0xff]   ;;  %v3253_v6 = vld [vmem:[%s5590_s4 + $0xe0] ss:$16 sps:$4 sm:$0xff]   ;;  %v3256_v59 = vld [vmem:[%s5590_s4 + $0xe8] ss:$16 sps:$4 sm:$0xff]  }
 0x717   :  { %3413 = vpow2.f32 %v3020_v0  ;;  %v4752_v50 = vld [vmem:[%s5591_s5 + $0x4] ss:$16 sps:$4 sm:$0xff]   ;;  %v4757_v26 = vld [vmem:[%s5591_s5 + $0xc] ss:$16 sps:$4 sm:$0xff]  }
 0x718   :  { %3415 = vtanh.f32 %v1224_v55  ;;  %v5658_v4 = vld [vmem:[#allocation21_spill] sm:$0xff]  ;;  %v5659_v42 = vld [vmem:[#allocation22_spill] sm:$0xff] }
 0x719   :  { %3417 = vpow2.f32 %v3021_v49 }
 0x720   :  { %v3412_v7 = vpop.eup %3411 }
 0x721   :  { %v1234_v63 = vadd.f32 1.0, %v3412_v7  ;;  %v3414_v19 = vpop.eup %3413 }
 0x722   :  { %v1235_v16 = vadd.f32 1.0, %v3414_v19  ;;  %v3416_v38 = vpop.eup %3415 }
 0x723   :  { %3419 = vrcp.f32 %v1234_v63  ;;  %v3418_v3 = vpop.eup %3417  ;;  %v5660_v63 = vld [vmem:[#allocation23_spill] sm:$0xff] }
 0x724   :  { %3421 = vrcp.f32 %v1235_v16  ;;  %v1236_v23 = vadd.f32 1.0, %v3418_v3 }
 0x726   :  { %3423 = vrcp.f32 %v1236_v23 }
 0x72d   :  { %v3420_v10 = vpop.eup %3419 }
 0x72e   :  { %v1245_v12 = vmul.f32 %v3420_v10, %v3416_v38  ;;  %v3422_v22 = vpop.eup %3421 }
 0x72f   :  { %v1244_v24 = vmul.f32 %v3422_v22, %v4586_v35  ;;  %v3229_v35 = vld [vmem:[%s5590_s4 + $0x60] ss:$16 sps:$4 sm:$0xff]  }
 0x730   :  { %v3424_v28 = vpop.eup %3423 }
 0x731   :  { %v4644_v25 = vadd.f32 %v1245_v12, %v1244_v24 }
 0x733   :  { %3425 = vtanh.f32 %v4644_v25 }
 0x73d   :  { %v3426_v29 = vpop.eup %3425 }
 0x73e   :  { %v4647_v48 = vmul.f32 %v3426_v29, %v3424_v28 }
 0x740   :  { %v1253_v9 = vpack.c.bf16 %v4647_v48, %v4647_v48 }
 0x742   :  { %1287 = vmatmul.mubr.bf16.vlgmr.msra.gmra.mrb[44].mxu0 %v1253_v9  ;;  %1328 = vmatmul.mubr.bf16.vlgmr.msra.gmra.mrb[44].mxu1 %v1253_v9 }
 0x743   :  { %1622 = vmatprep.mubr.bf16.mxu0 %v5640_v17  ;;  %1695 = vmatprep.mubr.bf16.mxu1 %v5640_v17 }
 0x744   :  { %1591 = vmatpush1.bf16.msra.mxu0 %v3211_v20  ;;  %1664 = vmatpush1.bf16.msra.mxu1 %v3214_v21 }
 0x745   :  { %1592 = vmatprep.subr.bf16.mxu0 %v3219_v2  ;;  %1665 = vmatprep.subr.bf16.mxu1 %v3222_v61 }
 0x748   :  { %1593 = vmatpush1.bf16.msra.mxu0 %v3217_v56  ;;  %1666 = vmatpush1.bf16.msra.mxu1 %v3220_v60 }
 0x749   :  { %1594 = vmatprep.subr.bf16.mxu0 %v3225_v62  ;;  %1667 = vmatprep.subr.bf16.mxu1 %v3228_v54 }
 0x74c   :  { %1595 = vmatpush1.bf16.msra.mxu0 %v3223_v30  ;;  %1668 = vmatpush1.bf16.msra.mxu1 %v3226_v32  ;;  %v5661_v30 = vld [vmem:[#allocation24_spill] sm:$0xff] }
 0x74d   :  { %1596 = vmatprep.subr.bf16.mxu0 %v3231_v33  ;;  %1669 = vmatprep.subr.bf16.mxu1 %v3234_v34  ;;  %v1365_v33 = vsel %vm35_vm1, %v4245_v27, %v4647_v48  ;;  %v4776_v34 = vld [vmem:[%s5591_s5] ss:$16 sps:$4 sm:$0xff]  }
 0x750   :  { %1597 = vmatpush1.bf16.msra.mxu0 %v3229_v35  ;;  %1670 = vmatpush1.bf16.msra.mxu1 %v3232_v36  ;;  %v1370_v35 = vsel %vm35_vm1, %v4647_v48, %v4245_v27  ;;  %v4805_v27 = vld [vmem:[%s5591_s5 + $0x20] ss:$16 sps:$4 sm:$0xff]   ;;  %v4810_v48 = vld [vmem:[%s5591_s5 + $0x28] ss:$16 sps:$4 sm:$0xff]  }
 0x751   :  { %1598 = vmatprep.subr.bf16.mxu0 %v3237_v37  ;;  %1671 = vmatprep.subr.bf16.mxu1 %v3240_v40  ;;  %v4793_v40 = vld [vmem:[%s5591_s5 + $0x24] ss:$16 sps:$4 sm:$0xff]  }
 0x754   :  { %1599 = vmatpush1.bf16.msra.mxu0 %v3235_v41  ;;  %1672 = vmatpush1.bf16.msra.mxu1 %v3238_v43  ;;  %v4798_v41 = vld [vmem:[%s5591_s5 + $0x2c] ss:$16 sps:$4 sm:$0xff]  }
 0x755   :  { %1600 = vmatprep.subr.bf16.mxu0 %v3243_v44  ;;  %1673 = vmatprep.subr.bf16.mxu1 %v3246_v45  ;;  %v4817_v44 = vld [vmem:[%s5591_s5 + $0x44] ss:$16 sps:$4 sm:$0xff]   ;;  %v4831_v45 = vld [vmem:[%s5591_s5 + $0x40] ss:$16 sps:$4 sm:$0xff]  }
 0x758   :  { %1601 = vmatpush1.bf16.msra.mxu0 %v3241_v39  ;;  %1674 = vmatpush1.bf16.msra.mxu1 %v3244_v11  ;;  %v4822_v39 = vld [vmem:[%s5591_s5 + $0x4c] ss:$16 sps:$4 sm:$0xff]   ;;  %v4843_v11 = vld [vmem:[%s5591_s5 + $0x64] ss:$16 sps:$4 sm:$0xff]  }
 0x759   :  { %1602 = vmatprep.subr.bf16.mxu0 %v3249_v1  ;;  %1675 = vmatprep.subr.bf16.mxu1 %v3252_v13  ;;  %v4836_v1 = vld [vmem:[%s5591_s5 + $0x48] ss:$16 sps:$4 sm:$0xff]   ;;  %v4848_v13 = vld [vmem:[%s5591_s5 + $0x6c] ss:$16 sps:$4 sm:$0xff]  }
 0x75c   :  { %1603 = vmatpush1.bf16.msra.mxu0 %v3247_v57  ;;  %1676 = vmatpush1.bf16.msra.mxu1 %v3250_v15  ;;  %v4857_v57 = vld [vmem:[%s5591_s5 + $0x60] ss:$16 sps:$4 sm:$0xff]   ;;  %v4874_v15 = vld [vmem:[%s5591_s5 + $0x8c] ss:$16 sps:$4 sm:$0xff]  }
 0x75d   :  { %1604 = vmatprep.subr.bf16.mxu0 %v3255_v14  ;;  %1677 = vmatprep.subr.bf16.mxu1 %v3258_v18  ;;  %v4862_v14 = vld [vmem:[%s5591_s5 + $0x68] ss:$16 sps:$4 sm:$0xff]   ;;  %v4883_v18 = vld [vmem:[%s5591_s5 + $0x80] ss:$16 sps:$4 sm:$0xff]  }
 0x760   :  { %1605 = vmatpush1.bf16.msra.mxu0 %v3253_v6  ;;  %1678 = vmatpush1.bf16.msra.mxu1 %v3256_v59  ;;  %v4888_v6 = vld [vmem:[%s5591_s5 + $0x88] ss:$16 sps:$4 sm:$0xff]   ;;  %v4895_v59 = vld [vmem:[%s5591_s5 + $0xa4] ss:$16 sps:$4 sm:$0xff]  }
 0x761   :  { %1928 = vmatprep.subr.bf16.mxu0 %v4752_v50  ;;  %1969 = vmatprep.subr.bf16.mxu1 %v4757_v26 }
 0x815   :  { %v1288_v55 = vpop.f32.mrb[44].mxu0  ;;  %v1329_v52 = vpop.f32.mrb[44].mxu1 }
 0x816   :  { %v1336_v47 = vadd.f32 %v1288_v55, %v5658_v4  ;;  %v1338_v5 = vadd.f32 %v1329_v52, %v5659_v42  ;;  %v1290_v0 = vpop.f32.mrb[45].mxu0  ;;  %v1331_v49 = vpop.f32.mrb[45].mxu1  ;;  %v4900_v55 = vld [vmem:[%s5591_s5 + $0xac] ss:$16 sps:$4 sm:$0xff]   ;;  %v4909_v52 = vld [vmem:[%s5591_s5 + $0xa0] ss:$16 sps:$4 sm:$0xff]  }
 0x817   :  { %v1337_v7 = vadd.f32 %v1290_v0, %v4190_v31  ;;  %v1339_v19 = vadd.f32 %v1331_v49, %v5660_v63  ;;  %v1292_v16 = vpop.f32.mrb[46].mxu0  ;;  %v1333_v38 = vpop.f32.mrb[46].mxu1  ;;  %v4914_v4 = vld [vmem:[%s5591_s5 + $0xa8] ss:$16 sps:$4 sm:$0xff]   ;;  %v4935_v42 = vld [vmem:[%s5591_s5 + $0xc0] ss:$16 sps:$4 sm:$0xff]  }
 0x818   :  { %v3022_v3 = vmul.f32 -1.442695, %v1336_v47  ;;  %v1293_v10 = vpop.f32.mrb[47].mxu0  ;;  %v1334_v12 = vpop.f32.mrb[47].mxu1  ;;  %v3024_v23 = vmul.f32 -1.442695, %v1338_v5 }
 0x819   :  { %v3023_v22 = vmul.f32 -1.442695, %v1337_v7  ;;  %v4926_v47 = vld [vmem:[%s5591_s5 + $0xcc] ss:$16 sps:$4 sm:$0xff]   ;;  %v4940_v5 = vld [vmem:[%s5591_s5 + $0xc8] ss:$16 sps:$4 sm:$0xff]  }
 0x81a   :  { %3427 = vpow2.f32 %v3022_v3  ;;  %v4947_v0 = vld [vmem:[%s5591_s5 + $0xe4] ss:$16 sps:$4 sm:$0xff]   ;;  %v4952_v49 = vld [vmem:[%s5591_s5 + $0xec] ss:$16 sps:$4 sm:$0xff]   ;;  %v4959_v7 = vld [vmem:[%s5591_s5 + $0xe0] ss:$16 sps:$4 sm:$0xff]  }
 0x81b   :  { %3429 = vpow2.f32 %v3023_v22  ;;  %v4964_v63 = vld [vmem:[%s5591_s5 + $0xe8] ss:$16 sps:$4 sm:$0xff]   ;;  %v5662_v3 = vld [vmem:[#allocation6_spill] sm:$0xff] }
 0x81c   :  { %3431 = vtanh.f32 %v1339_v19  ;;  %v1408_v19 = vld [vmem:[%s5592_s6] sm:$0xf]  ;;  %v5663_v10 = vsub.s32 0, %v5662_v3  ;;  %v5664_v22 = vsub.s32 2, %v5662_v3 }
 0x81d   :  { %3433 = vpow2.f32 %v3024_v23 }
 0x81e   :  { %v5019_v12 = vrot.slane %v1408_v19, %v5663_v10  ;;  %v5023_v23 = vrot.slane %v1408_v19, %v5664_v22 }
 0x824   :  { %v3428_v24 = vpop.eup %3427 }
 0x825   :  { %v1349_v28 = vadd.f32 1.0, %v3428_v24  ;;  %v3430_v29 = vpop.eup %3429 }
 0x826   :  { %v1350_v9 = vadd.f32 1.0, %v3430_v29  ;;  %v3432_v31 = vpop.eup %3431  ;;  %v5665_v29 = vsub.s32 1, %v5662_v3 }
 0x827   :  { %3435 = vrcp.f32 %v1349_v28  ;;  %v3434_v53 = vpop.eup %3433 }
 0x828   :  { %3437 = vrcp.f32 %v1350_v9  ;;  %v1351_v2 = vadd.f32 1.0, %v3434_v53  ;;  %v5031_v9 = vrot.slane %v1408_v19, %v5665_v29 }
 0x82a   :  { %3439 = vrcp.f32 %v1351_v2 }
 0x831   :  { %v3436_v20 = vpop.eup %3435 }
 0x832   :  { %v1360_v21 = vmul.f32 %v3436_v20, %v3432_v31  ;;  %v3438_v58 = vpop.eup %3437  ;;  %v5666_v31 = vsub.s32 3, %v5662_v3 }
 0x833   :  { %v1359_v61 = vmul.f32 %v3438_v58, %v4644_v25  ;;  %v4781_v25 = vld [vmem:[%s5591_s5 + $0x8] ss:$16 sps:$4 sm:$0xff]  }
 0x834   :  { %v3440_v60 = vpop.eup %3439  ;;  %v5035_v53 = vrot.slane %v1408_v19, %v5666_v31 }
 0x835   :  { %v1361_v56 = vadd.f32 %v1360_v21, %v1359_v61 }
 0x837   :  { %3441 = vtanh.f32 %v1361_v56 }
 0x841   :  { %v3442_v62 = vpop.eup %3441 }
 0x842   :  { %v1363_v54 = vmul.f32 %v3442_v62, %v3440_v60 }
 0x844   :  { %v1364_v32 = vsel %vm35_vm1, %v5661_v30, %v1363_v54  ;;  %v1371_v36 = vsel %vm35_vm1, %v1363_v54, %v5661_v30 }
 0x845   :  { %v1404_v37 = vpack.c.bf16 %v1365_v33, %v1364_v32  ;;  %v1407_v43 = vpack.c.bf16 %v1371_v36, %v1370_v35 }
 0x847   :  { %1623 = vmatmul.mubr.bf16.vlgmr.msra.gmra.mrb[48].mxu0 %v1404_v37  ;;  %1696 = vmatmul.mubr.bf16.vlgmr.msra.gmra.mrb[48].mxu1 %v1404_v37 }
 0x848   :  { %1929 = vmatpush1.bf16.msra.mxu0 %v4776_v34  ;;  %1970 = vmatpush1.bf16.msra.mxu1 %v4781_v25 }
 0x849   :  { %1930 = vmatprep.subr.bf16.mxu0 %v4793_v40  ;;  %1971 = vmatprep.subr.bf16.mxu1 %v4798_v41 }
 0x84a   :  { %1632 = vmatprep.mubr.bf16.mxu0 %v5640_v17  ;;  %1705 = vmatprep.mubr.bf16.mxu1 %v5640_v17 }
 0x84c   :  { %1931 = vmatpush1.bf16.msra.mxu0 %v4805_v27  ;;  %1972 = vmatpush1.bf16.msra.mxu1 %v4810_v48 }
 0x84d   :  { %1932 = vmatprep.subr.bf16.mxu0 %v4817_v44  ;;  %1973 = vmatprep.subr.bf16.mxu1 %v4822_v39 }
 0x84f   :  { %1633 = vmatmul.mubr.bf16.gmra.mrb[52].mxu0 %v4603_v46  ;;  %1706 = vmatmul.mubr.bf16.gmra.mrb[52].mxu1 %v4603_v46  ;;  %v4869_v46 = vld [vmem:[%s5591_s5 + $0x84] ss:$16 sps:$4 sm:$0xff]  }
 0x850   :  { %1933 = vmatpush1.bf16.msra.mxu0 %v4831_v45  ;;  %1974 = vmatpush1.bf16.msra.mxu1 %v4836_v1 }
 0x851   :  { %1934 = vmatprep.subr.bf16.mxu0 %v4843_v11  ;;  %1975 = vmatprep.subr.bf16.mxu1 %v4848_v13 }
 0x852   :  { %1642 = vmatprep.mubr.bf16.mxu0 %v5640_v17  ;;  %1715 = vmatprep.mubr.bf16.mxu1 %v5640_v17 }
 0x854   :  { %1935 = vmatpush1.bf16.msra.mxu0 %v4857_v57  ;;  %1976 = vmatpush1.bf16.msra.mxu1 %v4862_v14 }
 0x855   :  { %1936 = vmatprep.subr.bf16.mxu0 %v4869_v46  ;;  %1977 = vmatprep.subr.bf16.mxu1 %v4874_v15 }
 0x857   :  { %1643 = vmatmul.mubr.bf16.gmra.mrb[56].mxu0 %v4605_v8  ;;  %1716 = vmatmul.mubr.bf16.gmra.mrb[56].mxu1 %v4605_v8  ;;  %v4921_v8 = vld [vmem:[%s5591_s5 + $0xc4] ss:$16 sps:$4 sm:$0xff]  }
 0x858   :  { %1937 = vmatpush1.bf16.msra.mxu0 %v4883_v18  ;;  %1978 = vmatpush1.bf16.msra.mxu1 %v4888_v6 }
 0x859   :  { %1938 = vmatprep.subr.bf16.mxu0 %v4895_v59  ;;  %1979 = vmatprep.subr.bf16.mxu1 %v4900_v55 }
 0x85a   :  { %1652 = vmatprep.mubr.bf16.mxu0 %v5640_v17  ;;  %1725 = vmatprep.mubr.bf16.mxu1 %v5640_v17 }
 0x85c   :  { %1939 = vmatpush1.bf16.msra.mxu0 %v4909_v52  ;;  %1980 = vmatpush1.bf16.msra.mxu1 %v4914_v4 }
 0x85d   :  { %1940 = vmatprep.subr.bf16.mxu0 %v4921_v8  ;;  %1981 = vmatprep.subr.bf16.mxu1 %v4926_v47 }
 0x85f   :  { %1653 = vmatmul.mubr.bf16.gmra.mrb[60].mxu0 %v1407_v43  ;;  %1726 = vmatmul.mubr.bf16.gmra.mrb[60].mxu1 %v1407_v43 }
 0x860   :  { %1941 = vmatpush1.bf16.msra.mxu0 %v4935_v42  ;;  %1982 = vmatpush1.bf16.msra.mxu1 %v4940_v5 }
 0x861   :  { %1942 = vmatprep.subr.bf16.mxu0 %v4947_v0  ;;  %1983 = vmatprep.subr.bf16.mxu1 %v4952_v49 }
 0x862   :  { %1960 = vmatprep.mubr.bf16.mxu0 %v5640_v17  ;;  %2001 = vmatprep.mubr.bf16.mxu1 %v5640_v17 }
 0x864   :  { %1943 = vmatpush1.bf16.msra.mxu0 %v4959_v7  ;;  %1984 = vmatpush1.bf16.msra.mxu1 %v4964_v63 }
 0x865   :  { %2039 = vmatprep.subr.bf16.mxu0 %v4752_v50  ;;  %2080 = vmatprep.subr.bf16.mxu1 %v4757_v26 }
 0x867   :  { %1961 = vmatmul.mubr.bf16.vlgmr.msra.gmra.mrb[64].mxu0 %v5640_v17  ;;  %2002 = vmatmul.mubr.bf16.vlgmr.msra.gmra.mrb[64].mxu1 %v5640_v17 }
 0x868   :  { %2040 = vmatpush1.bf16.msra.mxu0 %v4776_v34  ;;  %2081 = vmatpush1.bf16.msra.mxu1 %v4781_v25 }
 0x869   :  { %2041 = vmatprep.subr.bf16.mxu0 %v4793_v40  ;;  %2082 = vmatprep.subr.bf16.mxu1 %v4798_v41 }
 0x86a   :  { %2071 = vmatprep.mubr.bf16.mxu0 %v5640_v17  ;;  %2112 = vmatprep.mubr.bf16.mxu1 %v5640_v17 }
 0x86c   :  { %2042 = vmatpush1.bf16.msra.mxu0 %v4805_v27  ;;  %2083 = vmatpush1.bf16.msra.mxu1 %v4810_v48 }
 0x86d   :  { %2043 = vmatprep.subr.bf16.mxu0 %v4817_v44  ;;  %2084 = vmatprep.subr.bf16.mxu1 %v4822_v39 }
 0x870   :  { %2044 = vmatpush1.bf16.msra.mxu0 %v4831_v45  ;;  %2085 = vmatpush1.bf16.msra.mxu1 %v4836_v1 }
 0x871   :  { %2045 = vmatprep.subr.bf16.mxu0 %v4843_v11  ;;  %2086 = vmatprep.subr.bf16.mxu1 %v4848_v13 }
 0x874   :  { %2046 = vmatpush1.bf16.msra.mxu0 %v4857_v57  ;;  %2087 = vmatpush1.bf16.msra.mxu1 %v4862_v14 }
 0x875   :  { %2047 = vmatprep.subr.bf16.mxu0 %v4869_v46  ;;  %2088 = vmatprep.subr.bf16.mxu1 %v4874_v15 }
 0x878   :  { %2048 = vmatpush1.bf16.msra.mxu0 %v4883_v18  ;;  %2089 = vmatpush1.bf16.msra.mxu1 %v4888_v6 }
 0x879   :  { %2049 = vmatprep.subr.bf16.mxu0 %v4895_v59  ;;  %2090 = vmatprep.subr.bf16.mxu1 %v4900_v55 }
 0x87c   :  { %2050 = vmatpush1.bf16.msra.mxu0 %v4909_v52  ;;  %2091 = vmatpush1.bf16.msra.mxu1 %v4914_v4 }
 0x87d   :  { %2051 = vmatprep.subr.bf16.mxu0 %v4921_v8  ;;  %2092 = vmatprep.subr.bf16.mxu1 %v4926_v47 }
 0x880   :  { %2052 = vmatpush1.bf16.msra.mxu0 %v4935_v42  ;;  %2093 = vmatpush1.bf16.msra.mxu1 %v4940_v5 }
 0x881   :  { %2053 = vmatprep.subr.bf16.mxu0 %v4947_v0  ;;  %2094 = vmatprep.subr.bf16.mxu1 %v4952_v49 }
 0x884   :  { %2054 = vmatpush1.bf16.msra.mxu0 %v4959_v7  ;;  %2095 = vmatpush1.bf16.msra.mxu1 %v4964_v63 }
 0x885   :  { %2150 = vmatprep.subr.bf16.mxu0 %v4752_v50  ;;  %2191 = vmatprep.subr.bf16.mxu1 %v4757_v26 }
 0x91a   :  { %v5013_v16 = vpop.f32.mrb[48].mxu0  ;;  %v5015_v38 = vpop.f32.mrb[48].mxu1 }
 0x91b   :  { %v5025_v24 = vpop.f32.mrb[49].mxu0  ;;  %v5027_v28 = vpop.f32.mrb[49].mxu1 }
 0x91c   :  { %v1628_v20 = vpop.f32.mrb[50].mxu0  ;;  %v1701_v21 = vpop.f32.mrb[50].mxu1 }
 0x91d   :  { %v5038_v58 = vadd.f32 %v1628_v20, %v5019_v12  ;;  %v5041_v2 = vadd.f32 %v1701_v21, %v5023_v23  ;;  %v1630_v61 = vpop.f32.mrb[51].mxu0  ;;  %v1703_v56 = vpop.f32.mrb[51].mxu1 }
 0x91e   :  { %v5044_v60 = vadd.f32 %v1630_v61, %v5031_v9  ;;  %v5047_v62 = vadd.f32 %v1703_v56, %v5035_v53 }
 0x922   :  { %v1634_v54 = vpop.f32.mrb[52].mxu0  ;;  %v1707_v30 = vpop.f32.mrb[52].mxu1 }
 0x923   :  { %v5050_v32 = vadd.f32 %v1634_v54, %v5019_v12  ;;  %v5053_v33 = vadd.f32 %v1707_v30, %v5023_v23  ;;  %v1636_v35 = vpop.f32.mrb[53].mxu0  ;;  %v1709_v36 = vpop.f32.mrb[53].mxu1 }
 0x924   :  { %v5056_v37 = vadd.f32 %v1636_v35, %v5031_v9  ;;  %v5059_v43 = vadd.f32 %v1709_v36, %v5035_v53  ;;  %v1638_v19 = vpop.f32.mrb[54].mxu0  ;;  %v1711_v3 = vpop.f32.mrb[54].mxu1 }
 0x925   :  { %v5062_v10 = vadd.f32 %v1638_v19, %v5019_v12  ;;  %v5065_v22 = vadd.f32 %v1711_v3, %v5023_v23  ;;  %v1640_v29 = vpop.f32.mrb[55].mxu0  ;;  %v1713_v31 = vpop.f32.mrb[55].mxu1 }
 0x926   :  { %5667 = vst [vmem:[#allocation4_spill] sm:$0xff] %v5056_v37  ;;  %5668 = vst [vmem:[#allocation5_spill] sm:$0xff] %v5059_v43  ;;  %v5068_v20 = vadd.f32 %v1640_v29, %v5031_v9  ;;  %v5071_v21 = vadd.f32 %v1713_v31, %v5035_v53 }
 0x927   :  { %5669 = vst [vmem:[#allocation2_spill] sm:$0xff] %v5062_v10  ;;  %5670 = vst [vmem:[#allocation3_spill] sm:$0xff] %v5065_v22 }
 0x928   :  { %5671 = vst [vmem:[#allocation8_spill] sm:$0xff] %v5068_v20  ;;  %5672 = vst [vmem:[#allocation9_spill] sm:$0xff] %v5071_v21 }
 0x92a   :  { %v1644_v61 = vpop.f32.mrb[56].mxu0  ;;  %v1717_v56 = vpop.f32.mrb[56].mxu1 }
 0x92b   :  { %v5074_v54 = vadd.f32 %v1644_v61, %v5019_v12  ;;  %v5077_v30 = vadd.f32 %v1717_v56, %v5023_v23  ;;  %v1646_v35 = vpop.f32.mrb[57].mxu0  ;;  %v1719_v36 = vpop.f32.mrb[57].mxu1 }
 0x92c   :  { %v5080_v19 = vadd.f32 %v1646_v35, %v5031_v9  ;;  %v5083_v3 = vadd.f32 %v1719_v36, %v5035_v53  ;;  %v1648_v29 = vpop.f32.mrb[58].mxu0  ;;  %v1721_v51 = vpop.f32.mrb[58].mxu1 }
 0x92d   :  { %5673 = vst [vmem:[#allocation10_spill] sm:$0xff] %v5074_v54  ;;  %5674 = vst [vmem:[#allocation11_spill] sm:$0xff] %v5077_v30  ;;  %v5086_v31 = vadd.f32 %v1648_v29, %v5019_v12  ;;  %v5089_v21 = vadd.f32 %v1721_v51, %v5023_v23  ;;  %v1650_v61 = vpop.f32.mrb[59].mxu0  ;;  %v1723_v54 = vpop.f32.mrb[59].mxu1 }
 0x92e   :  { %5675 = vst [vmem:[#allocation12_spill] sm:$0xff] %v5080_v19  ;;  %5676 = vst [vmem:[#allocation13_spill] sm:$0xff] %v5083_v3  ;;  %v5092_v56 = vadd.f32 %v1650_v61, %v5031_v9  ;;  %v5095_v30 = vadd.f32 %v1723_v54, %v5035_v53 }
 0x92f   :  { %5677 = vst [vmem:[#allocation14_spill] sm:$0xff] %v5086_v31  ;;  %5678 = vst [vmem:[#allocation15_spill] sm:$0xff] %v5089_v21 }
 0x930   :  { %5679 = vst [vmem:[#allocation16_spill] sm:$0xff] %v5092_v56  ;;  %5680 = vst [vmem:[#allocation17_spill] sm:$0xff] %v5095_v30 }
 0x932   :  { %v1654_v35 = vpop.f32.mrb[60].mxu0  ;;  %v1727_v19 = vpop.f32.mrb[60].mxu1 }
 0x933   :  { %v5098_v36 = vadd.f32 %v1654_v35, %v5019_v12  ;;  %v5101_v3 = vadd.f32 %v1727_v19, %v5023_v23  ;;  %v1656_v29 = vpop.f32.mrb[61].mxu0  ;;  %v1729_v31 = vpop.f32.mrb[61].mxu1 }
 0x934   :  { %v5104_v51 = vadd.f32 %v1656_v29, %v5031_v9  ;;  %v5107_v21 = vadd.f32 %v1729_v31, %v5035_v53  ;;  %v1658_v61 = vpop.f32.mrb[62].mxu0  ;;  %v1731_v56 = vpop.f32.mrb[62].mxu1 }
 0x935   :  { %5681 = vst [vmem:[#allocation18_spill] sm:$0xff] %v5098_v36  ;;  %5682 = vst [vmem:[#allocation19_spill] sm:$0xff] %v5101_v3  ;;  %v5110_v54 = vadd.f32 %v1658_v61, %v5019_v12  ;;  %v5113_v30 = vadd.f32 %v1731_v56, %v5023_v23  ;;  %v1660_v35 = vpop.f32.mrb[63].mxu0  ;;  %v1733_v36 = vpop.f32.mrb[63].mxu1  ;;  %v1698_v61 = vadd.f32 %v5015_v38, %v5023_v23 }
 0x936   :  { %5683 = vst [vmem:[#allocation20_spill] sm:$0xff] %v5104_v51  ;;  %5684 = vst [vmem:[#allocation21_spill] sm:$0xff] %v5107_v21  ;;  %v5116_v19 = vadd.f32 %v1660_v35, %v5031_v9  ;;  %v5119_v3 = vadd.f32 %v1733_v36, %v5035_v53  ;;  %v1625_v21 = vadd.f32 %v5013_v16, %v5019_v12 }
 0x937   :  { %5685 = vst [vmem:[#allocation22_spill] sm:$0xff] %v5110_v54  ;;  %v3113_v29 = vmul.f32 -1.442695, %v5110_v54  ;;  %v1627_v56 = vadd.f32 %v5025_v24, %v5031_v9  ;;  %v1700_v35 = vadd.f32 %v5027_v28, %v5035_v53  ;;  %v3115_v24 = vmul.f32 -1.442695, %v5113_v30 }
 0x938   :  { %5686 = vst [vmem:[#allocation23_spill] sm:$0xff] %v5116_v19  ;;  %v3114_v31 = vmul.f32 -1.442695, %v5116_v19 }
 0x939   :  { %3443 = vpow2.f32 %v3113_v29 }
 0x93a   :  { %v1962_v51 = vpop.f32.mrb[64].mxu0  ;;  %v2003_v36 = vpop.f32.mrb[64].mxu1  ;;  %3445 = vpow2.f32 %v3114_v31 }
 0x93b   :  { %v2010_v20 = vadd.f32 %v1962_v51, %v1625_v21  ;;  %v2012_v54 = vadd.f32 %v2003_v36, %v1698_v61  ;;  %v1964_v22 = vpop.f32.mrb[65].mxu0  ;;  %v2005_v19 = vpop.f32.mrb[65].mxu1 }
 0x93c   :  { %v2011_v10 = vadd.f32 %v1964_v22, %v1627_v56  ;;  %v2013_v43 = vadd.f32 %v2005_v19, %v1700_v35  ;;  %v1966_v16 = vpop.f32.mrb[66].mxu0  ;;  %v2007_v12 = vpop.f32.mrb[66].mxu1 }
 0x93d   :  { %v3089_v37 = vmul.f32 -1.442695, %v2010_v20  ;;  %v1967_v38 = vpop.f32.mrb[67].mxu0  ;;  %v2008_v23 = vpop.f32.mrb[67].mxu1  ;;  %v3091_v22 = vmul.f32 -1.442695, %v2012_v54 }
 0x93e   :  { %v3090_v29 = vmul.f32 -1.442695, %v2011_v10 }
 0x93f   :  { %3447 = vpow2.f32 %v3089_v37 }
 0x940   :  { %3449 = vpow2.f32 %v3090_v29 }
 0x941   :  { %3451 = vtanh.f32 %v5119_v3 }
 0x942   :  { %3453 = vpow2.f32 %v3115_v24 }
 0x943   :  { %v3444_v28 = vpop.eup %3443 }
 0x944   :  { %v2824_v9 = vadd.f32 1.0, %v3444_v28  ;;  %v3446_v53 = vpop.eup %3445 }
 0x945   :  { %v2825_v21 = vadd.f32 1.0, %v3446_v53 }
 0x946   :  { %3455 = vrcp.f32 %v2824_v9 }
 0x947   :  { %3457 = vrcp.f32 %v2825_v21 }
 0x948   :  { %3459 = vtanh.f32 %v2013_v43 }
 0x949   :  { %v3448_v51 = vpop.eup %3447  ;;  %3461 = vpow2.f32 %v3091_v22 }
 0x94a   :  { %v2023_v19 = vadd.f32 1.0, %v3448_v51  ;;  %v3450_v20 = vpop.eup %3449 }
 0x94b   :  { %v2024_v37 = vadd.f32 1.0, %v3450_v20  ;;  %v3452_v10 = vpop.eup %3451 }
 0x94c   :  { %3463 = vrcp.f32 %v2023_v19  ;;  %v3454_v31 = vpop.eup %3453 }
 0x94d   :  { %3465 = vrcp.f32 %v2024_v37  ;;  %v2826_v36 = vadd.f32 1.0, %v3454_v31 }
 0x94f   :  { %3467 = vrcp.f32 %v2826_v36 }
 0x950   :  { %v3456_v61 = vpop.eup %3455 }
 0x951   :  { %v2835_v56 = vmul.f32 %v3456_v61, %v3452_v10  ;;  %v3458_v35 = vpop.eup %3457 }
 0x952   :  { %v2834_v16 = vmul.f32 0.0, %v3458_v35  ;;  %v3460_v12 = vpop.eup %3459 }
 0x953   :  { %v3462_v38 = vpop.eup %3461 }
 0x954   :  { %v2836_v23 = vadd.f32 %v2835_v56, %v2834_v16  ;;  %v2025_v24 = vadd.f32 1.0, %v3462_v38 }
 0x956   :  { %v3464_v54 = vpop.eup %3463  ;;  %3469 = vtanh.f32 %v2836_v23 }
 0x957   :  { %v2034_v29 = vmul.f32 %v3464_v54, %v3460_v12  ;;  %v3466_v43 = vpop.eup %3465  ;;  %3471 = vrcp.f32 %v2025_v24 }
 0x958   :  { %v2033_v28 = vmul.f32 0.0, %v3466_v43 }
 0x959   :  { %v3468_v53 = vpop.eup %3467 }
 0x95a   :  { %v5133_v9 = vadd.f32 %v2034_v29, %v2033_v28 }
 0x95c   :  { %3473 = vtanh.f32 %v5133_v9 }
 0x960   :  { %v3470_v21 = vpop.eup %3469 }
 0x961   :  { %v5136_v22 = vmul.f32 %v3470_v21, %v3468_v53  ;;  %v3472_v51 = vpop.eup %3471 }
 0x966   :  { %v3474_v19 = vpop.eup %3473 }
 0x967   :  { %v2037_v20 = vmul.f32 %v3474_v19, %v3472_v51 }
 0x969   :  { %v2038_v37 = vpack.c.bf16 %v2037_v20, %v2037_v20 }
 0x96b   :  { %2072 = vmatmul.mubr.bf16.vlgmr.msra.gmra.mrb[68].mxu0 %v2038_v37  ;;  %2113 = vmatmul.mubr.bf16.vlgmr.msra.gmra.mrb[68].mxu1 %v2038_v37 }
 0x96c   :  { %2151 = vmatpush1.bf16.msra.mxu0 %v4776_v34  ;;  %2192 = vmatpush1.bf16.msra.mxu1 %v4781_v25 }
 0x96d   :  { %2152 = vmatprep.subr.bf16.mxu0 %v4793_v40  ;;  %2193 = vmatprep.subr.bf16.mxu1 %v4798_v41 }
 0x96e   :  { %2182 = vmatprep.mubr.bf16.mxu0 %v5640_v17  ;;  %2223 = vmatprep.mubr.bf16.mxu1 %v5640_v17 }
 0x970   :  { %2153 = vmatpush1.bf16.msra.mxu0 %v4805_v27  ;;  %2194 = vmatpush1.bf16.msra.mxu1 %v4810_v48 }
 0x971   :  { %2154 = vmatprep.subr.bf16.mxu0 %v4817_v44  ;;  %2195 = vmatprep.subr.bf16.mxu1 %v4822_v39 }
 0x974   :  { %2155 = vmatpush1.bf16.msra.mxu0 %v4831_v45  ;;  %2196 = vmatpush1.bf16.msra.mxu1 %v4836_v1 }
 0x975   :  { %2156 = vmatprep.subr.bf16.mxu0 %v4843_v11  ;;  %2197 = vmatprep.subr.bf16.mxu1 %v4848_v13 }
 0x978   :  { %2157 = vmatpush1.bf16.msra.mxu0 %v4857_v57  ;;  %2198 = vmatpush1.bf16.msra.mxu1 %v4862_v14 }
 0x979   :  { %2158 = vmatprep.subr.bf16.mxu0 %v4869_v46  ;;  %2199 = vmatprep.subr.bf16.mxu1 %v4874_v15 }
 0x97c   :  { %2159 = vmatpush1.bf16.msra.mxu0 %v4883_v18  ;;  %2200 = vmatpush1.bf16.msra.mxu1 %v4888_v6 }
 0x97d   :  { %2160 = vmatprep.subr.bf16.mxu0 %v4895_v59  ;;  %2201 = vmatprep.subr.bf16.mxu1 %v4900_v55 }
 0x980   :  { %2161 = vmatpush1.bf16.msra.mxu0 %v4909_v52  ;;  %2202 = vmatpush1.bf16.msra.mxu1 %v4914_v4 }
 0x981   :  { %2162 = vmatprep.subr.bf16.mxu0 %v4921_v8  ;;  %2203 = vmatprep.subr.bf16.mxu1 %v4926_v47 }
 0x984   :  { %2163 = vmatpush1.bf16.msra.mxu0 %v4935_v42  ;;  %2204 = vmatpush1.bf16.msra.mxu1 %v4940_v5 }
 0x985   :  { %2164 = vmatprep.subr.bf16.mxu0 %v4947_v0  ;;  %2205 = vmatprep.subr.bf16.mxu1 %v4952_v49 }
 0x988   :  { %2165 = vmatpush1.bf16.msra.mxu0 %v4959_v7  ;;  %2206 = vmatpush1.bf16.msra.mxu1 %v4964_v63 }
 0x989   :  { %2261 = vmatprep.subr.bf16.mxu0 %v4752_v50  ;;  %2302 = vmatprep.subr.bf16.mxu1 %v4757_v26 }
 0xa3e   :  { %v2073_v10 = vpop.f32.mrb[68].mxu0  ;;  %v2114_v31 = vpop.f32.mrb[68].mxu1 }
 0xa3f   :  { %v2121_v61 = vadd.f32 %v2073_v10, %v5038_v58  ;;  %v2123_v56 = vadd.f32 %v2114_v31, %v5041_v2  ;;  %v2075_v35 = vpop.f32.mrb[69].mxu0  ;;  %v2116_v36 = vpop.f32.mrb[69].mxu1 }
 0xa40   :  { %v2122_v16 = vadd.f32 %v2075_v35, %v5044_v60  ;;  %v2124_v12 = vadd.f32 %v2116_v36, %v5047_v62  ;;  %v2077_v38 = vpop.f32.mrb[70].mxu0  ;;  %v2118_v23 = vpop.f32.mrb[70].mxu1 }
 0xa41   :  { %v3092_v54 = vmul.f32 -1.442695, %v2121_v61  ;;  %v2078_v29 = vpop.f32.mrb[71].mxu0  ;;  %v2119_v43 = vpop.f32.mrb[71].mxu1  ;;  %v3094_v28 = vmul.f32 -1.442695, %v2123_v56 }
 0xa42   :  { %v3093_v24 = vmul.f32 -1.442695, %v2122_v16  ;;  %v5687_v29 = vld [vmem:[#allocation4_spill] sm:$0xff] }
 0xa43   :  { %3475 = vpow2.f32 %v3092_v54 }
 0xa44   :  { %3477 = vpow2.f32 %v3093_v24  ;;  %v5688_v24 = vld [vmem:[#allocation5_spill] sm:$0xff] }
 0xa45   :  { %3479 = vtanh.f32 %v2124_v12 }
 0xa46   :  { %3481 = vpow2.f32 %v3094_v28 }
 0xa4d   :  { %v3476_v53 = vpop.eup %3475 }
 0xa4e   :  { %v2134_v21 = vadd.f32 1.0, %v3476_v53  ;;  %v3478_v58 = vpop.eup %3477 }
 0xa4f   :  { %v2135_v2 = vadd.f32 1.0, %v3478_v58  ;;  %v3480_v60 = vpop.eup %3479 }
 0xa50   :  { %3483 = vrcp.f32 %v2134_v21  ;;  %v3482_v51 = vpop.eup %3481 }
 0xa51   :  { %3485 = vrcp.f32 %v2135_v2  ;;  %v2136_v37 = vadd.f32 1.0, %v3482_v51 }
 0xa53   :  { %3487 = vrcp.f32 %v2136_v37 }
 0xa5a   :  { %v3484_v62 = vpop.eup %3483 }
 0xa5b   :  { %v2145_v19 = vmul.f32 %v3484_v62, %v3480_v60  ;;  %v3486_v20 = vpop.eup %3485 }
 0xa5c   :  { %v2144_v10 = vmul.f32 %v3486_v20, %v5133_v9 }
 0xa5d   :  { %v3488_v61 = vpop.eup %3487 }
 0xa5e   :  { %v5177_v31 = vadd.f32 %v2145_v19, %v2144_v10 }
 0xa60   :  { %3489 = vtanh.f32 %v5177_v31 }
 0xa6a   :  { %v3490_v56 = vpop.eup %3489 }
 0xa6b   :  { %v2148_v35 = vmul.f32 %v3490_v56, %v3488_v61 }
 0xa6d   :  { %v2149_v36 = vpack.c.bf16 %v2148_v35, %v2148_v35 }
 0xa6f   :  { %2183 = vmatmul.mubr.bf16.vlgmr.msra.gmra.mrb[72].mxu0 %v2149_v36  ;;  %2224 = vmatmul.mubr.bf16.vlgmr.msra.gmra.mrb[72].mxu1 %v2149_v36 }
 0xa70   :  { %2262 = vmatpush1.bf16.msra.mxu0 %v4776_v34  ;;  %2303 = vmatpush1.bf16.msra.mxu1 %v4781_v25 }
 0xa71   :  { %2263 = vmatprep.subr.bf16.mxu0 %v4793_v40  ;;  %2304 = vmatprep.subr.bf16.mxu1 %v4798_v41 }
 0xa72   :  { %2293 = vmatprep.mubr.bf16.mxu0 %v5640_v17  ;;  %2334 = vmatprep.mubr.bf16.mxu1 %v5640_v17 }
 0xa74   :  { %2264 = vmatpush1.bf16.msra.mxu0 %v4805_v27  ;;  %2305 = vmatpush1.bf16.msra.mxu1 %v4810_v48 }
 0xa75   :  { %2265 = vmatprep.subr.bf16.mxu0 %v4817_v44  ;;  %2306 = vmatprep.subr.bf16.mxu1 %v4822_v39 }
 0xa78   :  { %2266 = vmatpush1.bf16.msra.mxu0 %v4831_v45  ;;  %2307 = vmatpush1.bf16.msra.mxu1 %v4836_v1 }
 0xa79   :  { %2267 = vmatprep.subr.bf16.mxu0 %v4843_v11  ;;  %2308 = vmatprep.subr.bf16.mxu1 %v4848_v13 }
 0xa7c   :  { %2268 = vmatpush1.bf16.msra.mxu0 %v4857_v57  ;;  %2309 = vmatpush1.bf16.msra.mxu1 %v4862_v14 }
 0xa7d   :  { %2269 = vmatprep.subr.bf16.mxu0 %v4869_v46  ;;  %2310 = vmatprep.subr.bf16.mxu1 %v4874_v15 }
 0xa80   :  { %2270 = vmatpush1.bf16.msra.mxu0 %v4883_v18  ;;  %2311 = vmatpush1.bf16.msra.mxu1 %v4888_v6 }
 0xa81   :  { %2271 = vmatprep.subr.bf16.mxu0 %v4895_v59  ;;  %2312 = vmatprep.subr.bf16.mxu1 %v4900_v55 }
 0xa84   :  { %2272 = vmatpush1.bf16.msra.mxu0 %v4909_v52  ;;  %2313 = vmatpush1.bf16.msra.mxu1 %v4914_v4 }
 0xa85   :  { %2273 = vmatprep.subr.bf16.mxu0 %v4921_v8  ;;  %2314 = vmatprep.subr.bf16.mxu1 %v4926_v47 }
 0xa88   :  { %2274 = vmatpush1.bf16.msra.mxu0 %v4935_v42  ;;  %2315 = vmatpush1.bf16.msra.mxu1 %v4940_v5 }
 0xa89   :  { %2275 = vmatprep.subr.bf16.mxu0 %v4947_v0  ;;  %2316 = vmatprep.subr.bf16.mxu1 %v4952_v49 }
 0xa8c   :  { %2276 = vmatpush1.bf16.msra.mxu0 %v4959_v7  ;;  %2317 = vmatpush1.bf16.msra.mxu1 %v4964_v63 }
 0xa8d   :  { %2372 = vmatprep.subr.bf16.mxu0 %v4752_v50  ;;  %2413 = vmatprep.subr.bf16.mxu1 %v4757_v26 }
 0xb42   :  { %v2184_v9 = vpop.f32.mrb[72].mxu0  ;;  %v2225_v16 = vpop.f32.mrb[72].mxu1 }
 0xb43   :  { %v2232_v12 = vadd.f32 %v2184_v9, %v5050_v32  ;;  %v2234_v38 = vadd.f32 %v2225_v16, %v5053_v33  ;;  %v2186_v23 = vpop.f32.mrb[73].mxu0  ;;  %v2227_v54 = vpop.f32.mrb[73].mxu1 }
 0xb44   :  { %v2233_v43 = vadd.f32 %v2186_v23, %v5687_v29  ;;  %v2235_v28 = vadd.f32 %v2227_v54, %v5688_v24  ;;  %v2188_v53 = vpop.f32.mrb[74].mxu0  ;;  %v2229_v21 = vpop.f32.mrb[74].mxu1 }
 0xb45   :  { %v3095_v58 = vmul.f32 -1.442695, %v2232_v12  ;;  %v2189_v2 = vpop.f32.mrb[75].mxu0  ;;  %v2230_v60 = vpop.f32.mrb[75].mxu1  ;;  %v3097_v51 = vmul.f32 -1.442695, %v2234_v38 }
 0xb46   :  { %v3096_v50 = vmul.f32 -1.442695, %v2233_v43  ;;  %v5689_v43 = vld [vmem:[#allocation2_spill] sm:$0xff]  ;;  %v5691_v2 = vld [vmem:[#allocation8_spill] sm:$0xff] }
 0xb47   :  { %3491 = vpow2.f32 %v3095_v58 }
 0xb48   :  { %3493 = vpow2.f32 %v3096_v50  ;;  %v5692_v50 = vld [vmem:[#allocation9_spill] sm:$0xff] }
 0xb49   :  { %3495 = vtanh.f32 %v2235_v28  ;;  %v5690_v28 = vld [vmem:[#allocation3_spill] sm:$0xff] }
 0xb4a   :  { %3497 = vpow2.f32 %v3097_v51 }
 0xb51   :  { %v3492_v62 = vpop.eup %3491 }
 0xb52   :  { %v2245_v19 = vadd.f32 1.0, %v3492_v62  ;;  %v3494_v32 = vpop.eup %3493 }
 0xb53   :  { %v2246_v33 = vadd.f32 1.0, %v3494_v32  ;;  %v3496_v20 = vpop.eup %3495 }
 0xb54   :  { %3499 = vrcp.f32 %v2245_v19  ;;  %v3498_v37 = vpop.eup %3497 }
 0xb55   :  { %3501 = vrcp.f32 %v2246_v33  ;;  %v2247_v35 = vadd.f32 1.0, %v3498_v37 }
 0xb57   :  { %3503 = vrcp.f32 %v2247_v35 }
 0xb5e   :  { %v3500_v10 = vpop.eup %3499 }
 0xb5f   :  { %v2256_v61 = vmul.f32 %v3500_v10, %v3496_v20  ;;  %v3502_v56 = vpop.eup %3501 }
 0xb60   :  { %v2255_v36 = vmul.f32 %v3502_v56, %v5177_v31  ;;  %v5257_v31 = vld [vmem:[%s5591_s5 + $0x4] ss:$16 sps:$4 sm:$0xff]  }
 0xb61   :  { %v3504_v16 = vpop.eup %3503 }
 0xb62   :  { %v5219_v9 = vadd.f32 %v2256_v61, %v2255_v36 }
 0xb64   :  { %3505 = vtanh.f32 %v5219_v9 }
 0xb6e   :  { %v3506_v12 = vpop.eup %3505 }
 0xb6f   :  { %v2259_v38 = vmul.f32 %v3506_v12, %v3504_v16 }
 0xb71   :  { %v2260_v23 = vpack.c.bf16 %v2259_v38, %v2259_v38 }
 0xb73   :  { %2294 = vmatmul.mubr.bf16.vlgmr.msra.gmra.mrb[76].mxu0 %v2260_v23  ;;  %2335 = vmatmul.mubr.bf16.vlgmr.msra.gmra.mrb[76].mxu1 %v2260_v23 }
 0xb74   :  { %2373 = vmatpush1.bf16.msra.mxu0 %v4776_v34  ;;  %2414 = vmatpush1.bf16.msra.mxu1 %v4781_v25 }
 0xb75   :  { %2374 = vmatprep.subr.bf16.mxu0 %v4793_v40  ;;  %2415 = vmatprep.subr.bf16.mxu1 %v4798_v41 }
 0xb76   :  { %2404 = vmatprep.mubr.bf16.mxu0 %v5640_v17  ;;  %2445 = vmatprep.mubr.bf16.mxu1 %v5640_v17 }
 0xb78   :  { %2375 = vmatpush1.bf16.msra.mxu0 %v4805_v27  ;;  %2416 = vmatpush1.bf16.msra.mxu1 %v4810_v48 }
 0xb79   :  { %2376 = vmatprep.subr.bf16.mxu0 %v4817_v44  ;;  %2417 = vmatprep.subr.bf16.mxu1 %v4822_v39 }
 0xb7c   :  { %2377 = vmatpush1.bf16.msra.mxu0 %v4831_v45  ;;  %2418 = vmatpush1.bf16.msra.mxu1 %v4836_v1 }
 0xb7d   :  { %2378 = vmatprep.subr.bf16.mxu0 %v4843_v11  ;;  %2419 = vmatprep.subr.bf16.mxu1 %v4848_v13 }
 0xb80   :  { %2379 = vmatpush1.bf16.msra.mxu0 %v4857_v57  ;;  %2420 = vmatpush1.bf16.msra.mxu1 %v4862_v14 }
 0xb81   :  { %2380 = vmatprep.subr.bf16.mxu0 %v4869_v46  ;;  %2421 = vmatprep.subr.bf16.mxu1 %v4874_v15 }
 0xb84   :  { %2381 = vmatpush1.bf16.msra.mxu0 %v4883_v18  ;;  %2422 = vmatpush1.bf16.msra.mxu1 %v4888_v6 }
 0xb85   :  { %2382 = vmatprep.subr.bf16.mxu0 %v4895_v59  ;;  %2423 = vmatprep.subr.bf16.mxu1 %v4900_v55 }
 0xb88   :  { %2383 = vmatpush1.bf16.msra.mxu0 %v4909_v52  ;;  %2424 = vmatpush1.bf16.msra.mxu1 %v4914_v4 }
 0xb89   :  { %2384 = vmatprep.subr.bf16.mxu0 %v4921_v8  ;;  %2425 = vmatprep.subr.bf16.mxu1 %v4926_v47 }
 0xb8c   :  { %2385 = vmatpush1.bf16.msra.mxu0 %v4935_v42  ;;  %2426 = vmatpush1.bf16.msra.mxu1 %v4940_v5 }
 0xb8d   :  { %2386 = vmatprep.subr.bf16.mxu0 %v4947_v0  ;;  %2427 = vmatprep.subr.bf16.mxu1 %v4952_v49 }
 0xb90   :  { %2387 = vmatpush1.bf16.msra.mxu0 %v4959_v7  ;;  %2428 = vmatpush1.bf16.msra.mxu1 %v4964_v63 }
 0xb91   :  { %2483 = vmatprep.subr.bf16.mxu0 %v5257_v31  ;;  %2524 = vmatprep.subr.bf16.mxu1 %v4757_v26 }
 0xc46   :  { %v2295_v54 = vpop.f32.mrb[76].mxu0  ;;  %v2336_v29 = vpop.f32.mrb[76].mxu1 }
 0xc47   :  { %v2343_v24 = vadd.f32 %v2295_v54, %v5689_v43  ;;  %v2345_v53 = vadd.f32 %v2336_v29, %v5690_v28  ;;  %v2297_v21 = vpop.f32.mrb[77].mxu0  ;;  %v2338_v58 = vpop.f32.mrb[77].mxu1 }
 0xc48   :  { %v2344_v60 = vadd.f32 %v2297_v21, %v5691_v2  ;;  %v2346_v51 = vadd.f32 %v2338_v58, %v5692_v50  ;;  %v2299_v62 = vpop.f32.mrb[78].mxu0  ;;  %v2340_v19 = vpop.f32.mrb[78].mxu1 }
 0xc49   :  { %v3098_v32 = vmul.f32 -1.442695, %v2343_v24  ;;  %v2300_v33 = vpop.f32.mrb[79].mxu0  ;;  %v2341_v20 = vpop.f32.mrb[79].mxu1  ;;  %v3100_v26 = vmul.f32 -1.442695, %v2345_v53 }
 0xc4a   :  { %v3099_v37 = vmul.f32 -1.442695, %v2344_v60  ;;  %v5319_v62 = vld [vmem:[%s5591_s5] ss:$16 sps:$4 sm:$0xff]   ;;  %v5325_v19 = vld [vmem:[%s5591_s5 + $0x8] ss:$16 sps:$4 sm:$0xff]  }
 0xc4b   :  { %3507 = vpow2.f32 %v3098_v32  ;;  %v5331_v32 = vld [vmem:[%s5591_s5 + $0x24] ss:$16 sps:$4 sm:$0xff]   ;;  %v5337_v33 = vld [vmem:[%s5591_s5 + $0x2c] ss:$16 sps:$4 sm:$0xff]   ;;  %v5345_v20 = vld [vmem:[%s5591_s5 + $0x20] ss:$16 sps:$4 sm:$0xff]  }
 0xc4c   :  { %3509 = vpow2.f32 %v3099_v37  ;;  %v5351_v37 = vld [vmem:[%s5591_s5 + $0x28] ss:$16 sps:$4 sm:$0xff]  }
 0xc4d   :  { %3511 = vtanh.f32 %v2346_v51 }
 0xc4e   :  { %3513 = vpow2.f32 %v3100_v26  ;;  %v5357_v26 = vld [vmem:[%s5591_s5 + $0x44] ss:$16 sps:$4 sm:$0xff]  }
 0xc55   :  { %v3508_v10 = vpop.eup %3507 }
 0xc56   :  { %v2356_v61 = vadd.f32 1.0, %v3508_v10  ;;  %v3510_v56 = vpop.eup %3509  ;;  %v5363_v10 = vld [vmem:[%s5591_s5 + $0x4c] ss:$16 sps:$4 sm:$0xff]  }
 0xc57   :  { %v2357_v35 = vadd.f32 1.0, %v3510_v56  ;;  %v3512_v36 = vpop.eup %3511  ;;  %v5375_v56 = vld [vmem:[%s5591_s5 + $0x48] ss:$16 sps:$4 sm:$0xff]  }
 0xc58   :  { %3515 = vrcp.f32 %v2356_v61  ;;  %v3514_v16 = vpop.eup %3513  ;;  %v5369_v61 = vld [vmem:[%s5591_s5 + $0x40] ss:$16 sps:$4 sm:$0xff]  }
 0xc59   :  { %3517 = vrcp.f32 %v2357_v35  ;;  %v2358_v54 = vadd.f32 1.0, %v3514_v16  ;;  %v5381_v35 = vld [vmem:[%s5591_s5 + $0x64] ss:$16 sps:$4 sm:$0xff]   ;;  %v5393_v16 = vld [vmem:[%s5591_s5 + $0x60] ss:$16 sps:$4 sm:$0xff]  }
 0xc5b   :  { %3519 = vrcp.f32 %v2358_v54  ;;  %v5417_v54 = vld [vmem:[%s5591_s5 + $0x80] ss:$16 sps:$4 sm:$0xff]  }
 0xc62   :  { %v3516_v12 = vpop.eup %3515 }
 0xc63   :  { %v2367_v38 = vmul.f32 %v3516_v12, %v3512_v36  ;;  %v3518_v23 = vpop.eup %3517  ;;  %v5387_v36 = vld [vmem:[%s5591_s5 + $0x6c] ss:$16 sps:$4 sm:$0xff]   ;;  %v5399_v12 = vld [vmem:[%s5591_s5 + $0x68] ss:$16 sps:$4 sm:$0xff]  }
 0xc64   :  { %v2366_v29 = vmul.f32 %v3518_v23, %v5219_v9  ;;  %v5411_v23 = vld [vmem:[%s5591_s5 + $0x8c] ss:$16 sps:$4 sm:$0xff]  }
 0xc65   :  { %v3520_v24 = vpop.eup %3519 }
 0xc66   :  { %v5266_v43 = vadd.f32 %v2367_v38, %v2366_v29  ;;  %v5405_v38 = vld [vmem:[%s5591_s5 + $0x84] ss:$16 sps:$4 sm:$0xff]   ;;  %v5423_v29 = vld [vmem:[%s5591_s5 + $0x88] ss:$16 sps:$4 sm:$0xff]  }
 0xc68   :  { %3521 = vtanh.f32 %v5266_v43 }
 0xc72   :  { %v3522_v28 = vpop.eup %3521 }
 0xc73   :  { %v2370_v53 = vmul.f32 %v3522_v28, %v3520_v24  ;;  %v5435_v24 = vld [vmem:[%s5591_s5 + $0xac] ss:$16 sps:$4 sm:$0xff]   ;;  %v5441_v28 = vld [vmem:[%s5591_s5 + $0xa0] ss:$16 sps:$4 sm:$0xff]  }
 0xc75   :  { %v2371_v21 = vpack.c.bf16 %v2370_v53, %v2370_v53  ;;  %v5447_v53 = vld [vmem:[%s5591_s5 + $0xa8] ss:$16 sps:$4 sm:$0xff]  }
 0xc77   :  { %2405 = vmatmul.mubr.bf16.vlgmr.msra.gmra.mrb[80].mxu0 %v2371_v21  ;;  %2446 = vmatmul.mubr.bf16.vlgmr.msra.gmra.mrb[80].mxu1 %v2371_v21  ;;  %v5453_v21 = vld [vmem:[%s5591_s5 + $0xc4] ss:$16 sps:$4 sm:$0xff]  }
 0xc78   :  { %2484 = vmatpush1.bf16.msra.mxu0 %v4776_v34  ;;  %2525 = vmatpush1.bf16.msra.mxu1 %v4781_v25  ;;  %v5305_v34 = vld [vmem:[%s5591_s5 + $0xc] ss:$16 sps:$4 sm:$0xff]  }
 0xc79   :  { %2485 = vmatprep.subr.bf16.mxu0 %v4793_v40  ;;  %2526 = vmatprep.subr.bf16.mxu1 %v4798_v41  ;;  %v5693_v41 = vld [vmem:[#allocation10_spill] sm:$0xff] }
 0xc7a   :  { %2515 = vmatprep.mubr.bf16.mxu0 %v5640_v17  ;;  %2556 = vmatprep.mubr.bf16.mxu1 %v5640_v17 }
 0xc7c   :  { %2486 = vmatpush1.bf16.msra.mxu0 %v4805_v27  ;;  %2527 = vmatpush1.bf16.msra.mxu1 %v4810_v48  ;;  %v5694_v48 = vld [vmem:[#allocation11_spill] sm:$0xff] }
 0xc7d   :  { %2487 = vmatprep.subr.bf16.mxu0 %v4817_v44  ;;  %2528 = vmatprep.subr.bf16.mxu1 %v4822_v39 }
 0xc80   :  { %2488 = vmatpush1.bf16.msra.mxu0 %v4831_v45  ;;  %2529 = vmatpush1.bf16.msra.mxu1 %v4836_v1  ;;  %v5695_v1 = vld [vmem:[#allocation12_spill] sm:$0xff] }
 0xc81   :  { %2489 = vmatprep.subr.bf16.mxu0 %v4843_v11  ;;  %2530 = vmatprep.subr.bf16.mxu1 %v4848_v13  ;;  %v5696_v13 = vld [vmem:[#allocation13_spill] sm:$0xff] }
 0xc84   :  { %2490 = vmatpush1.bf16.msra.mxu0 %v4857_v57  ;;  %2531 = vmatpush1.bf16.msra.mxu1 %v4862_v14 }
 0xc85   :  { %2491 = vmatprep.subr.bf16.mxu0 %v4869_v46  ;;  %2532 = vmatprep.subr.bf16.mxu1 %v4874_v15 }
 0xc88   :  { %2492 = vmatpush1.bf16.msra.mxu0 %v4883_v18  ;;  %2533 = vmatpush1.bf16.msra.mxu1 %v4888_v6 }
 0xc89   :  { %2493 = vmatprep.subr.bf16.mxu0 %v4895_v59  ;;  %2534 = vmatprep.subr.bf16.mxu1 %v4900_v55 }
 0xc8c   :  { %2494 = vmatpush1.bf16.msra.mxu0 %v4909_v52  ;;  %2535 = vmatpush1.bf16.msra.mxu1 %v4914_v4 }
 0xc8d   :  { %2495 = vmatprep.subr.bf16.mxu0 %v4921_v8  ;;  %2536 = vmatprep.subr.bf16.mxu1 %v4926_v47 }
 0xc90   :  { %2496 = vmatpush1.bf16.msra.mxu0 %v4935_v42  ;;  %2537 = vmatpush1.bf16.msra.mxu1 %v4940_v5 }
 0xc91   :  { %2497 = vmatprep.subr.bf16.mxu0 %v4947_v0  ;;  %2538 = vmatprep.subr.bf16.mxu1 %v4952_v49 }
 0xc94   :  { %2498 = vmatpush1.bf16.msra.mxu0 %v4959_v7  ;;  %2539 = vmatpush1.bf16.msra.mxu1 %v4964_v63 }
 0xc95   :  { %2594 = vmatprep.subr.bf16.mxu0 %v5257_v31  ;;  %2635 = vmatprep.subr.bf16.mxu1 %v5305_v34 }
 0xd4a   :  { %v2406_v25 = vpop.f32.mrb[80].mxu0  ;;  %v2447_v40 = vpop.f32.mrb[80].mxu1 }
 0xd4b   :  { %v2454_v27 = vadd.f32 %v2406_v25, %v5693_v41  ;;  %v2456_v44 = vadd.f32 %v2447_v40, %v5694_v48  ;;  %v2408_v39 = vpop.f32.mrb[81].mxu0  ;;  %v2449_v45 = vpop.f32.mrb[81].mxu1  ;;  %v5459_v25 = vld [vmem:[%s5591_s5 + $0xcc] ss:$16 sps:$4 sm:$0xff]   ;;  %v5465_v40 = vld [vmem:[%s5591_s5 + $0xc0] ss:$16 sps:$4 sm:$0xff]  }
 0xd4c   :  { %v2455_v11 = vadd.f32 %v2408_v39, %v5695_v1  ;;  %v2457_v57 = vadd.f32 %v2449_v45, %v5696_v13  ;;  %v2410_v14 = vpop.f32.mrb[82].mxu0  ;;  %v2451_v46 = vpop.f32.mrb[82].mxu1  ;;  %v5471_v41 = vld [vmem:[%s5591_s5 + $0xc8] ss:$16 sps:$4 sm:$0xff]   ;;  %v5483_v48 = vld [vmem:[%s5591_s5 + $0xec] ss:$16 sps:$4 sm:$0xff]  }
 0xd4d   :  { %v3101_v15 = vmul.f32 -1.442695, %v2454_v27  ;;  %v2411_v18 = vpop.f32.mrb[83].mxu0  ;;  %v2452_v6 = vpop.f32.mrb[83].mxu1  ;;  %v3103_v55 = vmul.f32 -1.442695, %v2456_v44 }
 0xd4e   :  { %v3102_v59 = vmul.f32 -1.442695, %v2455_v11  ;;  %v5477_v27 = vld [vmem:[%s5591_s5 + $0xe4] ss:$16 sps:$4 sm:$0xff]   ;;  %v5489_v44 = vld [vmem:[%s5591_s5 + $0xe0] ss:$16 sps:$4 sm:$0xff]  }
 0xd4f   :  { %3523 = vpow2.f32 %v3101_v15  ;;  %v5495_v39 = vld [vmem:[%s5591_s5 + $0xe8] ss:$16 sps:$4 sm:$0xff]   ;;  %v5697_v11 = vld [vmem:[#allocation14_spill] sm:$0xff]  ;;  %v5699_v18 = vld [vmem:[#allocation16_spill] sm:$0xff] }
 0xd50   :  { %3525 = vpow2.f32 %v3102_v59  ;;  %v5700_v59 = vld [vmem:[#allocation17_spill] sm:$0xff] }
 0xd51   :  { %3527 = vtanh.f32 %v2457_v57  ;;  %v5698_v57 = vld [vmem:[#allocation15_spill] sm:$0xff] }
 0xd52   :  { %3529 = vpow2.f32 %v3103_v55 }
 0xd59   :  { %v3524_v52 = vpop.eup %3523 }
 0xd5a   :  { %v2467_v4 = vadd.f32 1.0, %v3524_v52  ;;  %v3526_v8 = vpop.eup %3525 }
 0xd5b   :  { %v2468_v47 = vadd.f32 1.0, %v3526_v8  ;;  %v3528_v42 = vpop.eup %3527 }
 0xd5c   :  { %3531 = vrcp.f32 %v2467_v4  ;;  %v3530_v5 = vpop.eup %3529 }
 0xd5d   :  { %3533 = vrcp.f32 %v2468_v47  ;;  %v2469_v63 = vadd.f32 1.0, %v3530_v5 }
 0xd5f   :  { %3535 = vrcp.f32 %v2469_v63 }
 0xd66   :  { %v3532_v0 = vpop.eup %3531 }
 0xd67   :  { %v2478_v49 = vmul.f32 %v3532_v0, %v3528_v42  ;;  %v3534_v7 = vpop.eup %3533 }
 0xd68   :  { %v2477_v9 = vmul.f32 %v3534_v7, %v5266_v43  ;;  %v5429_v43 = vld [vmem:[%s5591_s5 + $0xa4] ss:$16 sps:$4 sm:$0xff]  }
 0xd69   :  { %v3536_v2 = vpop.eup %3535 }
 0xd6a   :  { %v5313_v58 = vadd.f32 %v2478_v49, %v2477_v9 }
 0xd6c   :  { %3537 = vtanh.f32 %v5313_v58 }
 0xd76   :  { %v3538_v60 = vpop.eup %3537 }
 0xd77   :  { %v2481_v50 = vmul.f32 %v3538_v60, %v3536_v2 }
 0xd79   :  { %v2482_v51 = vpack.c.bf16 %v2481_v50, %v2481_v50 }
 0xd7b   :  { %2516 = vmatmul.mubr.bf16.vlgmr.msra.gmra.mrb[84].mxu0 %v2482_v51  ;;  %2557 = vmatmul.mubr.bf16.vlgmr.msra.gmra.mrb[84].mxu1 %v2482_v51 }
 0xd7c   :  { %2595 = vmatpush1.bf16.msra.mxu0 %v5319_v62  ;;  %2636 = vmatpush1.bf16.msra.mxu1 %v5325_v19 }
 0xd7d   :  { %2596 = vmatprep.subr.bf16.mxu0 %v5331_v32  ;;  %2637 = vmatprep.subr.bf16.mxu1 %v5337_v33 }
 0xd7e   :  { %2626 = vmatprep.mubr.bf16.mxu0 %v5640_v17  ;;  %2667 = vmatprep.mubr.bf16.mxu1 %v5640_v17 }
 0xd80   :  { %2597 = vmatpush1.bf16.msra.mxu0 %v5345_v20  ;;  %2638 = vmatpush1.bf16.msra.mxu1 %v5351_v37 }
 0xd81   :  { %2598 = vmatprep.subr.bf16.mxu0 %v5357_v26  ;;  %2639 = vmatprep.subr.bf16.mxu1 %v5363_v10 }
 0xd84   :  { %2599 = vmatpush1.bf16.msra.mxu0 %v5369_v61  ;;  %2640 = vmatpush1.bf16.msra.mxu1 %v5375_v56 }
 0xd85   :  { %2600 = vmatprep.subr.bf16.mxu0 %v5381_v35  ;;  %2641 = vmatprep.subr.bf16.mxu1 %v5387_v36 }
 0xd88   :  { %2601 = vmatpush1.bf16.msra.mxu0 %v5393_v16  ;;  %2642 = vmatpush1.bf16.msra.mxu1 %v5399_v12 }
 0xd89   :  { %2602 = vmatprep.subr.bf16.mxu0 %v5405_v38  ;;  %2643 = vmatprep.subr.bf16.mxu1 %v5411_v23 }
 0xd8c   :  { %2603 = vmatpush1.bf16.msra.mxu0 %v5417_v54  ;;  %2644 = vmatpush1.bf16.msra.mxu1 %v5423_v29 }
 0xd8d   :  { %2604 = vmatprep.subr.bf16.mxu0 %v5429_v43  ;;  %2645 = vmatprep.subr.bf16.mxu1 %v5435_v24 }
 0xd90   :  { %2605 = vmatpush1.bf16.msra.mxu0 %v5441_v28  ;;  %2646 = vmatpush1.bf16.msra.mxu1 %v5447_v53 }
 0xd91   :  { %2606 = vmatprep.subr.bf16.mxu0 %v5453_v21  ;;  %2647 = vmatprep.subr.bf16.mxu1 %v5459_v25 }
 0xd94   :  { %2607 = vmatpush1.bf16.msra.mxu0 %v5465_v40  ;;  %2648 = vmatpush1.bf16.msra.mxu1 %v5471_v41 }
 0xd95   :  { %2608 = vmatprep.subr.bf16.mxu0 %v5477_v27  ;;  %2649 = vmatprep.subr.bf16.mxu1 %v5483_v48 }
 0xd98   :  { %2609 = vmatpush1.bf16.msra.mxu0 %v5489_v44  ;;  %2650 = vmatpush1.bf16.msra.mxu1 %v5495_v39 }
 0xd99   :  { %2705 = vmatprep.subr.bf16.mxu0 %v5257_v31  ;;  %2746 = vmatprep.subr.bf16.mxu1 %v5305_v34 }
 0xe4e   :  { %v2517_v45 = vpop.f32.mrb[84].mxu0  ;;  %v2558_v1 = vpop.f32.mrb[84].mxu1 }
 0xe4f   :  { %v2565_v13 = vadd.f32 %v2517_v45, %v5697_v11  ;;  %v2567_v14 = vadd.f32 %v2558_v1, %v5698_v57  ;;  %v2519_v46 = vpop.f32.mrb[85].mxu0  ;;  %v2560_v15 = vpop.f32.mrb[85].mxu1 }
 0xe50   :  { %v2566_v6 = vadd.f32 %v2519_v46, %v5699_v18  ;;  %v2568_v55 = vadd.f32 %v2560_v15, %v5700_v59  ;;  %v2521_v52 = vpop.f32.mrb[86].mxu0  ;;  %v2562_v4 = vpop.f32.mrb[86].mxu1  ;;  %v3652_v59 = vmov 0.0  }
 0xe51   :  { %v3104_v8 = vmul.f32 -1.442695, %v2565_v13  ;;  %v2522_v47 = vpop.f32.mrb[87].mxu0  ;;  %v2563_v42 = vpop.f32.mrb[87].mxu1  ;;  %v3106_v34 = vmul.f32 -1.442695, %v2567_v14 }
 0xe52   :  { %v3105_v31 = vmul.f32 -1.442695, %v2566_v6  ;;  %v3307_v6 = vld [vmem:[%s5593_s7] sm:$0xff]   ;;  %v3309_v52 = vld [vmem:[%s5593_s7 + $0x10] sm:$0xff]   ;;  %v3310_v4 = vld [vmem:[%s5593_s7 + $0x18] sm:$0xff]  }
 0xe53   :  { %3539 = vpow2.f32 %v3104_v8  ;;  %v3311_v8 = vld [vmem:[%s5593_s7 + $0x20] sm:$0xff]   ;;  %v3312_v47 = vld [vmem:[%s5593_s7 + $0x28] sm:$0xff]   ;;  %v3313_v42 = vld [vmem:[%s5593_s7 + $0x30] sm:$0xff]  }
 0xe54   :  { %3541 = vpow2.f32 %v3105_v31  ;;  %v3314_v31 = vld [vmem:[%s5593_s7 + $0x38] sm:$0xff]  }
 0xe55   :  { %3543 = vtanh.f32 %v2568_v55  ;;  %v3308_v55 = vld [vmem:[%s5593_s7 + $0x8] sm:$0xff]  }
 0xe56   :  { %3545 = vpow2.f32 %v3106_v34 }
 0xe5d   :  { %v3540_v5 = vpop.eup %3539 }
 0xe5e   :  { %v2578_v0 = vadd.f32 1.0, %v3540_v5  ;;  %v3542_v49 = vpop.eup %3541 }
 0xe5f   :  { %v2579_v7 = vadd.f32 1.0, %v3542_v49  ;;  %v3544_v63 = vpop.eup %3543 }
 0xe60   :  { %3547 = vrcp.f32 %v2578_v0  ;;  %v3546_v9 = vpop.eup %3545  ;;  %v5705_v0 = vld [vmem:[#allocation22_spill] sm:$0xff] }
 0xe61   :  { %3549 = vrcp.f32 %v2579_v7  ;;  %v2580_v51 = vadd.f32 1.0, %v3546_v9 }
 0xe63   :  { %3551 = vrcp.f32 %v2580_v51 }
 0xe6a   :  { %v3548_v2 = vpop.eup %3547 }
 0xe6b   :  { %v2589_v60 = vmul.f32 %v3548_v2, %v3544_v63  ;;  %v3550_v50 = vpop.eup %3549  ;;  %v5706_v2 = vld [vmem:[#allocation23_spill] sm:$0xff] }
 0xe6c   :  { %v2588_v45 = vmul.f32 %v3550_v50, %v5313_v58 }
 0xe6d   :  { %v3552_v11 = vpop.eup %3551 }
 0xe6e   :  { %v5505_v1 = vadd.f32 %v2589_v60, %v2588_v45 }
 0xe70   :  { %3553 = vtanh.f32 %v5505_v1 }
 0xe7a   :  { %v3554_v13 = vpop.eup %3553 }
 0xe7b   :  { %v2592_v57 = vmul.f32 %v3554_v13, %v3552_v11 }
 0xe7d   :  { %v2593_v14 = vpack.c.bf16 %v2592_v57, %v2592_v57 }
 0xe7f   :  { %2627 = vmatmul.mubr.bf16.vlgmr.msra.gmra.mrb[88].mxu0 %v2593_v14  ;;  %2668 = vmatmul.mubr.bf16.vlgmr.msra.gmra.mrb[88].mxu1 %v2593_v14 }
 0xe80   :  { %2706 = vmatpush1.bf16.msra.mxu0 %v5319_v62  ;;  %2747 = vmatpush1.bf16.msra.mxu1 %v5325_v19  ;;  %v5701_v62 = vld [vmem:[#allocation18_spill] sm:$0xff] }
 0xe81   :  { %2707 = vmatprep.subr.bf16.mxu0 %v5331_v32  ;;  %2748 = vmatprep.subr.bf16.mxu1 %v5337_v33  ;;  %v5702_v32 = vld [vmem:[#allocation19_spill] sm:$0xff] }
 0xe82   :  { %2737 = vmatprep.mubr.bf16.mxu0 %v5640_v17  ;;  %2778 = vmatprep.mubr.bf16.mxu1 %v5640_v17 }
 0xe84   :  { %2708 = vmatpush1.bf16.msra.mxu0 %v5345_v20  ;;  %2749 = vmatpush1.bf16.msra.mxu1 %v5351_v37 }
 0xe85   :  { %2709 = vmatprep.subr.bf16.mxu0 %v5357_v26  ;;  %2750 = vmatprep.subr.bf16.mxu1 %v5363_v10  ;;  %v5703_v26 = vld [vmem:[#allocation20_spill] sm:$0xff] }
 0xe88   :  { %2710 = vmatpush1.bf16.msra.mxu0 %v5369_v61  ;;  %2751 = vmatpush1.bf16.msra.mxu1 %v5375_v56  ;;  %v5704_v61 = vld [vmem:[#allocation21_spill] sm:$0xff] }
 0xe89   :  { %2711 = vmatprep.subr.bf16.mxu0 %v5381_v35  ;;  %2752 = vmatprep.subr.bf16.mxu1 %v5387_v36 }
 0xe8c   :  { %2712 = vmatpush1.bf16.msra.mxu0 %v5393_v16  ;;  %2753 = vmatpush1.bf16.msra.mxu1 %v5399_v12 }
 0xe8d   :  { %2713 = vmatprep.subr.bf16.mxu0 %v5405_v38  ;;  %2754 = vmatprep.subr.bf16.mxu1 %v5411_v23 }
 0xe90   :  { %2714 = vmatpush1.bf16.msra.mxu0 %v5417_v54  ;;  %2755 = vmatpush1.bf16.msra.mxu1 %v5423_v29 }
 0xe91   :  { %2715 = vmatprep.subr.bf16.mxu0 %v5429_v43  ;;  %2756 = vmatprep.subr.bf16.mxu1 %v5435_v24 }
 0xe94   :  { %2716 = vmatpush1.bf16.msra.mxu0 %v5441_v28  ;;  %2757 = vmatpush1.bf16.msra.mxu1 %v5447_v53 }
 0xe95   :  { %2717 = vmatprep.subr.bf16.mxu0 %v5453_v21  ;;  %2758 = vmatprep.subr.bf16.mxu1 %v5459_v25 }
 0xe98   :  { %2718 = vmatpush1.bf16.msra.mxu0 %v5465_v40  ;;  %2759 = vmatpush1.bf16.msra.mxu1 %v5471_v41 }
 0xe99   :  { %2719 = vmatprep.subr.bf16.mxu0 %v5477_v27  ;;  %2760 = vmatprep.subr.bf16.mxu1 %v5483_v48 }
 0xe9c   :  { %2720 = vmatpush1.bf16.msra.mxu0 %v5489_v44  ;;  %2761 = vmatpush1.bf16.msra.mxu1 %v5495_v39 }
 0xe9d   :  { %3134 = vmatprep.subr.bf16.mxu0 %v3652_v59 }
 0xf52   :  { %v2628_v17 = vpop.f32.mrb[88].mxu0  ;;  %v2669_v58 = vpop.f32.mrb[88].mxu1 }
 0xf53   :  { %v2676_v19 = vadd.f32 %v2628_v17, %v5701_v62  ;;  %v2678_v33 = vadd.f32 %v2669_v58, %v5702_v32  ;;  %v2630_v20 = vpop.f32.mrb[89].mxu0  ;;  %v2671_v37 = vpop.f32.mrb[89].mxu1 }
 0xf54   :  { %v2677_v10 = vadd.f32 %v2630_v20, %v5703_v26  ;;  %v2679_v56 = vadd.f32 %v2671_v37, %v5704_v61  ;;  %v2632_v35 = vpop.f32.mrb[90].mxu0  ;;  %v2673_v36 = vpop.f32.mrb[90].mxu1 }
 0xf55   :  { %v3107_v16 = vmul.f32 -1.442695, %v2676_v19  ;;  %v2633_v12 = vpop.f32.mrb[91].mxu0  ;;  %v2674_v38 = vpop.f32.mrb[91].mxu1  ;;  %v3109_v54 = vmul.f32 -1.442695, %v2678_v33 }
 0xf56   :  { %v3108_v23 = vmul.f32 -1.442695, %v2677_v10  ;;  %v3116_v38 = vld [vmem:[%s5594_s8] ss:$0 sm:$0xff] }
 0xf57   :  { %3555 = vpow2.f32 %v3107_v16 }
 0xf58   :  { %3557 = vpow2.f32 %v3108_v23 }
 0xf59   :  { %3559 = vtanh.f32 %v2679_v56 }
 0xf5a   :  { %3561 = vpow2.f32 %v3109_v54 }
 0xf61   :  { %v3556_v29 = vpop.eup %3555 }
 0xf62   :  { %v2689_v43 = vadd.f32 1.0, %v3556_v29  ;;  %v3558_v24 = vpop.eup %3557 }
 0xf63   :  { %v2690_v28 = vadd.f32 1.0, %v3558_v24  ;;  %v3560_v53 = vpop.eup %3559 }
 0xf64   :  { %3563 = vrcp.f32 %v2689_v43  ;;  %v3562_v21 = vpop.eup %3561 }
 0xf65   :  { %3565 = vrcp.f32 %v2690_v28  ;;  %v2691_v27 = vadd.f32 1.0, %v3562_v21 }
 0xf67   :  { %3567 = vrcp.f32 %v2691_v27 }
 0xf6e   :  { %v3564_v25 = vpop.eup %3563 }
 0xf6f   :  { %v2700_v40 = vmul.f32 %v3564_v25, %v3560_v53  ;;  %v3566_v41 = vpop.eup %3565 }
 0xf70   :  { %v2699_v48 = vmul.f32 %v3566_v41, %v5505_v1 }
 0xf71   :  { %v3568_v39 = vpop.eup %3567 }
 0xf72   :  { %v5545_v44 = vadd.f32 %v2700_v40, %v2699_v48 }
 0xf74   :  { %3569 = vtanh.f32 %v5545_v44 }
 0xf7e   :  { %v3570_v46 = vpop.eup %3569 }
 0xf7f   :  { %v2703_v15 = vmul.f32 %v3570_v46, %v3568_v39 }
 0xf81   :  { %v2704_v18 = vpack.c.bf16 %v2703_v15, %v2703_v15 }
 0xf83   :  { %2738 = vmatmul.mubr.bf16.vlgmr.msra.gmra.mrb[92].mxu0 %v2704_v18  ;;  %2779 = vmatmul.mubr.bf16.vlgmr.msra.gmra.mrb[92].mxu1 %v2704_v18 }
 0xf84   :  { %3135 = vmatpush3.bf16.msra.mxu0 %v3307_v6  ;;  %3150 = vmatprep.mubr.msk.bf16.mxu0 %vm3653_vm2, %v3652_v59 }
 0xf85   :  { %3136 = vmatprep.subr.bf16.mxu0 %v3652_v59 }
 0xf88   :  { %3137 = vmatpush3.bf16.msra.mxu0 %v3308_v55 }
 0xf89   :  { %3138 = vmatprep.subr.bf16.mxu0 %v3652_v59 }
 0xf8c   :  { %3139 = vmatpush3.bf16.msra.mxu0 %v3309_v52 }
 0xf8d   :  { %3140 = vmatprep.subr.bf16.mxu0 %v3652_v59 }
 0xf90   :  { %3141 = vmatpush3.bf16.msra.mxu0 %v3310_v4 }
 0xf91   :  { %3142 = vmatprep.subr.bf16.mxu0 %v3652_v59 }
 0xf94   :  { %3143 = vmatpush3.bf16.msra.mxu0 %v3311_v8 }
 0xf95   :  { %3144 = vmatprep.subr.bf16.mxu0 %v3652_v59 }
 0xf98   :  { %3145 = vmatpush3.bf16.msra.mxu0 %v3312_v47 }
 0xf99   :  { %3146 = vmatprep.subr.bf16.mxu0 %v3652_v59 }
 0xf9c   :  { %3147 = vmatpush3.bf16.msra.mxu0 %v3313_v42 }
 0xf9d   :  { %3148 = vmatprep.subr.bf16.mxu0 %v3652_v59 }
 0xfa0   :  { %3149 = vmatpush3.bf16.msra.mxu0 %v3314_v31 }
0x1056   :  { %v2739_v34 = vpop.f32.mrb[92].mxu0  ;;  %v2780_v5 = vpop.f32.mrb[92].mxu1 }
0x1057   :  { %v2787_v49 = vadd.f32 %v2739_v34, %v5705_v0  ;;  %v2789_v7 = vadd.f32 %v2780_v5, %v5113_v30  ;;  %v2741_v63 = vpop.f32.mrb[93].mxu0  ;;  %v2782_v9 = vpop.f32.mrb[93].mxu1 }
0x1058   :  { %v2788_v60 = vadd.f32 %v2741_v63, %v5706_v2  ;;  %v2790_v50 = vadd.f32 %v2782_v9, %v5119_v3  ;;  %v2743_v51 = vpop.f32.mrb[94].mxu0  ;;  %v2784_v45 = vpop.f32.mrb[94].mxu1 }
0x1059   :  { %v3110_v1 = vmul.f32 -1.442695, %v2787_v49  ;;  %v2744_v11 = vpop.f32.mrb[95].mxu0  ;;  %v2785_v13 = vpop.f32.mrb[95].mxu1  ;;  %v3112_v14 = vmul.f32 -1.442695, %v2789_v7 }
0x105a   :  { %v3111_v57 = vmul.f32 -1.442695, %v2788_v60 }
0x105b   :  { %3571 = vpow2.f32 %v3110_v1 }
0x105c   :  { %3573 = vpow2.f32 %v3111_v57 }
0x105d   :  { %3575 = vtanh.f32 %v2790_v50 }
0x105e   :  { %3577 = vpow2.f32 %v3112_v14 }
0x1065   :  { %v3572_v17 = vpop.eup %3571 }
0x1066   :  { %v2800_v58 = vadd.f32 1.0, %v3572_v17  ;;  %v3574_v62 = vpop.eup %3573 }
0x1067   :  { %v2801_v30 = vadd.f32 1.0, %v3574_v62  ;;  %v3576_v19 = vpop.eup %3575 }
0x1068   :  { %3579 = vrcp.f32 %v2800_v58  ;;  %v3578_v32 = vpop.eup %3577 }
0x1069   :  { %3581 = vrcp.f32 %v2801_v30  ;;  %v2802_v37 = vadd.f32 1.0, %v3578_v32 }
0x106b   :  { %3583 = vrcp.f32 %v2802_v37 }
0x1072   :  { %v3580_v3 = vpop.eup %3579 }
0x1073   :  { %v2811_v33 = vmul.f32 %v3580_v3, %v3576_v19  ;;  %v3582_v20 = vpop.eup %3581 }
0x1074   :  { %v2810_v26 = vmul.f32 %v3582_v20, %v5545_v44 }
0x1075   :  { %v3584_v61 = vpop.eup %3583 }
0x1076   :  { %v2812_v10 = vadd.f32 %v2811_v33, %v2810_v26 }
0x1078   :  { %3585 = vtanh.f32 %v2812_v10 }
0x1082   :  { %v3586_v56 = vpop.eup %3585 }
0x1083   :  { %v2814_v35 = vmul.f32 %v3586_v56, %v3584_v61 }
0x1085   :  { %v2839_v16 = vsel %vm35_vm1, %v2814_v35, %v5136_v22 }
0x1086   :  { %v2856_v12 = vpack.c.bf16 %v2839_v16, %v2839_v16 }
0x1088   :  { %3151 = vmatmul.mubr.bf16.vlgmr.msra.gmra.mrb[96].mxu0 %v2856_v12 }
0x115b   :  { %v2946_v23 = vpop.f32.mrb[96].mxu0 }
0x115c   :  { %v2947_v54 = vadd.f32 %v3116_v38, %v2946_v23  ;;  %v3152_v29 = vpop.f32.mrb[97].mxu0 }
0x115d   :  { %v2949_v43 = vpop.f32.mrb[98].mxu0 }
0x115e   :  { %2952 = vst [vmem:[%s5595_s9] sm:$0xff] %v2947_v54  ;;  %v3153_v24 = vpop.f32.mrb[99].mxu0 }

</bundles_post_ra>
